<compile_context>
chip_gen: v6e
topology: v6e:2x2x1
jax: 0.10.0
libtpu: 0.0.40
codegen_flags: <defaults>
</compile_context>

<pallas_src>
import math
import numpy as np
import jax
import jax.numpy as jnp
from jax import lax
from jax.experimental import pallas as pl
from jax.experimental.pallas import tpu as pltpu

# ---------------- small deterministic config ----------------
B = 2
T = 8                        # sequence length
BT = B * T
D_MODEL = 32                 # encoder_hidden
N_HEAD = 2                   # encoder_head
D_K = D_MODEL // N_HEAD      # 16
D_V = D_K
N_LAYERS = 2                 # encoder_layer
D_INNER = 64                 # conv_filter_size
KERNEL_SIZES = (9, 1)        # conv_kernel_size
K1 = KERNEL_SIZES[0]
CPAD = (K1 - 1) // 2
V_SRC = 40                   # n_src_vocab = len(symbols) + 1 (small stand-in vocab)
PAD_ID = 0                   # Constants.PAD
MAX_SEQ_LEN_CFG = 64         # config['max_seq_len'] -> n_position = 65
LN_EPS = 1e-5
NEG_INF = -1e9


def get_sinusoid_encoding_table(n_position, d_hid):
    pos = np.arange(n_position, dtype=np.float64)[:, None]
    hid = np.arange(d_hid)[None, :]
    angle = pos / np.power(10000.0, 2 * (hid // 2) / d_hid)
    table = angle.copy()
    table[:, 0::2] = np.sin(angle[:, 0::2])
    table[:, 1::2] = np.cos(angle[:, 1::2])
    return jnp.asarray(table, dtype=jnp.float32)


def _detect_groups():
    """Batch-parallel grid only on dual-TensorCore chips (v7x); 1 step elsewhere."""
    try:
        kind = jax.devices()[0].device_kind.lower()
    except Exception:
        return 1
    return B if "v7" in kind else 1


GROUPS = _detect_groups()
ROWS = BT // GROUPS          # rows (flattened batch*time) handled per grid step

# ---- precomputed constants: same-batch mask + conv-tap shift/boundary matrices ----
_BATCH_IDS = np.repeat(np.arange(B), T)


def _build_shift_mats():
    # S[j, i, s] = 1  iff  row i takes its tap-j contribution from row s = i + (j - CPAD),
    # s within the sequence and in the same batch (zero-padding at sequence boundaries).
    S = np.zeros((K1, BT, BT), dtype=np.float32)
    for j in range(K1):
        off = j - CPAD
        for i in range(BT):
            srci = i + off
            if 0 <= srci < BT and _BATCH_IDS[srci] == _BATCH_IDS[i]:
                S[j, i, srci] = 1.0
    return S


_SHIFT_FULL_NP = _build_shift_mats()
SAME_BATCH = jnp.asarray((_BATCH_IDS[:, None] == _BATCH_IDS[None, :]).astype(np.float32))
SHIFT_FULL = jnp.asarray(_SHIFT_FULL_NP)                                      # (K1, BT, BT)
SHIFT_BLOCKS = jnp.asarray(np.stack(
    [_SHIFT_FULL_NP[:, g * T:(g + 1) * T, g * T:(g + 1) * T] for g in range(B)], axis=0))  # (B,K1,T,T)


def _layer_norm(x, gamma, beta):
    mean = jnp.mean(x, axis=-1, keepdims=True)
    var = jnp.mean(jnp.square(x - mean), axis=-1, keepdims=True)
    return (x - mean) * jax.lax.rsqrt(var + LN_EPS) * gamma + beta


# ---------------- fused Pallas kernel (whole encoder for one grid step) ----------------
def encoder_kernel(x_ref, masks_ref, keep_ref,
                   wqkv_ref, bqkv_ref, wo_ref, w1_ref, w2_ref, cb1_ref, vecs_ref,
                   out_ref):
    f32 = jnp.float32
    r = x_ref.shape[0]                   # rows handled by this grid step (T or B*T)

    x = x_ref[...]                       # (r, D) f32
    keep = keep_ref[...]                 # (r, 1)  1.0 = valid, 0.0 = padded
    attn_bias = masks_ref[0]             # (r, r)  0 where attendable, -1e9 where masked
    scale = 1.0 / math.sqrt(D_K)

    for l in range(N_LAYERS):            # static unroll over layers
        # ---- multi-head self-attention (per-head weights; no lane slicing, no k^T) ----
        att = jnp.zeros((r, D_MODEL), f32) + vecs_ref[l, 0]          # start from output bias b_o
        for h in range(N_HEAD):
            wq = wqkv_ref[l, 0, h].astype(f32)
            wk = wqkv_ref[l, 1, h].astype(f32)
            wv = wqkv_ref[l, 2, h].astype(f32)
            qh = jnp.dot(x, wq, preferred_element_type=f32) + bqkv_ref[l, 0, h]
            kh = jnp.dot(x, wk, preferred_element_type=f32) + bqkv_ref[l, 1, h]
            vh = jnp.dot(x, wv, preferred_element_type=f32) + bqkv_ref[l, 2, h]
            s = lax.dot_general(qh, kh, dimension_numbers=(((1,), (1,)), ((), ())),
                                preferred_element_type=f32) * scale + attn_bias
            m = jnp.max(s, axis=-1, keepdims=True)
            e = jnp.exp(s - m)
            p = e * pl.reciprocal(jnp.sum(e, axis=-1, keepdims=True), approx=True)
            ctx = jnp.dot(p, vh, preferred_element_type=f32)                      # (r, D_V)
            att = att + jnp.dot(ctx, wo_ref[l, h].astype(f32),
                                preferred_element_type=f32)
        x = _layer_norm(att + x, vecs_ref[l, 1], vecs_ref[l, 2]) * keep           # masked_fill(pad,0)

        # ---- position-wise FFN: Conv1d(k=9) as per-tap shift-matmul accumulation ----
        h1 = jnp.zeros((r, D_INNER), f32) + cb1_ref[l]
        for j in range(K1):
            xs = jnp.dot(masks_ref[1 + j], x, preferred_element_type=f32)         # shifted rows
            h1 = h1 + jnp.dot(xs, w1_ref[l, j].astype(f32), preferred_element_type=f32)
        h1 = jnp.maximum(h1, 0.0)
        y = jnp.dot(h1, w2_ref[l].astype(f32), preferred_element_type=f32) + vecs_ref[l, 3]
        x = _layer_norm(y + x, vecs_ref[l, 4], vecs_ref[l, 5]) * keep             # masked_fill(pad,0)

    out_ref[...] = x


def _build_pallas_call(groups):
    r = BT // groups
    z3 = lambda g: (0, 0, 0)
    z4 = lambda g: (0, 0, 0, 0)
    z5 = lambda g: (0, 0, 0, 0, 0)
    in_specs = [
        pl.BlockSpec((r, D_MODEL), lambda g: (g, 0)),                    # x0 (embedded + pos)
        pl.BlockSpec((None, K1 + 1, r, r), lambda g: (g, 0, 0, 0)),      # [attn bias, shift mats]
        pl.BlockSpec((None, r, 1), lambda g: (g, 0, 0)),                 # keep mask
        pl.BlockSpec((N_LAYERS, 3, N_HEAD, D_MODEL, D_K), z5),           # W_q/W_k/W_v (bf16)
        pl.BlockSpec((N_LAYERS, 3, N_HEAD, 1, D_K), z5),                 # b_q/b_k/b_v
        pl.BlockSpec((N_LAYERS, N_HEAD, D_V, D_MODEL), z4),              # W_o per head (bf16)
        pl.BlockSpec((N_LAYERS, K1, D_MODEL, D_INNER), z4),              # conv1 taps (bf16)
        pl.BlockSpec((N_LAYERS, D_INNER, D_MODEL), z3),                  # conv2 (bf16)
        pl.BlockSpec((N_LAYERS, 1, D_INNER), z3),                        # conv1 bias
        pl.BlockSpec((N_LAYERS, 6, 1, D_MODEL), z4),                     # packed small vectors
    ]
    return pl.pallas_call(
        encoder_kernel,
        out_shape=jax.ShapeDtypeStruct((BT, D_MODEL), jnp.float32),
        grid=(groups,),
        in_specs=in_specs,
        out_specs=pl.BlockSpec((r, D_MODEL), lambda g: (g, 0)),
        compiler_params=pltpu.CompilerParams(dimension_semantics=("parallel",)),
    )


_ENCODER_CALL = _build_pallas_call(GROUPS)


# ---------------- wrapper ----------------
def _encoder_forward(tokens, mask_bool, params):
    # XLA-side: tiny embedding gather + positional add (overlaps with kernel launch).
    x0 = (params['emb'][tokens] + params['pos'][None, :, :]).reshape(BT, D_MODEL)
    padk = mask_bool.reshape(BT).astype(jnp.float32)
    keep = (1.0 - padk).reshape(GROUPS, ROWS, 1)
    attn_bias = jnp.where((SAME_BATCH > 0.5) & (padk[None, :] < 0.5),
                          0.0, NEG_INF).astype(jnp.float32)
    if GROUPS == 1:
        masks = jnp.concatenate([attn_bias[None], SHIFT_FULL], axis=0)[None]      # (1,K1+1,BT,BT)
    else:
        bias_blk = jnp.stack([attn_bias[g * T:(g + 1) * T, g * T:(g + 1) * T]
                              for g in range(B)], axis=0)                         # (B,T,T)
        masks = jnp.concatenate([bias_blk[:, None], SHIFT_BLOCKS], axis=1)        # (B,K1+1,T,T)

    out = _ENCODER_CALL(
        x0.astype(jnp.float32), masks, keep,
        params['w_qkv'].astype(jnp.bfloat16), params['b_qkv'],
        params['wo'].astype(jnp.bfloat16), params['w1'].astype(jnp.bfloat16),
        params['w2'].astype(jnp.bfloat16), params['cb1'], params['vecs'])
    return out.reshape(B, T, D_MODEL)


encoder_forward = jax.jit(_encoder_forward)


# ---------------- deterministic parameter init ----------------
def init_params(seed=0):
    key = jax.random.PRNGKey(seed)

    def nxt():
        nonlocal key
        key, sub = jax.random.split(key)
        return sub

    s = 0.05

    def rnd(shape):
        return jax.random.normal(nxt(), shape, jnp.float32) * s

    def bf16_round(x):
        # Weights are shipped to the kernel as bf16; pre-round so that transport is lossless
        # and the f32 reference sees exactly the same values.
        return x.astype(jnp.bfloat16).astype(jnp.float32)

    emb = rnd((V_SRC, D_MODEL)).at[PAD_ID].set(0.0)           # nn.Embedding(padding_idx=PAD)
    pos = get_sinusoid_encoding_table(MAX_SEQ_LEN_CFG + 1, D_MODEL)[:T, :]   # (T, D)

    ones = jnp.ones((N_LAYERS, 1, D_MODEL), jnp.float32)
    zeros = jnp.zeros((N_LAYERS, 1, D_MODEL), jnp.float32)
    bo = rnd((N_LAYERS, 1, D_MODEL))
    cb2 = rnd((N_LAYERS, 1, D_MODEL))
    # packed small per-layer vectors: [b_o, ln1_g, ln1_b, cb2, ln2_g, ln2_b]
    vecs = jnp.stack([bo, ones, zeros, cb2, ones, zeros], axis=1)            # (L, 6, 1, D)

    return dict(
        emb=emb, pos=pos,
        w_qkv=bf16_round(rnd((N_LAYERS, 3, N_HEAD, D_MODEL, D_K))),
        b_qkv=rnd((N_LAYERS, 3, N_HEAD, 1, D_K)),
        wo=bf16_round(rnd((N_LAYERS, N_HEAD, D_V, D_MODEL))),
        w1=bf16_round(rnd((N_LAYERS, K1, D_MODEL, D_INNER))),
        cb1=rnd((N_LAYERS, 1, D_INNER)),
        w2=bf16_round(rnd((N_LAYERS, D_INNER, D_MODEL))),
        vecs=vecs,
    )


# ---------------- pure-JAX reference (for verification) ----------------
def reference_forward(tokens, mask_bool, params):
    x = params['emb'][tokens] + params['pos'][None, :, :]                     # (B,T,D)
    keypad = mask_bool[:, None, :]                                            # (B,1,T)
    outpad = mask_bool[:, :, None]                                            # (B,T,1)
    for l in range(N_LAYERS):
        att = jnp.zeros_like(x) + params['vecs'][l, 0]
        for h in range(N_HEAD):
            qh = x @ params['w_qkv'][l, 0, h] + params['b_qkv'][l, 0, h]
            kh = x @ params['w_qkv'][l, 1, h] + params['b_qkv'][l, 1, h]
            vh = x @ params['w_qkv'][l, 2, h] + params['b_qkv'][l, 2, h]
            s = jnp.einsum('bqd,bkd->bqk', qh, kh) / math.sqrt(D_K)
            s = jnp.where(keypad, NEG_INF, s)
            p = jax.nn.softmax(s, axis=-1)
            att = att + jnp.einsum('bqk,bkd->bqd', p, vh) @ params['wo'][l, h]
        x = _layer_norm(att + x, params['vecs'][l, 1], params['vecs'][l, 2])
        x = jnp.where(outpad, 0.0, x)

        xp = jnp.pad(x, ((0, 0), (CPAD, CPAD), (0, 0)))
        h1 = jnp.zeros((B, T, D_INNER), jnp.float32) + params['cb1'][l]
        for j in range(K1):
            h1 = h1 + xp[:, j:j + T, :] @ params['w1'][l, j]
        h1 = jnp.maximum(h1, 0.0)
        y = h1 @ params['w2'][l] + params['vecs'][l, 3]
        x = _layer_norm(y + x, params['vecs'][l, 4], params['vecs'][l, 5])
        x = jnp.where(outpad, 0.0, x)
    return x


if __name__ == "__main__":
    key = jax.random.PRNGKey(0)
    key, tk = jax.random.split(key)

    lengths = jnp.array([T, 5], dtype=jnp.int32)
    mask_bool = jnp.arange(T)[None, :] >= lengths[:, None]          # True = padded position
    tokens = jax.random.randint(tk, (B, T), 1, V_SRC, dtype=jnp.int32)
    tokens = jnp.where(mask_bool, PAD_ID, tokens)

    params = init_params(seed=0)

    out = encoder_forward(tokens, mask_bool, params)
    jax.block_until_ready(out)

    ref = reference_forward(tokens, mask_bool, params)
    assert out.shape == (B, T, D_MODEL)
    max_err = float(jnp.max(jnp.abs(out - ref)))
    assert jnp.allclose(out, ref, atol=5e-3, rtol=5e-3), f"max abs err = {max_err}"

    print("KERNEL_OK")
</pallas_src>

<mosaic_0001>
module attributes {stable_mosaic.version = 11 : i64} {
  func.func @encoder_kernel(%arg0: i32, %arg1: memref<16x32xf32, #tpu.memory_space<vmem>>, %arg2: memref<1x10x16x16xf32, #tpu.memory_space<vmem>>, %arg3: memref<1x16x1xf32, #tpu.memory_space<vmem>>, %arg4: memref<2x3x2x32x16xbf16, #tpu.memory_space<vmem>>, %arg5: memref<2x3x2x1x16xf32, #tpu.memory_space<vmem>>, %arg6: memref<2x2x16x32xbf16, #tpu.memory_space<vmem>>, %arg7: memref<2x9x32x64xbf16, #tpu.memory_space<vmem>>, %arg8: memref<2x64x32xbf16, #tpu.memory_space<vmem>>, %arg9: memref<2x1x64xf32, #tpu.memory_space<vmem>>, %arg10: memref<2x6x1x32xf32, #tpu.memory_space<vmem>>, %arg11: memref<16x32xf32, #tpu.memory_space<vmem>>) attributes {dimension_semantics = [#tpu.dimension_semantics<parallel>], iteration_bounds = array<i64: 1>, scalar_prefetch = 0 : i64, scratch_operands = 0 : i64, tpu.core_type = #tpu.core_type<tc>, window_params = [{transform_indices = @transform_0, window_bounds = array<i64: 16, 32>}, {transform_indices = @transform_1, window_bounds = array<i64: 1, 10, 16, 16>}, {transform_indices = @transform_2, window_bounds = array<i64: 1, 16, 1>}, {pipeline_mode = #tpu.pipeline_mode<synchronous>, transform_indices = @transform_3, window_bounds = array<i64: 2, 3, 2, 32, 16>}, {pipeline_mode = #tpu.pipeline_mode<synchronous>, transform_indices = @transform_4, window_bounds = array<i64: 2, 3, 2, 1, 16>}, {pipeline_mode = #tpu.pipeline_mode<synchronous>, transform_indices = @transform_5, window_bounds = array<i64: 2, 2, 16, 32>}, {pipeline_mode = #tpu.pipeline_mode<synchronous>, transform_indices = @transform_6, window_bounds = array<i64: 2, 9, 32, 64>}, {pipeline_mode = #tpu.pipeline_mode<synchronous>, transform_indices = @transform_7, window_bounds = array<i64: 2, 64, 32>}, {pipeline_mode = #tpu.pipeline_mode<synchronous>, transform_indices = @transform_8, window_bounds = array<i64: 2, 1, 64>}, {pipeline_mode = #tpu.pipeline_mode<synchronous>, transform_indices = @transform_9, window_bounds = array<i64: 2, 6, 1, 32>}, {transform_indices = @transform_10, window_bounds = array<i64: 16, 32>}]} {
    %c0 = arith.constant 0 : index
    %c0_0 = arith.constant 0 : index
    %0 = vector.load %arg1[%c0, %c0_0] : memref<16x32xf32, #tpu.memory_space<vmem>>, vector<16x32xf32>
    %c0_1 = arith.constant 0 : index
    %c0_2 = arith.constant 0 : index
    %c0_3 = arith.constant 0 : index
    %1 = vector.load %arg3[%c0_1, %c0_2, %c0_3] : memref<1x16x1xf32, #tpu.memory_space<vmem>>, vector<1x16x1xf32>
    %2 = vector.shape_cast %1 : vector<1x16x1xf32> to vector<16x1xf32>
    %c0_4 = arith.constant 0 : index
    %c0_5 = arith.constant 0 : index
    %c0_6 = arith.constant 0 : index
    %c0_7 = arith.constant 0 : index
    %3 = vector.load %arg2[%c0_4, %c0_5, %c0_6, %c0_7] : memref<1x10x16x16xf32, #tpu.memory_space<vmem>>, vector<1x1x16x16xf32>
    %4 = vector.shape_cast %3 : vector<1x1x16x16xf32> to vector<16x16xf32>
    %cst = arith.constant 0.000000e+00 : f32
    %5 = vector.broadcast %cst : f32 to vector<16x32xf32>
    %c0_8 = arith.constant 0 : index
    %c0_9 = arith.constant 0 : index
    %c0_10 = arith.constant 0 : index
    %c0_11 = arith.constant 0 : index
    %6 = vector.load %arg10[%c0_8, %c0_9, %c0_10, %c0_11] : memref<2x6x1x32xf32, #tpu.memory_space<vmem>>, vector<1x1x1x32xf32>
    %7 = vector.shape_cast %6 : vector<1x1x1x32xf32> to vector<1x32xf32>
    %8 = vector.broadcast %7 : vector<1x32xf32> to vector<16x32xf32>
    %9 = arith.addf %5, %8 : vector<16x32xf32>
    %c0_12 = arith.constant 0 : index
    %c0_13 = arith.constant 0 : index
    %c0_14 = arith.constant 0 : index
    %c0_15 = arith.constant 0 : index
    %c0_16 = arith.constant 0 : index
    %10 = vector.load %arg4[%c0_12, %c0_13, %c0_14, %c0_15, %c0_16] : memref<2x3x2x32x16xbf16, #tpu.memory_space<vmem>>, vector<1x1x1x32x16xbf16>
    %11 = vector.shape_cast %10 : vector<1x1x1x32x16xbf16> to vector<32x16xbf16>
    %12 = arith.extf %11 : vector<32x16xbf16> to vector<32x16xf32>
    %c0_17 = arith.constant 0 : index
    %c1 = arith.constant 1 : index
    %c0_18 = arith.constant 0 : index
    %c0_19 = arith.constant 0 : index
    %c0_20 = arith.constant 0 : index
    %13 = vector.load %arg4[%c0_17, %c1, %c0_18, %c0_19, %c0_20] : memref<2x3x2x32x16xbf16, #tpu.memory_space<vmem>>, vector<1x1x1x32x16xbf16>
    %14 = vector.shape_cast %13 : vector<1x1x1x32x16xbf16> to vector<32x16xbf16>
    %15 = arith.extf %14 : vector<32x16xbf16> to vector<32x16xf32>
    %c0_21 = arith.constant 0 : index
    %c2 = arith.constant 2 : index
    %c0_22 = arith.constant 0 : index
    %c0_23 = arith.constant 0 : index
    %c0_24 = arith.constant 0 : index
    %16 = vector.load %arg4[%c0_21, %c2, %c0_22, %c0_23, %c0_24] : memref<2x3x2x32x16xbf16, #tpu.memory_space<vmem>>, vector<1x1x1x32x16xbf16>
    %17 = vector.shape_cast %16 : vector<1x1x1x32x16xbf16> to vector<32x16xbf16>
    %18 = arith.extf %17 : vector<32x16xbf16> to vector<32x16xf32>
    %cst_25 = arith.constant dense<0.000000e+00> : vector<16x16xf32>
    %19 = tpu.matmul %0, %12, %cst_25 {dimension_numbers = #tpu.dot_dimension_numbers<[1], [0], [0], [1], [0, 0, 1, 1], [], []>} : vector<16x32xf32>, vector<32x16xf32>, vector<16x16xf32> -> vector<16x16xf32>
    %c0_26 = arith.constant 0 : index
    %c0_27 = arith.constant 0 : index
    %c0_28 = arith.constant 0 : index
    %c0_29 = arith.constant 0 : index
    %c0_30 = arith.constant 0 : index
    %20 = vector.load %arg5[%c0_26, %c0_27, %c0_28, %c0_29, %c0_30] : memref<2x3x2x1x16xf32, #tpu.memory_space<vmem>>, vector<1x1x1x1x16xf32>
    %21 = vector.shape_cast %20 : vector<1x1x1x1x16xf32> to vector<1x16xf32>
    %22 = vector.broadcast %21 : vector<1x16xf32> to vector<16x16xf32>
    %23 = arith.addf %19, %22 : vector<16x16xf32>
    %cst_31 = arith.constant dense<0.000000e+00> : vector<16x16xf32>
    %24 = tpu.matmul %0, %15, %cst_31 {dimension_numbers = #tpu.dot_dimension_numbers<[1], [0], [0], [1], [0, 0, 1, 1], [], []>} : vector<16x32xf32>, vector<32x16xf32>, vector<16x16xf32> -> vector<16x16xf32>
    %c0_32 = arith.constant 0 : index
    %c1_33 = arith.constant 1 : index
    %c0_34 = arith.constant 0 : index
    %c0_35 = arith.constant 0 : index
    %c0_36 = arith.constant 0 : index
    %25 = vector.load %arg5[%c0_32, %c1_33, %c0_34, %c0_35, %c0_36] : memref<2x3x2x1x16xf32, #tpu.memory_space<vmem>>, vector<1x1x1x1x16xf32>
    %26 = vector.shape_cast %25 : vector<1x1x1x1x16xf32> to vector<1x16xf32>
    %27 = vector.broadcast %26 : vector<1x16xf32> to vector<16x16xf32>
    %28 = arith.addf %24, %27 : vector<16x16xf32>
    %cst_37 = arith.constant dense<0.000000e+00> : vector<16x16xf32>
    %29 = tpu.matmul %0, %18, %cst_37 {dimension_numbers = #tpu.dot_dimension_numbers<[1], [0], [0], [1], [0, 0, 1, 1], [], []>} : vector<16x32xf32>, vector<32x16xf32>, vector<16x16xf32> -> vector<16x16xf32>
    %c0_38 = arith.constant 0 : index
    %c2_39 = arith.constant 2 : index
    %c0_40 = arith.constant 0 : index
    %c0_41 = arith.constant 0 : index
    %c0_42 = arith.constant 0 : index
    %30 = vector.load %arg5[%c0_38, %c2_39, %c0_40, %c0_41, %c0_42] : memref<2x3x2x1x16xf32, #tpu.memory_space<vmem>>, vector<1x1x1x1x16xf32>
    %31 = vector.shape_cast %30 : vector<1x1x1x1x16xf32> to vector<1x16xf32>
    %32 = vector.broadcast %31 : vector<1x16xf32> to vector<16x16xf32>
    %33 = arith.addf %29, %32 : vector<16x16xf32>
    %cst_43 = arith.constant dense<0.000000e+00> : vector<16x16xf32>
    %34 = tpu.matmul %23, %28, %cst_43 {dimension_numbers = #tpu.dot_dimension_numbers<[1], [1], [0], [0], [0, 0, 1, 0], [], []>} : vector<16x16xf32>, vector<16x16xf32>, vector<16x16xf32> -> vector<16x16xf32>
    %cst_44 = arith.constant 2.500000e-01 : f32
    %35 = vector.broadcast %cst_44 : f32 to vector<16x16xf32>
    %36 = arith.mulf %34, %35 : vector<16x16xf32>
    %37 = arith.addf %36, %4 : vector<16x16xf32>
    %cst_45 = arith.constant dense<0xFF800000> : vector<16xf32>
    %38 = vector.multi_reduction <maximumf>, %37, %cst_45 [1] : vector<16x16xf32> to vector<16xf32>
    %39 = vector.shape_cast %38 : vector<16xf32> to vector<16x1xf32>
    %40 = vector.broadcast %39 : vector<16x1xf32> to vector<16x16xf32>
    %41 = arith.subf %37, %40 : vector<16x16xf32>
    %42 = math.exp %41 : vector<16x16xf32>
    %cst_46 = arith.constant dense<0.000000e+00> : vector<16xf32>
    %43 = vector.multi_reduction <add>, %42, %cst_46 [1] : vector<16x16xf32> to vector<16xf32>
    %44 = vector.shape_cast %43 : vector<16xf32> to vector<16x1xf32>
    %45 = tpu.reciprocal %44 {approx = true} : vector<16x1xf32> -> vector<16x1xf32>
    %46 = vector.broadcast %45 : vector<16x1xf32> to vector<16x16xf32>
    %47 = arith.mulf %42, %46 : vector<16x16xf32>
    %cst_47 = arith.constant dense<0.000000e+00> : vector<16x16xf32>
    %48 = tpu.matmul %47, %33, %cst_47 {dimension_numbers = #tpu.dot_dimension_numbers<[1], [0], [0], [1], [0, 0, 1, 1], [], []>} : vector<16x16xf32>, vector<16x16xf32>, vector<16x16xf32> -> vector<16x16xf32>
    %c0_48 = arith.constant 0 : index
    %c0_49 = arith.constant 0 : index
    %c0_50 = arith.constant 0 : index
    %c0_51 = arith.constant 0 : index
    %49 = vector.load %arg6[%c0_48, %c0_49, %c0_50, %c0_51] : memref<2x2x16x32xbf16, #tpu.memory_space<vmem>>, vector<1x1x16x32xbf16>
    %50 = vector.shape_cast %49 : vector<1x1x16x32xbf16> to vector<16x32xbf16>
    %51 = arith.extf %50 : vector<16x32xbf16> to vector<16x32xf32>
    %cst_52 = arith.constant dense<0.000000e+00> : vector<16x32xf32>
    %52 = tpu.matmul %48, %51, %cst_52 {dimension_numbers = #tpu.dot_dimension_numbers<[1], [0], [0], [1], [0, 0, 1, 1], [], []>} : vector<16x16xf32>, vector<16x32xf32>, vector<16x32xf32> -> vector<16x32xf32>
    %53 = arith.addf %9, %52 : vector<16x32xf32>
    %c0_53 = arith.constant 0 : index
    %c0_54 = arith.constant 0 : index
    %c1_55 = arith.constant 1 : index
    %c0_56 = arith.constant 0 : index
    %c0_57 = arith.constant 0 : index
    %54 = vector.load %arg4[%c0_53, %c0_54, %c1_55, %c0_56, %c0_57] : memref<2x3x2x32x16xbf16, #tpu.memory_space<vmem>>, vector<1x1x1x32x16xbf16>
    %55 = vector.shape_cast %54 : vector<1x1x1x32x16xbf16> to vector<32x16xbf16>
    %56 = arith.extf %55 : vector<32x16xbf16> to vector<32x16xf32>
    %c0_58 = arith.constant 0 : index
    %c1_59 = arith.constant 1 : index
    %c1_60 = arith.constant 1 : index
    %c0_61 = arith.constant 0 : index
    %c0_62 = arith.constant 0 : index
    %57 = vector.load %arg4[%c0_58, %c1_59, %c1_60, %c0_61, %c0_62] : memref<2x3x2x32x16xbf16, #tpu.memory_space<vmem>>, vector<1x1x1x32x16xbf16>
    %58 = vector.shape_cast %57 : vector<1x1x1x32x16xbf16> to vector<32x16xbf16>
    %59 = arith.extf %58 : vector<32x16xbf16> to vector<32x16xf32>
    %c0_63 = arith.constant 0 : index
    %c2_64 = arith.constant 2 : index
    %c1_65 = arith.constant 1 : index
    %c0_66 = arith.constant 0 : index
    %c0_67 = arith.constant 0 : index
    %60 = vector.load %arg4[%c0_63, %c2_64, %c1_65, %c0_66, %c0_67] : memref<2x3x2x32x16xbf16, #tpu.memory_space<vmem>>, vector<1x1x1x32x16xbf16>
    %61 = vector.shape_cast %60 : vector<1x1x1x32x16xbf16> to vector<32x16xbf16>
    %62 = arith.extf %61 : vector<32x16xbf16> to vector<32x16xf32>
    %cst_68 = arith.constant dense<0.000000e+00> : vector<16x16xf32>
    %63 = tpu.matmul %0, %56, %cst_68 {dimension_numbers = #tpu.dot_dimension_numbers<[1], [0], [0], [1], [0, 0, 1, 1], [], []>} : vector<16x32xf32>, vector<32x16xf32>, vector<16x16xf32> -> vector<16x16xf32>
    %c0_69 = arith.constant 0 : index
    %c0_70 = arith.constant 0 : index
    %c1_71 = arith.constant 1 : index
    %c0_72 = arith.constant 0 : index
    %c0_73 = arith.constant 0 : index
    %64 = vector.load %arg5[%c0_69, %c0_70, %c1_71, %c0_72, %c0_73] : memref<2x3x2x1x16xf32, #tpu.memory_space<vmem>>, vector<1x1x1x1x16xf32>
    %65 = vector.shape_cast %64 : vector<1x1x1x1x16xf32> to vector<1x16xf32>
    %66 = vector.broadcast %65 : vector<1x16xf32> to vector<16x16xf32>
    %67 = arith.addf %63, %66 : vector<16x16xf32>
    %cst_74 = arith.constant dense<0.000000e+00> : vector<16x16xf32>
    %68 = tpu.matmul %0, %59, %cst_74 {dimension_numbers = #tpu.dot_dimension_numbers<[1], [0], [0], [1], [0, 0, 1, 1], [], []>} : vector<16x32xf32>, vector<32x16xf32>, vector<16x16xf32> -> vector<16x16xf32>
    %c0_75 = arith.constant 0 : index
    %c1_76 = arith.constant 1 : index
    %c1_77 = arith.constant 1 : index
    %c0_78 = arith.constant 0 : index
    %c0_79 = arith.constant 0 : index
    %69 = vector.load %arg5[%c0_75, %c1_76, %c1_77, %c0_78, %c0_79] : memref<2x3x2x1x16xf32, #tpu.memory_space<vmem>>, vector<1x1x1x1x16xf32>
    %70 = vector.shape_cast %69 : vector<1x1x1x1x16xf32> to vector<1x16xf32>
    %71 = vector.broadcast %70 : vector<1x16xf32> to vector<16x16xf32>
    %72 = arith.addf %68, %71 : vector<16x16xf32>
    %cst_80 = arith.constant dense<0.000000e+00> : vector<16x16xf32>
    %73 = tpu.matmul %0, %62, %cst_80 {dimension_numbers = #tpu.dot_dimension_numbers<[1], [0], [0], [1], [0, 0, 1, 1], [], []>} : vector<16x32xf32>, vector<32x16xf32>, vector<16x16xf32> -> vector<16x16xf32>
    %c0_81 = arith.constant 0 : index
    %c2_82 = arith.constant 2 : index
    %c1_83 = arith.constant 1 : index
    %c0_84 = arith.constant 0 : index
    %c0_85 = arith.constant 0 : index
    %74 = vector.load %arg5[%c0_81, %c2_82, %c1_83, %c0_84, %c0_85] : memref<2x3x2x1x16xf32, #tpu.memory_space<vmem>>, vector<1x1x1x1x16xf32>
    %75 = vector.shape_cast %74 : vector<1x1x1x1x16xf32> to vector<1x16xf32>
    %76 = vector.broadcast %75 : vector<1x16xf32> to vector<16x16xf32>
    %77 = arith.addf %73, %76 : vector<16x16xf32>
    %cst_86 = arith.constant dense<0.000000e+00> : vector<16x16xf32>
    %78 = tpu.matmul %67, %72, %cst_86 {dimension_numbers = #tpu.dot_dimension_numbers<[1], [1], [0], [0], [0, 0, 1, 0], [], []>} : vector<16x16xf32>, vector<16x16xf32>, vector<16x16xf32> -> vector<16x16xf32>
    %cst_87 = arith.constant 2.500000e-01 : f32
    %79 = vector.broadcast %cst_87 : f32 to vector<16x16xf32>
    %80 = arith.mulf %78, %79 : vector<16x16xf32>
    %81 = arith.addf %80, %4 : vector<16x16xf32>
    %cst_88 = arith.constant dense<0xFF800000> : vector<16xf32>
    %82 = vector.multi_reduction <maximumf>, %81, %cst_88 [1] : vector<16x16xf32> to vector<16xf32>
    %83 = vector.shape_cast %82 : vector<16xf32> to vector<16x1xf32>
    %84 = vector.broadcast %83 : vector<16x1xf32> to vector<16x16xf32>
    %85 = arith.subf %81, %84 : vector<16x16xf32>
    %86 = math.exp %85 : vector<16x16xf32>
    %cst_89 = arith.constant dense<0.000000e+00> : vector<16xf32>
    %87 = vector.multi_reduction <add>, %86, %cst_89 [1] : vector<16x16xf32> to vector<16xf32>
    %88 = vector.shape_cast %87 : vector<16xf32> to vector<16x1xf32>
    %89 = tpu.reciprocal %88 {approx = true} : vector<16x1xf32> -> vector<16x1xf32>
    %90 = vector.broadcast %89 : vector<16x1xf32> to vector<16x16xf32>
    %91 = arith.mulf %86, %90 : vector<16x16xf32>
    %cst_90 = arith.constant dense<0.000000e+00> : vector<16x16xf32>
    %92 = tpu.matmul %91, %77, %cst_90 {dimension_numbers = #tpu.dot_dimension_numbers<[1], [0], [0], [1], [0, 0, 1, 1], [], []>} : vector<16x16xf32>, vector<16x16xf32>, vector<16x16xf32> -> vector<16x16xf32>
    %c0_91 = arith.constant 0 : index
    %c1_92 = arith.constant 1 : index
    %c0_93 = arith.constant 0 : index
    %c0_94 = arith.constant 0 : index
    %93 = vector.load %arg6[%c0_91, %c1_92, %c0_93, %c0_94] : memref<2x2x16x32xbf16, #tpu.memory_space<vmem>>, vector<1x1x16x32xbf16>
    %94 = vector.shape_cast %93 : vector<1x1x16x32xbf16> to vector<16x32xbf16>
    %95 = arith.extf %94 : vector<16x32xbf16> to vector<16x32xf32>
    %cst_95 = arith.constant dense<0.000000e+00> : vector<16x32xf32>
    %96 = tpu.matmul %92, %95, %cst_95 {dimension_numbers = #tpu.dot_dimension_numbers<[1], [0], [0], [1], [0, 0, 1, 1], [], []>} : vector<16x16xf32>, vector<16x32xf32>, vector<16x32xf32> -> vector<16x32xf32>
    %97 = arith.addf %53, %96 : vector<16x32xf32>
    %98 = arith.addf %97, %0 : vector<16x32xf32>
    %c0_96 = arith.constant 0 : index
    %c1_97 = arith.constant 1 : index
    %c0_98 = arith.constant 0 : index
    %c0_99 = arith.constant 0 : index
    %99 = vector.load %arg10[%c0_96, %c1_97, %c0_98, %c0_99] : memref<2x6x1x32xf32, #tpu.memory_space<vmem>>, vector<1x1x1x32xf32>
    %100 = vector.shape_cast %99 : vector<1x1x1x32xf32> to vector<1x32xf32>
    %c0_100 = arith.constant 0 : index
    %c2_101 = arith.constant 2 : index
    %c0_102 = arith.constant 0 : index
    %c0_103 = arith.constant 0 : index
    %101 = vector.load %arg10[%c0_100, %c2_101, %c0_102, %c0_103] : memref<2x6x1x32xf32, #tpu.memory_space<vmem>>, vector<1x1x1x32xf32>
    %102 = vector.shape_cast %101 : vector<1x1x1x32xf32> to vector<1x32xf32>
    %cst_104 = arith.constant dense<0.000000e+00> : vector<16xf32>
    %103 = vector.multi_reduction <add>, %98, %cst_104 [1] : vector<16x32xf32> to vector<16xf32>
    %104 = vector.shape_cast %103 : vector<16xf32> to vector<16x1xf32>
    %cst_105 = arith.constant 3.200000e+01 : f32
    %105 = vector.broadcast %cst_105 : f32 to vector<16x1xf32>
    %106 = arith.divf %104, %105 : vector<16x1xf32>
    %107 = vector.broadcast %106 : vector<16x1xf32> to vector<16x32xf32>
    %108 = arith.subf %98, %107 : vector<16x32xf32>
    %109 = arith.mulf %108, %108 : vector<16x32xf32>
    %cst_106 = arith.constant dense<0.000000e+00> : vector<16xf32>
    %110 = vector.multi_reduction <add>, %109, %cst_106 [1] : vector<16x32xf32> to vector<16xf32>
    %111 = vector.shape_cast %110 : vector<16xf32> to vector<16x1xf32>
    %cst_107 = arith.constant 3.200000e+01 : f32
    %112 = vector.broadcast %cst_107 : f32 to vector<16x1xf32>
    %113 = arith.divf %111, %112 : vector<16x1xf32>
    %114 = vector.broadcast %106 : vector<16x1xf32> to vector<16x32xf32>
    %115 = arith.subf %98, %114 : vector<16x32xf32>
    %cst_108 = arith.constant 9.99999974E-6 : f32
    %116 = vector.broadcast %cst_108 : f32 to vector<16x1xf32>
    %117 = arith.addf %113, %116 : vector<16x1xf32>
    %118 = math.rsqrt %117 : vector<16x1xf32>
    %119 = vector.broadcast %118 : vector<16x1xf32> to vector<16x32xf32>
    %120 = arith.mulf %115, %119 : vector<16x32xf32>
    %121 = vector.broadcast %100 : vector<1x32xf32> to vector<16x32xf32>
    %122 = arith.mulf %120, %121 : vector<16x32xf32>
    %123 = vector.broadcast %102 : vector<1x32xf32> to vector<16x32xf32>
    %124 = arith.addf %122, %123 : vector<16x32xf32>
    %125 = vector.broadcast %2 : vector<16x1xf32> to vector<16x32xf32>
    %126 = arith.mulf %124, %125 : vector<16x32xf32>
    %cst_109 = arith.constant 0.000000e+00 : f32
    %127 = vector.broadcast %cst_109 : f32 to vector<16x64xf32>
    %c0_110 = arith.constant 0 : index
    %c0_111 = arith.constant 0 : index
    %c0_112 = arith.constant 0 : index
    %128 = vector.load %arg9[%c0_110, %c0_111, %c0_112] : memref<2x1x64xf32, #tpu.memory_space<vmem>>, vector<1x1x64xf32>
    %129 = vector.shape_cast %128 : vector<1x1x64xf32> to vector<1x64xf32>
    %130 = vector.broadcast %129 : vector<1x64xf32> to vector<16x64xf32>
    %131 = arith.addf %127, %130 : vector<16x64xf32>
    %c0_113 = arith.constant 0 : index
    %c1_114 = arith.constant 1 : index
    %c0_115 = arith.constant 0 : index
    %c0_116 = arith.constant 0 : index
    %132 = vector.load %arg2[%c0_113, %c1_114, %c0_115, %c0_116] : memref<1x10x16x16xf32, #tpu.memory_space<vmem>>, vector<1x1x16x16xf32>
    %133 = vector.shape_cast %132 : vector<1x1x16x16xf32> to vector<16x16xf32>
    %cst_117 = arith.constant dense<0.000000e+00> : vector<16x32xf32>
    %134 = tpu.matmul %133, %126, %cst_117 {dimension_numbers = #tpu.dot_dimension_numbers<[1], [0], [0], [1], [0, 0, 1, 1], [], []>} : vector<16x16xf32>, vector<16x32xf32>, vector<16x32xf32> -> vector<16x32xf32>
    %c0_118 = arith.constant 0 : index
    %c0_119 = arith.constant 0 : index
    %c0_120 = arith.constant 0 : index
    %c0_121 = arith.constant 0 : index
    %135 = vector.load %arg7[%c0_118, %c0_119, %c0_120, %c0_121] : memref<2x9x32x64xbf16, #tpu.memory_space<vmem>>, vector<1x1x32x64xbf16>
    %136 = vector.shape_cast %135 : vector<1x1x32x64xbf16> to vector<32x64xbf16>
    %137 = arith.extf %136 : vector<32x64xbf16> to vector<32x64xf32>
    %cst_122 = arith.constant dense<0.000000e+00> : vector<16x64xf32>
    %138 = tpu.matmul %134, %137, %cst_122 {dimension_numbers = #tpu.dot_dimension_numbers<[1], [0], [0], [1], [0, 0, 1, 1], [], []>} : vector<16x32xf32>, vector<32x64xf32>, vector<16x64xf32> -> vector<16x64xf32>
    %139 = arith.addf %131, %138 : vector<16x64xf32>
    %c0_123 = arith.constant 0 : index
    %c2_124 = arith.constant 2 : index
    %c0_125 = arith.constant 0 : index
    %c0_126 = arith.constant 0 : index
    %140 = vector.load %arg2[%c0_123, %c2_124, %c0_125, %c0_126] : memref<1x10x16x16xf32, #tpu.memory_space<vmem>>, vector<1x1x16x16xf32>
    %141 = vector.shape_cast %140 : vector<1x1x16x16xf32> to vector<16x16xf32>
    %cst_127 = arith.constant dense<0.000000e+00> : vector<16x32xf32>
    %142 = tpu.matmul %141, %126, %cst_127 {dimension_numbers = #tpu.dot_dimension_numbers<[1], [0], [0], [1], [0, 0, 1, 1], [], []>} : vector<16x16xf32>, vector<16x32xf32>, vector<16x32xf32> -> vector<16x32xf32>
    %c0_128 = arith.constant 0 : index
    %c1_129 = arith.constant 1 : index
    %c0_130 = arith.constant 0 : index
    %c0_131 = arith.constant 0 : index
    %143 = vector.load %arg7[%c0_128, %c1_129, %c0_130, %c0_131] : memref<2x9x32x64xbf16, #tpu.memory_space<vmem>>, vector<1x1x32x64xbf16>
    %144 = vector.shape_cast %143 : vector<1x1x32x64xbf16> to vector<32x64xbf16>
    %145 = arith.extf %144 : vector<32x64xbf16> to vector<32x64xf32>
    %cst_132 = arith.constant dense<0.000000e+00> : vector<16x64xf32>
    %146 = tpu.matmul %142, %145, %cst_132 {dimension_numbers = #tpu.dot_dimension_numbers<[1], [0], [0], [1], [0, 0, 1, 1], [], []>} : vector<16x32xf32>, vector<32x64xf32>, vector<16x64xf32> -> vector<16x64xf32>
    %147 = arith.addf %139, %146 : vector<16x64xf32>
    %c0_133 = arith.constant 0 : index
    %c3 = arith.constant 3 : index
    %c0_134 = arith.constant 0 : index
    %c0_135 = arith.constant 0 : index
    %148 = vector.load %arg2[%c0_133, %c3, %c0_134, %c0_135] : memref<1x10x16x16xf32, #tpu.memory_space<vmem>>, vector<1x1x16x16xf32>
    %149 = vector.shape_cast %148 : vector<1x1x16x16xf32> to vector<16x16xf32>
    %cst_136 = arith.constant dense<0.000000e+00> : vector<16x32xf32>
    %150 = tpu.matmul %149, %126, %cst_136 {dimension_numbers = #tpu.dot_dimension_numbers<[1], [0], [0], [1], [0, 0, 1, 1], [], []>} : vector<16x16xf32>, vector<16x32xf32>, vector<16x32xf32> -> vector<16x32xf32>
    %c0_137 = arith.constant 0 : index
    %c2_138 = arith.constant 2 : index
    %c0_139 = arith.constant 0 : index
    %c0_140 = arith.constant 0 : index
    %151 = vector.load %arg7[%c0_137, %c2_138, %c0_139, %c0_140] : memref<2x9x32x64xbf16, #tpu.memory_space<vmem>>, vector<1x1x32x64xbf16>
    %152 = vector.shape_cast %151 : vector<1x1x32x64xbf16> to vector<32x64xbf16>
    %153 = arith.extf %152 : vector<32x64xbf16> to vector<32x64xf32>
    %cst_141 = arith.constant dense<0.000000e+00> : vector<16x64xf32>
    %154 = tpu.matmul %150, %153, %cst_141 {dimension_numbers = #tpu.dot_dimension_numbers<[1], [0], [0], [1], [0, 0, 1, 1], [], []>} : vector<16x32xf32>, vector<32x64xf32>, vector<16x64xf32> -> vector<16x64xf32>
    %155 = arith.addf %147, %154 : vector<16x64xf32>
    %c0_142 = arith.constant 0 : index
    %c4 = arith.constant 4 : index
    %c0_143 = arith.constant 0 : index
    %c0_144 = arith.constant 0 : index
    %156 = vector.load %arg2[%c0_142, %c4, %c0_143, %c0_144] : memref<1x10x16x16xf32, #tpu.memory_space<vmem>>, vector<1x1x16x16xf32>
    %157 = vector.shape_cast %156 : vector<1x1x16x16xf32> to vector<16x16xf32>
    %cst_145 = arith.constant dense<0.000000e+00> : vector<16x32xf32>
    %158 = tpu.matmul %157, %126, %cst_145 {dimension_numbers = #tpu.dot_dimension_numbers<[1], [0], [0], [1], [0, 0, 1, 1], [], []>} : vector<16x16xf32>, vector<16x32xf32>, vector<16x32xf32> -> vector<16x32xf32>
    %c0_146 = arith.constant 0 : index
    %c3_147 = arith.constant 3 : index
    %c0_148 = arith.constant 0 : index
    %c0_149 = arith.constant 0 : index
    %159 = vector.load %arg7[%c0_146, %c3_147, %c0_148, %c0_149] : memref<2x9x32x64xbf16, #tpu.memory_space<vmem>>, vector<1x1x32x64xbf16>
    %160 = vector.shape_cast %159 : vector<1x1x32x64xbf16> to vector<32x64xbf16>
    %161 = arith.extf %160 : vector<32x64xbf16> to vector<32x64xf32>
    %cst_150 = arith.constant dense<0.000000e+00> : vector<16x64xf32>
    %162 = tpu.matmul %158, %161, %cst_150 {dimension_numbers = #tpu.dot_dimension_numbers<[1], [0], [0], [1], [0, 0, 1, 1], [], []>} : vector<16x32xf32>, vector<32x64xf32>, vector<16x64xf32> -> vector<16x64xf32>
    %163 = arith.addf %155, %162 : vector<16x64xf32>
    %c0_151 = arith.constant 0 : index
    %c5 = arith.constant 5 : index
    %c0_152 = arith.constant 0 : index
    %c0_153 = arith.constant 0 : index
    %164 = vector.load %arg2[%c0_151, %c5, %c0_152, %c0_153] : memref<1x10x16x16xf32, #tpu.memory_space<vmem>>, vector<1x1x16x16xf32>
    %165 = vector.shape_cast %164 : vector<1x1x16x16xf32> to vector<16x16xf32>
    %cst_154 = arith.constant dense<0.000000e+00> : vector<16x32xf32>
    %166 = tpu.matmul %165, %126, %cst_154 {dimension_numbers = #tpu.dot_dimension_numbers<[1], [0], [0], [1], [0, 0, 1, 1], [], []>} : vector<16x16xf32>, vector<16x32xf32>, vector<16x32xf32> -> vector<16x32xf32>
    %c0_155 = arith.constant 0 : index
    %c4_156 = arith.constant 4 : index
    %c0_157 = arith.constant 0 : index
    %c0_158 = arith.constant 0 : index
    %167 = vector.load %arg7[%c0_155, %c4_156, %c0_157, %c0_158] : memref<2x9x32x64xbf16, #tpu.memory_space<vmem>>, vector<1x1x32x64xbf16>
    %168 = vector.shape_cast %167 : vector<1x1x32x64xbf16> to vector<32x64xbf16>
    %169 = arith.extf %168 : vector<32x64xbf16> to vector<32x64xf32>
    %cst_159 = arith.constant dense<0.000000e+00> : vector<16x64xf32>
    %170 = tpu.matmul %166, %169, %cst_159 {dimension_numbers = #tpu.dot_dimension_numbers<[1], [0], [0], [1], [0, 0, 1, 1], [], []>} : vector<16x32xf32>, vector<32x64xf32>, vector<16x64xf32> -> vector<16x64xf32>
    %171 = arith.addf %163, %170 : vector<16x64xf32>
    %c0_160 = arith.constant 0 : index
    %c6 = arith.constant 6 : index
    %c0_161 = arith.constant 0 : index
    %c0_162 = arith.constant 0 : index
    %172 = vector.load %arg2[%c0_160, %c6, %c0_161, %c0_162] : memref<1x10x16x16xf32, #tpu.memory_space<vmem>>, vector<1x1x16x16xf32>
    %173 = vector.shape_cast %172 : vector<1x1x16x16xf32> to vector<16x16xf32>
    %cst_163 = arith.constant dense<0.000000e+00> : vector<16x32xf32>
    %174 = tpu.matmul %173, %126, %cst_163 {dimension_numbers = #tpu.dot_dimension_numbers<[1], [0], [0], [1], [0, 0, 1, 1], [], []>} : vector<16x16xf32>, vector<16x32xf32>, vector<16x32xf32> -> vector<16x32xf32>
    %c0_164 = arith.constant 0 : index
    %c5_165 = arith.constant 5 : index
    %c0_166 = arith.constant 0 : index
    %c0_167 = arith.constant 0 : index
    %175 = vector.load %arg7[%c0_164, %c5_165, %c0_166, %c0_167] : memref<2x9x32x64xbf16, #tpu.memory_space<vmem>>, vector<1x1x32x64xbf16>
    %176 = vector.shape_cast %175 : vector<1x1x32x64xbf16> to vector<32x64xbf16>
    %177 = arith.extf %176 : vector<32x64xbf16> to vector<32x64xf32>
    %cst_168 = arith.constant dense<0.000000e+00> : vector<16x64xf32>
    %178 = tpu.matmul %174, %177, %cst_168 {dimension_numbers = #tpu.dot_dimension_numbers<[1], [0], [0], [1], [0, 0, 1, 1], [], []>} : vector<16x32xf32>, vector<32x64xf32>, vector<16x64xf32> -> vector<16x64xf32>
    %179 = arith.addf %171, %178 : vector<16x64xf32>
    %c0_169 = arith.constant 0 : index
    %c7 = arith.constant 7 : index
    %c0_170 = arith.constant 0 : index
    %c0_171 = arith.constant 0 : index
    %180 = vector.load %arg2[%c0_169, %c7, %c0_170, %c0_171] : memref<1x10x16x16xf32, #tpu.memory_space<vmem>>, vector<1x1x16x16xf32>
    %181 = vector.shape_cast %180 : vector<1x1x16x16xf32> to vector<16x16xf32>
    %cst_172 = arith.constant dense<0.000000e+00> : vector<16x32xf32>
    %182 = tpu.matmul %181, %126, %cst_172 {dimension_numbers = #tpu.dot_dimension_numbers<[1], [0], [0], [1], [0, 0, 1, 1], [], []>} : vector<16x16xf32>, vector<16x32xf32>, vector<16x32xf32> -> vector<16x32xf32>
    %c0_173 = arith.constant 0 : index
    %c6_174 = arith.constant 6 : index
    %c0_175 = arith.constant 0 : index
    %c0_176 = arith.constant 0 : index
    %183 = vector.load %arg7[%c0_173, %c6_174, %c0_175, %c0_176] : memref<2x9x32x64xbf16, #tpu.memory_space<vmem>>, vector<1x1x32x64xbf16>
    %184 = vector.shape_cast %183 : vector<1x1x32x64xbf16> to vector<32x64xbf16>
    %185 = arith.extf %184 : vector<32x64xbf16> to vector<32x64xf32>
    %cst_177 = arith.constant dense<0.000000e+00> : vector<16x64xf32>
    %186 = tpu.matmul %182, %185, %cst_177 {dimension_numbers = #tpu.dot_dimension_numbers<[1], [0], [0], [1], [0, 0, 1, 1], [], []>} : vector<16x32xf32>, vector<32x64xf32>, vector<16x64xf32> -> vector<16x64xf32>
    %187 = arith.addf %179, %186 : vector<16x64xf32>
    %c0_178 = arith.constant 0 : index
    %c8 = arith.constant 8 : index
    %c0_179 = arith.constant 0 : index
    %c0_180 = arith.constant 0 : index
    %188 = vector.load %arg2[%c0_178, %c8, %c0_179, %c0_180] : memref<1x10x16x16xf32, #tpu.memory_space<vmem>>, vector<1x1x16x16xf32>
    %189 = vector.shape_cast %188 : vector<1x1x16x16xf32> to vector<16x16xf32>
    %cst_181 = arith.constant dense<0.000000e+00> : vector<16x32xf32>
    %190 = tpu.matmul %189, %126, %cst_181 {dimension_numbers = #tpu.dot_dimension_numbers<[1], [0], [0], [1], [0, 0, 1, 1], [], []>} : vector<16x16xf32>, vector<16x32xf32>, vector<16x32xf32> -> vector<16x32xf32>
    %c0_182 = arith.constant 0 : index
    %c7_183 = arith.constant 7 : index
    %c0_184 = arith.constant 0 : index
    %c0_185 = arith.constant 0 : index
    %191 = vector.load %arg7[%c0_182, %c7_183, %c0_184, %c0_185] : memref<2x9x32x64xbf16, #tpu.memory_space<vmem>>, vector<1x1x32x64xbf16>
    %192 = vector.shape_cast %191 : vector<1x1x32x64xbf16> to vector<32x64xbf16>
    %193 = arith.extf %192 : vector<32x64xbf16> to vector<32x64xf32>
    %cst_186 = arith.constant dense<0.000000e+00> : vector<16x64xf32>
    %194 = tpu.matmul %190, %193, %cst_186 {dimension_numbers = #tpu.dot_dimension_numbers<[1], [0], [0], [1], [0, 0, 1, 1], [], []>} : vector<16x32xf32>, vector<32x64xf32>, vector<16x64xf32> -> vector<16x64xf32>
    %195 = arith.addf %187, %194 : vector<16x64xf32>
    %c0_187 = arith.constant 0 : index
    %c9 = arith.constant 9 : index
    %c0_188 = arith.constant 0 : index
    %c0_189 = arith.constant 0 : index
    %196 = vector.load %arg2[%c0_187, %c9, %c0_188, %c0_189] : memref<1x10x16x16xf32, #tpu.memory_space<vmem>>, vector<1x1x16x16xf32>
    %197 = vector.shape_cast %196 : vector<1x1x16x16xf32> to vector<16x16xf32>
    %cst_190 = arith.constant dense<0.000000e+00> : vector<16x32xf32>
    %198 = tpu.matmul %197, %126, %cst_190 {dimension_numbers = #tpu.dot_dimension_numbers<[1], [0], [0], [1], [0, 0, 1, 1], [], []>} : vector<16x16xf32>, vector<16x32xf32>, vector<16x32xf32> -> vector<16x32xf32>
    %c0_191 = arith.constant 0 : index
    %c8_192 = arith.constant 8 : index
    %c0_193 = arith.constant 0 : index
    %c0_194 = arith.constant 0 : index
    %199 = vector.load %arg7[%c0_191, %c8_192, %c0_193, %c0_194] : memref<2x9x32x64xbf16, #tpu.memory_space<vmem>>, vector<1x1x32x64xbf16>
    %200 = vector.shape_cast %199 : vector<1x1x32x64xbf16> to vector<32x64xbf16>
    %201 = arith.extf %200 : vector<32x64xbf16> to vector<32x64xf32>
    %cst_195 = arith.constant dense<0.000000e+00> : vector<16x64xf32>
    %202 = tpu.matmul %198, %201, %cst_195 {dimension_numbers = #tpu.dot_dimension_numbers<[1], [0], [0], [1], [0, 0, 1, 1], [], []>} : vector<16x32xf32>, vector<32x64xf32>, vector<16x64xf32> -> vector<16x64xf32>
    %203 = arith.addf %195, %202 : vector<16x64xf32>
    %cst_196 = arith.constant 0.000000e+00 : f32
    %204 = vector.broadcast %cst_196 : f32 to vector<16x64xf32>
    %205 = arith.maximumf %203, %204 : vector<16x64xf32>
    %c0_197 = arith.constant 0 : index
    %c0_198 = arith.constant 0 : index
    %c0_199 = arith.constant 0 : index
    %206 = vector.load %arg8[%c0_197, %c0_198, %c0_199] : memref<2x64x32xbf16, #tpu.memory_space<vmem>>, vector<1x64x32xbf16>
    %207 = vector.shape_cast %206 : vector<1x64x32xbf16> to vector<64x32xbf16>
    %208 = arith.extf %207 : vector<64x32xbf16> to vector<64x32xf32>
    %cst_200 = arith.constant dense<0.000000e+00> : vector<16x32xf32>
    %209 = tpu.matmul %205, %208, %cst_200 {dimension_numbers = #tpu.dot_dimension_numbers<[1], [0], [0], [1], [0, 0, 1, 1], [], []>} : vector<16x64xf32>, vector<64x32xf32>, vector<16x32xf32> -> vector<16x32xf32>
    %c0_201 = arith.constant 0 : index
    %c3_202 = arith.constant 3 : index
    %c0_203 = arith.constant 0 : index
    %c0_204 = arith.constant 0 : index
    %210 = vector.load %arg10[%c0_201, %c3_202, %c0_203, %c0_204] : memref<2x6x1x32xf32, #tpu.memory_space<vmem>>, vector<1x1x1x32xf32>
    %211 = vector.shape_cast %210 : vector<1x1x1x32xf32> to vector<1x32xf32>
    %212 = vector.broadcast %211 : vector<1x32xf32> to vector<16x32xf32>
    %213 = arith.addf %209, %212 : vector<16x32xf32>
    %214 = arith.addf %213, %126 : vector<16x32xf32>
    %c0_205 = arith.constant 0 : index
    %c4_206 = arith.constant 4 : index
    %c0_207 = arith.constant 0 : index
    %c0_208 = arith.constant 0 : index
    %215 = vector.load %arg10[%c0_205, %c4_206, %c0_207, %c0_208] : memref<2x6x1x32xf32, #tpu.memory_space<vmem>>, vector<1x1x1x32xf32>
    %216 = vector.shape_cast %215 : vector<1x1x1x32xf32> to vector<1x32xf32>
    %c0_209 = arith.constant 0 : index
    %c5_210 = arith.constant 5 : index
    %c0_211 = arith.constant 0 : index
    %c0_212 = arith.constant 0 : index
    %217 = vector.load %arg10[%c0_209, %c5_210, %c0_211, %c0_212] : memref<2x6x1x32xf32, #tpu.memory_space<vmem>>, vector<1x1x1x32xf32>
    %218 = vector.shape_cast %217 : vector<1x1x1x32xf32> to vector<1x32xf32>
    %cst_213 = arith.constant dense<0.000000e+00> : vector<16xf32>
    %219 = vector.multi_reduction <add>, %214, %cst_213 [1] : vector<16x32xf32> to vector<16xf32>
    %220 = vector.shape_cast %219 : vector<16xf32> to vector<16x1xf32>
    %cst_214 = arith.constant 3.200000e+01 : f32
    %221 = vector.broadcast %cst_214 : f32 to vector<16x1xf32>
    %222 = arith.divf %220, %221 : vector<16x1xf32>
    %223 = vector.broadcast %222 : vector<16x1xf32> to vector<16x32xf32>
    %224 = arith.subf %214, %223 : vector<16x32xf32>
    %225 = arith.mulf %224, %224 : vector<16x32xf32>
    %cst_215 = arith.constant dense<0.000000e+00> : vector<16xf32>
    %226 = vector.multi_reduction <add>, %225, %cst_215 [1] : vector<16x32xf32> to vector<16xf32>
    %227 = vector.shape_cast %226 : vector<16xf32> to vector<16x1xf32>
    %cst_216 = arith.constant 3.200000e+01 : f32
    %228 = vector.broadcast %cst_216 : f32 to vector<16x1xf32>
    %229 = arith.divf %227, %228 : vector<16x1xf32>
    %230 = vector.broadcast %222 : vector<16x1xf32> to vector<16x32xf32>
    %231 = arith.subf %214, %230 : vector<16x32xf32>
    %cst_217 = arith.constant 9.99999974E-6 : f32
    %232 = vector.broadcast %cst_217 : f32 to vector<16x1xf32>
    %233 = arith.addf %229, %232 : vector<16x1xf32>
    %234 = math.rsqrt %233 : vector<16x1xf32>
    %235 = vector.broadcast %234 : vector<16x1xf32> to vector<16x32xf32>
    %236 = arith.mulf %231, %235 : vector<16x32xf32>
    %237 = vector.broadcast %216 : vector<1x32xf32> to vector<16x32xf32>
    %238 = arith.mulf %236, %237 : vector<16x32xf32>
    %239 = vector.broadcast %218 : vector<1x32xf32> to vector<16x32xf32>
    %240 = arith.addf %238, %239 : vector<16x32xf32>
    %241 = vector.broadcast %2 : vector<16x1xf32> to vector<16x32xf32>
    %242 = arith.mulf %240, %241 : vector<16x32xf32>
    %cst_218 = arith.constant 0.000000e+00 : f32
    %243 = vector.broadcast %cst_218 : f32 to vector<16x32xf32>
    %c1_219 = arith.constant 1 : index
    %c0_220 = arith.constant 0 : index
    %c0_221 = arith.constant 0 : index
    %c0_222 = arith.constant 0 : index
    %244 = vector.load %arg10[%c1_219, %c0_220, %c0_221, %c0_222] : memref<2x6x1x32xf32, #tpu.memory_space<vmem>>, vector<1x1x1x32xf32>
    %245 = vector.shape_cast %244 : vector<1x1x1x32xf32> to vector<1x32xf32>
    %246 = vector.broadcast %245 : vector<1x32xf32> to vector<16x32xf32>
    %247 = arith.addf %243, %246 : vector<16x32xf32>
    %c1_223 = arith.constant 1 : index
    %c0_224 = arith.constant 0 : index
    %c0_225 = arith.constant 0 : index
    %c0_226 = arith.constant 0 : index
    %c0_227 = arith.constant 0 : index
    %248 = vector.load %arg4[%c1_223, %c0_224, %c0_225, %c0_226, %c0_227] : memref<2x3x2x32x16xbf16, #tpu.memory_space<vmem>>, vector<1x1x1x32x16xbf16>
    %249 = vector.shape_cast %248 : vector<1x1x1x32x16xbf16> to vector<32x16xbf16>
    %250 = arith.extf %249 : vector<32x16xbf16> to vector<32x16xf32>
    %c1_228 = arith.constant 1 : index
    %c1_229 = arith.constant 1 : index
    %c0_230 = arith.constant 0 : index
    %c0_231 = arith.constant 0 : index
    %c0_232 = arith.constant 0 : index
    %251 = vector.load %arg4[%c1_228, %c1_229, %c0_230, %c0_231, %c0_232] : memref<2x3x2x32x16xbf16, #tpu.memory_space<vmem>>, vector<1x1x1x32x16xbf16>
    %252 = vector.shape_cast %251 : vector<1x1x1x32x16xbf16> to vector<32x16xbf16>
    %253 = arith.extf %252 : vector<32x16xbf16> to vector<32x16xf32>
    %c1_233 = arith.constant 1 : index
    %c2_234 = arith.constant 2 : index
    %c0_235 = arith.constant 0 : index
    %c0_236 = arith.constant 0 : index
    %c0_237 = arith.constant 0 : index
    %254 = vector.load %arg4[%c1_233, %c2_234, %c0_235, %c0_236, %c0_237] : memref<2x3x2x32x16xbf16, #tpu.memory_space<vmem>>, vector<1x1x1x32x16xbf16>
    %255 = vector.shape_cast %254 : vector<1x1x1x32x16xbf16> to vector<32x16xbf16>
    %256 = arith.extf %255 : vector<32x16xbf16> to vector<32x16xf32>
    %cst_238 = arith.constant dense<0.000000e+00> : vector<16x16xf32>
    %257 = tpu.matmul %242, %250, %cst_238 {dimension_numbers = #tpu.dot_dimension_numbers<[1], [0], [0], [1], [0, 0, 1, 1], [], []>} : vector<16x32xf32>, vector<32x16xf32>, vector<16x16xf32> -> vector<16x16xf32>
    %c1_239 = arith.constant 1 : index
    %c0_240 = arith.constant 0 : index
    %c0_241 = arith.constant 0 : index
    %c0_242 = arith.constant 0 : index
    %c0_243 = arith.constant 0 : index
    %258 = vector.load %arg5[%c1_239, %c0_240, %c0_241, %c0_242, %c0_243] : memref<2x3x2x1x16xf32, #tpu.memory_space<vmem>>, vector<1x1x1x1x16xf32>
    %259 = vector.shape_cast %258 : vector<1x1x1x1x16xf32> to vector<1x16xf32>
    %260 = vector.broadcast %259 : vector<1x16xf32> to vector<16x16xf32>
    %261 = arith.addf %257, %260 : vector<16x16xf32>
    %cst_244 = arith.constant dense<0.000000e+00> : vector<16x16xf32>
    %262 = tpu.matmul %242, %253, %cst_244 {dimension_numbers = #tpu.dot_dimension_numbers<[1], [0], [0], [1], [0, 0, 1, 1], [], []>} : vector<16x32xf32>, vector<32x16xf32>, vector<16x16xf32> -> vector<16x16xf32>
    %c1_245 = arith.constant 1 : index
    %c1_246 = arith.constant 1 : index
    %c0_247 = arith.constant 0 : index
    %c0_248 = arith.constant 0 : index
    %c0_249 = arith.constant 0 : index
    %263 = vector.load %arg5[%c1_245, %c1_246, %c0_247, %c0_248, %c0_249] : memref<2x3x2x1x16xf32, #tpu.memory_space<vmem>>, vector<1x1x1x1x16xf32>
    %264 = vector.shape_cast %263 : vector<1x1x1x1x16xf32> to vector<1x16xf32>
    %265 = vector.broadcast %264 : vector<1x16xf32> to vector<16x16xf32>
    %266 = arith.addf %262, %265 : vector<16x16xf32>
    %cst_250 = arith.constant dense<0.000000e+00> : vector<16x16xf32>
    %267 = tpu.matmul %242, %256, %cst_250 {dimension_numbers = #tpu.dot_dimension_numbers<[1], [0], [0], [1], [0, 0, 1, 1], [], []>} : vector<16x32xf32>, vector<32x16xf32>, vector<16x16xf32> -> vector<16x16xf32>
    %c1_251 = arith.constant 1 : index
    %c2_252 = arith.constant 2 : index
    %c0_253 = arith.constant 0 : index
    %c0_254 = arith.constant 0 : index
    %c0_255 = arith.constant 0 : index
    %268 = vector.load %arg5[%c1_251, %c2_252, %c0_253, %c0_254, %c0_255] : memref<2x3x2x1x16xf32, #tpu.memory_space<vmem>>, vector<1x1x1x1x16xf32>
    %269 = vector.shape_cast %268 : vector<1x1x1x1x16xf32> to vector<1x16xf32>
    %270 = vector.broadcast %269 : vector<1x16xf32> to vector<16x16xf32>
    %271 = arith.addf %267, %270 : vector<16x16xf32>
    %cst_256 = arith.constant dense<0.000000e+00> : vector<16x16xf32>
    %272 = tpu.matmul %261, %266, %cst_256 {dimension_numbers = #tpu.dot_dimension_numbers<[1], [1], [0], [0], [0, 0, 1, 0], [], []>} : vector<16x16xf32>, vector<16x16xf32>, vector<16x16xf32> -> vector<16x16xf32>
    %cst_257 = arith.constant 2.500000e-01 : f32
    %273 = vector.broadcast %cst_257 : f32 to vector<16x16xf32>
    %274 = arith.mulf %272, %273 : vector<16x16xf32>
    %275 = arith.addf %274, %4 : vector<16x16xf32>
    %cst_258 = arith.constant dense<0xFF800000> : vector<16xf32>
    %276 = vector.multi_reduction <maximumf>, %275, %cst_258 [1] : vector<16x16xf32> to vector<16xf32>
    %277 = vector.shape_cast %276 : vector<16xf32> to vector<16x1xf32>
    %278 = vector.broadcast %277 : vector<16x1xf32> to vector<16x16xf32>
    %279 = arith.subf %275, %278 : vector<16x16xf32>
    %280 = math.exp %279 : vector<16x16xf32>
    %cst_259 = arith.constant dense<0.000000e+00> : vector<16xf32>
    %281 = vector.multi_reduction <add>, %280, %cst_259 [1] : vector<16x16xf32> to vector<16xf32>
    %282 = vector.shape_cast %281 : vector<16xf32> to vector<16x1xf32>
    %283 = tpu.reciprocal %282 {approx = true} : vector<16x1xf32> -> vector<16x1xf32>
    %284 = vector.broadcast %283 : vector<16x1xf32> to vector<16x16xf32>
    %285 = arith.mulf %280, %284 : vector<16x16xf32>
    %cst_260 = arith.constant dense<0.000000e+00> : vector<16x16xf32>
    %286 = tpu.matmul %285, %271, %cst_260 {dimension_numbers = #tpu.dot_dimension_numbers<[1], [0], [0], [1], [0, 0, 1, 1], [], []>} : vector<16x16xf32>, vector<16x16xf32>, vector<16x16xf32> -> vector<16x16xf32>
    %c1_261 = arith.constant 1 : index
    %c0_262 = arith.constant 0 : index
    %c0_263 = arith.constant 0 : index
    %c0_264 = arith.constant 0 : index
    %287 = vector.load %arg6[%c1_261, %c0_262, %c0_263, %c0_264] : memref<2x2x16x32xbf16, #tpu.memory_space<vmem>>, vector<1x1x16x32xbf16>
    %288 = vector.shape_cast %287 : vector<1x1x16x32xbf16> to vector<16x32xbf16>
    %289 = arith.extf %288 : vector<16x32xbf16> to vector<16x32xf32>
    %cst_265 = arith.constant dense<0.000000e+00> : vector<16x32xf32>
    %290 = tpu.matmul %286, %289, %cst_265 {dimension_numbers = #tpu.dot_dimension_numbers<[1], [0], [0], [1], [0, 0, 1, 1], [], []>} : vector<16x16xf32>, vector<16x32xf32>, vector<16x32xf32> -> vector<16x32xf32>
    %291 = arith.addf %247, %290 : vector<16x32xf32>
    %c1_266 = arith.constant 1 : index
    %c0_267 = arith.constant 0 : index
    %c1_268 = arith.constant 1 : index
    %c0_269 = arith.constant 0 : index
    %c0_270 = arith.constant 0 : index
    %292 = vector.load %arg4[%c1_266, %c0_267, %c1_268, %c0_269, %c0_270] : memref<2x3x2x32x16xbf16, #tpu.memory_space<vmem>>, vector<1x1x1x32x16xbf16>
    %293 = vector.shape_cast %292 : vector<1x1x1x32x16xbf16> to vector<32x16xbf16>
    %294 = arith.extf %293 : vector<32x16xbf16> to vector<32x16xf32>
    %c1_271 = arith.constant 1 : index
    %c1_272 = arith.constant 1 : index
    %c1_273 = arith.constant 1 : index
    %c0_274 = arith.constant 0 : index
    %c0_275 = arith.constant 0 : index
    %295 = vector.load %arg4[%c1_271, %c1_272, %c1_273, %c0_274, %c0_275] : memref<2x3x2x32x16xbf16, #tpu.memory_space<vmem>>, vector<1x1x1x32x16xbf16>
    %296 = vector.shape_cast %295 : vector<1x1x1x32x16xbf16> to vector<32x16xbf16>
    %297 = arith.extf %296 : vector<32x16xbf16> to vector<32x16xf32>
    %c1_276 = arith.constant 1 : index
    %c2_277 = arith.constant 2 : index
    %c1_278 = arith.constant 1 : index
    %c0_279 = arith.constant 0 : index
    %c0_280 = arith.constant 0 : index
    %298 = vector.load %arg4[%c1_276, %c2_277, %c1_278, %c0_279, %c0_280] : memref<2x3x2x32x16xbf16, #tpu.memory_space<vmem>>, vector<1x1x1x32x16xbf16>
    %299 = vector.shape_cast %298 : vector<1x1x1x32x16xbf16> to vector<32x16xbf16>
    %300 = arith.extf %299 : vector<32x16xbf16> to vector<32x16xf32>
    %cst_281 = arith.constant dense<0.000000e+00> : vector<16x16xf32>
    %301 = tpu.matmul %242, %294, %cst_281 {dimension_numbers = #tpu.dot_dimension_numbers<[1], [0], [0], [1], [0, 0, 1, 1], [], []>} : vector<16x32xf32>, vector<32x16xf32>, vector<16x16xf32> -> vector<16x16xf32>
    %c1_282 = arith.constant 1 : index
    %c0_283 = arith.constant 0 : index
    %c1_284 = arith.constant 1 : index
    %c0_285 = arith.constant 0 : index
    %c0_286 = arith.constant 0 : index
    %302 = vector.load %arg5[%c1_282, %c0_283, %c1_284, %c0_285, %c0_286] : memref<2x3x2x1x16xf32, #tpu.memory_space<vmem>>, vector<1x1x1x1x16xf32>
    %303 = vector.shape_cast %302 : vector<1x1x1x1x16xf32> to vector<1x16xf32>
    %304 = vector.broadcast %303 : vector<1x16xf32> to vector<16x16xf32>
    %305 = arith.addf %301, %304 : vector<16x16xf32>
    %cst_287 = arith.constant dense<0.000000e+00> : vector<16x16xf32>
    %306 = tpu.matmul %242, %297, %cst_287 {dimension_numbers = #tpu.dot_dimension_numbers<[1], [0], [0], [1], [0, 0, 1, 1], [], []>} : vector<16x32xf32>, vector<32x16xf32>, vector<16x16xf32> -> vector<16x16xf32>
    %c1_288 = arith.constant 1 : index
    %c1_289 = arith.constant 1 : index
    %c1_290 = arith.constant 1 : index
    %c0_291 = arith.constant 0 : index
    %c0_292 = arith.constant 0 : index
    %307 = vector.load %arg5[%c1_288, %c1_289, %c1_290, %c0_291, %c0_292] : memref<2x3x2x1x16xf32, #tpu.memory_space<vmem>>, vector<1x1x1x1x16xf32>
    %308 = vector.shape_cast %307 : vector<1x1x1x1x16xf32> to vector<1x16xf32>
    %309 = vector.broadcast %308 : vector<1x16xf32> to vector<16x16xf32>
    %310 = arith.addf %306, %309 : vector<16x16xf32>
    %cst_293 = arith.constant dense<0.000000e+00> : vector<16x16xf32>
    %311 = tpu.matmul %242, %300, %cst_293 {dimension_numbers = #tpu.dot_dimension_numbers<[1], [0], [0], [1], [0, 0, 1, 1], [], []>} : vector<16x32xf32>, vector<32x16xf32>, vector<16x16xf32> -> vector<16x16xf32>
    %c1_294 = arith.constant 1 : index
    %c2_295 = arith.constant 2 : index
    %c1_296 = arith.constant 1 : index
    %c0_297 = arith.constant 0 : index
    %c0_298 = arith.constant 0 : index
    %312 = vector.load %arg5[%c1_294, %c2_295, %c1_296, %c0_297, %c0_298] : memref<2x3x2x1x16xf32, #tpu.memory_space<vmem>>, vector<1x1x1x1x16xf32>
    %313 = vector.shape_cast %312 : vector<1x1x1x1x16xf32> to vector<1x16xf32>
    %314 = vector.broadcast %313 : vector<1x16xf32> to vector<16x16xf32>
    %315 = arith.addf %311, %314 : vector<16x16xf32>
    %cst_299 = arith.constant dense<0.000000e+00> : vector<16x16xf32>
    %316 = tpu.matmul %305, %310, %cst_299 {dimension_numbers = #tpu.dot_dimension_numbers<[1], [1], [0], [0], [0, 0, 1, 0], [], []>} : vector<16x16xf32>, vector<16x16xf32>, vector<16x16xf32> -> vector<16x16xf32>
    %cst_300 = arith.constant 2.500000e-01 : f32
    %317 = vector.broadcast %cst_300 : f32 to vector<16x16xf32>
    %318 = arith.mulf %316, %317 : vector<16x16xf32>
    %319 = arith.addf %318, %4 : vector<16x16xf32>
    %cst_301 = arith.constant dense<0xFF800000> : vector<16xf32>
    %320 = vector.multi_reduction <maximumf>, %319, %cst_301 [1] : vector<16x16xf32> to vector<16xf32>
    %321 = vector.shape_cast %320 : vector<16xf32> to vector<16x1xf32>
    %322 = vector.broadcast %321 : vector<16x1xf32> to vector<16x16xf32>
    %323 = arith.subf %319, %322 : vector<16x16xf32>
    %324 = math.exp %323 : vector<16x16xf32>
    %cst_302 = arith.constant dense<0.000000e+00> : vector<16xf32>
    %325 = vector.multi_reduction <add>, %324, %cst_302 [1] : vector<16x16xf32> to vector<16xf32>
    %326 = vector.shape_cast %325 : vector<16xf32> to vector<16x1xf32>
    %327 = tpu.reciprocal %326 {approx = true} : vector<16x1xf32> -> vector<16x1xf32>
    %328 = vector.broadcast %327 : vector<16x1xf32> to vector<16x16xf32>
    %329 = arith.mulf %324, %328 : vector<16x16xf32>
    %cst_303 = arith.constant dense<0.000000e+00> : vector<16x16xf32>
    %330 = tpu.matmul %329, %315, %cst_303 {dimension_numbers = #tpu.dot_dimension_numbers<[1], [0], [0], [1], [0, 0, 1, 1], [], []>} : vector<16x16xf32>, vector<16x16xf32>, vector<16x16xf32> -> vector<16x16xf32>
    %c1_304 = arith.constant 1 : index
    %c1_305 = arith.constant 1 : index
    %c0_306 = arith.constant 0 : index
    %c0_307 = arith.constant 0 : index
    %331 = vector.load %arg6[%c1_304, %c1_305, %c0_306, %c0_307] : memref<2x2x16x32xbf16, #tpu.memory_space<vmem>>, vector<1x1x16x32xbf16>
    %332 = vector.shape_cast %331 : vector<1x1x16x32xbf16> to vector<16x32xbf16>
    %333 = arith.extf %332 : vector<16x32xbf16> to vector<16x32xf32>
    %cst_308 = arith.constant dense<0.000000e+00> : vector<16x32xf32>
    %334 = tpu.matmul %330, %333, %cst_308 {dimension_numbers = #tpu.dot_dimension_numbers<[1], [0], [0], [1], [0, 0, 1, 1], [], []>} : vector<16x16xf32>, vector<16x32xf32>, vector<16x32xf32> -> vector<16x32xf32>
    %335 = arith.addf %291, %334 : vector<16x32xf32>
    %336 = arith.addf %335, %242 : vector<16x32xf32>
    %c1_309 = arith.constant 1 : index
    %c1_310 = arith.constant 1 : index
    %c0_311 = arith.constant 0 : index
    %c0_312 = arith.constant 0 : index
    %337 = vector.load %arg10[%c1_309, %c1_310, %c0_311, %c0_312] : memref<2x6x1x32xf32, #tpu.memory_space<vmem>>, vector<1x1x1x32xf32>
    %338 = vector.shape_cast %337 : vector<1x1x1x32xf32> to vector<1x32xf32>
    %c1_313 = arith.constant 1 : index
    %c2_314 = arith.constant 2 : index
    %c0_315 = arith.constant 0 : index
    %c0_316 = arith.constant 0 : index
    %339 = vector.load %arg10[%c1_313, %c2_314, %c0_315, %c0_316] : memref<2x6x1x32xf32, #tpu.memory_space<vmem>>, vector<1x1x1x32xf32>
    %340 = vector.shape_cast %339 : vector<1x1x1x32xf32> to vector<1x32xf32>
    %cst_317 = arith.constant dense<0.000000e+00> : vector<16xf32>
    %341 = vector.multi_reduction <add>, %336, %cst_317 [1] : vector<16x32xf32> to vector<16xf32>
    %342 = vector.shape_cast %341 : vector<16xf32> to vector<16x1xf32>
    %cst_318 = arith.constant 3.200000e+01 : f32
    %343 = vector.broadcast %cst_318 : f32 to vector<16x1xf32>
    %344 = arith.divf %342, %343 : vector<16x1xf32>
    %345 = vector.broadcast %344 : vector<16x1xf32> to vector<16x32xf32>
    %346 = arith.subf %336, %345 : vector<16x32xf32>
    %347 = arith.mulf %346, %346 : vector<16x32xf32>
    %cst_319 = arith.constant dense<0.000000e+00> : vector<16xf32>
    %348 = vector.multi_reduction <add>, %347, %cst_319 [1] : vector<16x32xf32> to vector<16xf32>
    %349 = vector.shape_cast %348 : vector<16xf32> to vector<16x1xf32>
    %cst_320 = arith.constant 3.200000e+01 : f32
    %350 = vector.broadcast %cst_320 : f32 to vector<16x1xf32>
    %351 = arith.divf %349, %350 : vector<16x1xf32>
    %352 = vector.broadcast %344 : vector<16x1xf32> to vector<16x32xf32>
    %353 = arith.subf %336, %352 : vector<16x32xf32>
    %cst_321 = arith.constant 9.99999974E-6 : f32
    %354 = vector.broadcast %cst_321 : f32 to vector<16x1xf32>
    %355 = arith.addf %351, %354 : vector<16x1xf32>
    %356 = math.rsqrt %355 : vector<16x1xf32>
    %357 = vector.broadcast %356 : vector<16x1xf32> to vector<16x32xf32>
    %358 = arith.mulf %353, %357 : vector<16x32xf32>
    %359 = vector.broadcast %338 : vector<1x32xf32> to vector<16x32xf32>
    %360 = arith.mulf %358, %359 : vector<16x32xf32>
    %361 = vector.broadcast %340 : vector<1x32xf32> to vector<16x32xf32>
    %362 = arith.addf %360, %361 : vector<16x32xf32>
    %363 = vector.broadcast %2 : vector<16x1xf32> to vector<16x32xf32>
    %364 = arith.mulf %362, %363 : vector<16x32xf32>
    %cst_322 = arith.constant 0.000000e+00 : f32
    %365 = vector.broadcast %cst_322 : f32 to vector<16x64xf32>
    %c1_323 = arith.constant 1 : index
    %c0_324 = arith.constant 0 : index
    %c0_325 = arith.constant 0 : index
    %366 = vector.load %arg9[%c1_323, %c0_324, %c0_325] : memref<2x1x64xf32, #tpu.memory_space<vmem>>, vector<1x1x64xf32>
    %367 = vector.shape_cast %366 : vector<1x1x64xf32> to vector<1x64xf32>
    %368 = vector.broadcast %367 : vector<1x64xf32> to vector<16x64xf32>
    %369 = arith.addf %365, %368 : vector<16x64xf32>
    %c0_326 = arith.constant 0 : index
    %c1_327 = arith.constant 1 : index
    %c0_328 = arith.constant 0 : index
    %c0_329 = arith.constant 0 : index
    %370 = vector.load %arg2[%c0_326, %c1_327, %c0_328, %c0_329] : memref<1x10x16x16xf32, #tpu.memory_space<vmem>>, vector<1x1x16x16xf32>
    %371 = vector.shape_cast %370 : vector<1x1x16x16xf32> to vector<16x16xf32>
    %cst_330 = arith.constant dense<0.000000e+00> : vector<16x32xf32>
    %372 = tpu.matmul %371, %364, %cst_330 {dimension_numbers = #tpu.dot_dimension_numbers<[1], [0], [0], [1], [0, 0, 1, 1], [], []>} : vector<16x16xf32>, vector<16x32xf32>, vector<16x32xf32> -> vector<16x32xf32>
    %c1_331 = arith.constant 1 : index
    %c0_332 = arith.constant 0 : index
    %c0_333 = arith.constant 0 : index
    %c0_334 = arith.constant 0 : index
    %373 = vector.load %arg7[%c1_331, %c0_332, %c0_333, %c0_334] : memref<2x9x32x64xbf16, #tpu.memory_space<vmem>>, vector<1x1x32x64xbf16>
    %374 = vector.shape_cast %373 : vector<1x1x32x64xbf16> to vector<32x64xbf16>
    %375 = arith.extf %374 : vector<32x64xbf16> to vector<32x64xf32>
    %cst_335 = arith.constant dense<0.000000e+00> : vector<16x64xf32>
    %376 = tpu.matmul %372, %375, %cst_335 {dimension_numbers = #tpu.dot_dimension_numbers<[1], [0], [0], [1], [0, 0, 1, 1], [], []>} : vector<16x32xf32>, vector<32x64xf32>, vector<16x64xf32> -> vector<16x64xf32>
    %377 = arith.addf %369, %376 : vector<16x64xf32>
    %c0_336 = arith.constant 0 : index
    %c2_337 = arith.constant 2 : index
    %c0_338 = arith.constant 0 : index
    %c0_339 = arith.constant 0 : index
    %378 = vector.load %arg2[%c0_336, %c2_337, %c0_338, %c0_339] : memref<1x10x16x16xf32, #tpu.memory_space<vmem>>, vector<1x1x16x16xf32>
    %379 = vector.shape_cast %378 : vector<1x1x16x16xf32> to vector<16x16xf32>
    %cst_340 = arith.constant dense<0.000000e+00> : vector<16x32xf32>
    %380 = tpu.matmul %379, %364, %cst_340 {dimension_numbers = #tpu.dot_dimension_numbers<[1], [0], [0], [1], [0, 0, 1, 1], [], []>} : vector<16x16xf32>, vector<16x32xf32>, vector<16x32xf32> -> vector<16x32xf32>
    %c1_341 = arith.constant 1 : index
    %c1_342 = arith.constant 1 : index
    %c0_343 = arith.constant 0 : index
    %c0_344 = arith.constant 0 : index
    %381 = vector.load %arg7[%c1_341, %c1_342, %c0_343, %c0_344] : memref<2x9x32x64xbf16, #tpu.memory_space<vmem>>, vector<1x1x32x64xbf16>
    %382 = vector.shape_cast %381 : vector<1x1x32x64xbf16> to vector<32x64xbf16>
    %383 = arith.extf %382 : vector<32x64xbf16> to vector<32x64xf32>
    %cst_345 = arith.constant dense<0.000000e+00> : vector<16x64xf32>
    %384 = tpu.matmul %380, %383, %cst_345 {dimension_numbers = #tpu.dot_dimension_numbers<[1], [0], [0], [1], [0, 0, 1, 1], [], []>} : vector<16x32xf32>, vector<32x64xf32>, vector<16x64xf32> -> vector<16x64xf32>
    %385 = arith.addf %377, %384 : vector<16x64xf32>
    %c0_346 = arith.constant 0 : index
    %c3_347 = arith.constant 3 : index
    %c0_348 = arith.constant 0 : index
    %c0_349 = arith.constant 0 : index
    %386 = vector.load %arg2[%c0_346, %c3_347, %c0_348, %c0_349] : memref<1x10x16x16xf32, #tpu.memory_space<vmem>>, vector<1x1x16x16xf32>
    %387 = vector.shape_cast %386 : vector<1x1x16x16xf32> to vector<16x16xf32>
    %cst_350 = arith.constant dense<0.000000e+00> : vector<16x32xf32>
    %388 = tpu.matmul %387, %364, %cst_350 {dimension_numbers = #tpu.dot_dimension_numbers<[1], [0], [0], [1], [0, 0, 1, 1], [], []>} : vector<16x16xf32>, vector<16x32xf32>, vector<16x32xf32> -> vector<16x32xf32>
    %c1_351 = arith.constant 1 : index
    %c2_352 = arith.constant 2 : index
    %c0_353 = arith.constant 0 : index
    %c0_354 = arith.constant 0 : index
    %389 = vector.load %arg7[%c1_351, %c2_352, %c0_353, %c0_354] : memref<2x9x32x64xbf16, #tpu.memory_space<vmem>>, vector<1x1x32x64xbf16>
    %390 = vector.shape_cast %389 : vector<1x1x32x64xbf16> to vector<32x64xbf16>
    %391 = arith.extf %390 : vector<32x64xbf16> to vector<32x64xf32>
    %cst_355 = arith.constant dense<0.000000e+00> : vector<16x64xf32>
    %392 = tpu.matmul %388, %391, %cst_355 {dimension_numbers = #tpu.dot_dimension_numbers<[1], [0], [0], [1], [0, 0, 1, 1], [], []>} : vector<16x32xf32>, vector<32x64xf32>, vector<16x64xf32> -> vector<16x64xf32>
    %393 = arith.addf %385, %392 : vector<16x64xf32>
    %c0_356 = arith.constant 0 : index
    %c4_357 = arith.constant 4 : index
    %c0_358 = arith.constant 0 : index
    %c0_359 = arith.constant 0 : index
    %394 = vector.load %arg2[%c0_356, %c4_357, %c0_358, %c0_359] : memref<1x10x16x16xf32, #tpu.memory_space<vmem>>, vector<1x1x16x16xf32>
    %395 = vector.shape_cast %394 : vector<1x1x16x16xf32> to vector<16x16xf32>
    %cst_360 = arith.constant dense<0.000000e+00> : vector<16x32xf32>
    %396 = tpu.matmul %395, %364, %cst_360 {dimension_numbers = #tpu.dot_dimension_numbers<[1], [0], [0], [1], [0, 0, 1, 1], [], []>} : vector<16x16xf32>, vector<16x32xf32>, vector<16x32xf32> -> vector<16x32xf32>
    %c1_361 = arith.constant 1 : index
    %c3_362 = arith.constant 3 : index
    %c0_363 = arith.constant 0 : index
    %c0_364 = arith.constant 0 : index
    %397 = vector.load %arg7[%c1_361, %c3_362, %c0_363, %c0_364] : memref<2x9x32x64xbf16, #tpu.memory_space<vmem>>, vector<1x1x32x64xbf16>
    %398 = vector.shape_cast %397 : vector<1x1x32x64xbf16> to vector<32x64xbf16>
    %399 = arith.extf %398 : vector<32x64xbf16> to vector<32x64xf32>
    %cst_365 = arith.constant dense<0.000000e+00> : vector<16x64xf32>
    %400 = tpu.matmul %396, %399, %cst_365 {dimension_numbers = #tpu.dot_dimension_numbers<[1], [0], [0], [1], [0, 0, 1, 1], [], []>} : vector<16x32xf32>, vector<32x64xf32>, vector<16x64xf32> -> vector<16x64xf32>
    %401 = arith.addf %393, %400 : vector<16x64xf32>
    %c0_366 = arith.constant 0 : index
    %c5_367 = arith.constant 5 : index
    %c0_368 = arith.constant 0 : index
    %c0_369 = arith.constant 0 : index
    %402 = vector.load %arg2[%c0_366, %c5_367, %c0_368, %c0_369] : memref<1x10x16x16xf32, #tpu.memory_space<vmem>>, vector<1x1x16x16xf32>
    %403 = vector.shape_cast %402 : vector<1x1x16x16xf32> to vector<16x16xf32>
    %cst_370 = arith.constant dense<0.000000e+00> : vector<16x32xf32>
    %404 = tpu.matmul %403, %364, %cst_370 {dimension_numbers = #tpu.dot_dimension_numbers<[1], [0], [0], [1], [0, 0, 1, 1], [], []>} : vector<16x16xf32>, vector<16x32xf32>, vector<16x32xf32> -> vector<16x32xf32>
    %c1_371 = arith.constant 1 : index
    %c4_372 = arith.constant 4 : index
    %c0_373 = arith.constant 0 : index
    %c0_374 = arith.constant 0 : index
    %405 = vector.load %arg7[%c1_371, %c4_372, %c0_373, %c0_374] : memref<2x9x32x64xbf16, #tpu.memory_space<vmem>>, vector<1x1x32x64xbf16>
    %406 = vector.shape_cast %405 : vector<1x1x32x64xbf16> to vector<32x64xbf16>
    %407 = arith.extf %406 : vector<32x64xbf16> to vector<32x64xf32>
    %cst_375 = arith.constant dense<0.000000e+00> : vector<16x64xf32>
    %408 = tpu.matmul %404, %407, %cst_375 {dimension_numbers = #tpu.dot_dimension_numbers<[1], [0], [0], [1], [0, 0, 1, 1], [], []>} : vector<16x32xf32>, vector<32x64xf32>, vector<16x64xf32> -> vector<16x64xf32>
    %409 = arith.addf %401, %408 : vector<16x64xf32>
    %c0_376 = arith.constant 0 : index
    %c6_377 = arith.constant 6 : index
    %c0_378 = arith.constant 0 : index
    %c0_379 = arith.constant 0 : index
    %410 = vector.load %arg2[%c0_376, %c6_377, %c0_378, %c0_379] : memref<1x10x16x16xf32, #tpu.memory_space<vmem>>, vector<1x1x16x16xf32>
    %411 = vector.shape_cast %410 : vector<1x1x16x16xf32> to vector<16x16xf32>
    %cst_380 = arith.constant dense<0.000000e+00> : vector<16x32xf32>
    %412 = tpu.matmul %411, %364, %cst_380 {dimension_numbers = #tpu.dot_dimension_numbers<[1], [0], [0], [1], [0, 0, 1, 1], [], []>} : vector<16x16xf32>, vector<16x32xf32>, vector<16x32xf32> -> vector<16x32xf32>
    %c1_381 = arith.constant 1 : index
    %c5_382 = arith.constant 5 : index
    %c0_383 = arith.constant 0 : index
    %c0_384 = arith.constant 0 : index
    %413 = vector.load %arg7[%c1_381, %c5_382, %c0_383, %c0_384] : memref<2x9x32x64xbf16, #tpu.memory_space<vmem>>, vector<1x1x32x64xbf16>
    %414 = vector.shape_cast %413 : vector<1x1x32x64xbf16> to vector<32x64xbf16>
    %415 = arith.extf %414 : vector<32x64xbf16> to vector<32x64xf32>
    %cst_385 = arith.constant dense<0.000000e+00> : vector<16x64xf32>
    %416 = tpu.matmul %412, %415, %cst_385 {dimension_numbers = #tpu.dot_dimension_numbers<[1], [0], [0], [1], [0, 0, 1, 1], [], []>} : vector<16x32xf32>, vector<32x64xf32>, vector<16x64xf32> -> vector<16x64xf32>
    %417 = arith.addf %409, %416 : vector<16x64xf32>
    %c0_386 = arith.constant 0 : index
    %c7_387 = arith.constant 7 : index
    %c0_388 = arith.constant 0 : index
    %c0_389 = arith.constant 0 : index
    %418 = vector.load %arg2[%c0_386, %c7_387, %c0_388, %c0_389] : memref<1x10x16x16xf32, #tpu.memory_space<vmem>>, vector<1x1x16x16xf32>
    %419 = vector.shape_cast %418 : vector<1x1x16x16xf32> to vector<16x16xf32>
    %cst_390 = arith.constant dense<0.000000e+00> : vector<16x32xf32>
    %420 = tpu.matmul %419, %364, %cst_390 {dimension_numbers = #tpu.dot_dimension_numbers<[1], [0], [0], [1], [0, 0, 1, 1], [], []>} : vector<16x16xf32>, vector<16x32xf32>, vector<16x32xf32> -> vector<16x32xf32>
    %c1_391 = arith.constant 1 : index
    %c6_392 = arith.constant 6 : index
    %c0_393 = arith.constant 0 : index
    %c0_394 = arith.constant 0 : index
    %421 = vector.load %arg7[%c1_391, %c6_392, %c0_393, %c0_394] : memref<2x9x32x64xbf16, #tpu.memory_space<vmem>>, vector<1x1x32x64xbf16>
    %422 = vector.shape_cast %421 : vector<1x1x32x64xbf16> to vector<32x64xbf16>
    %423 = arith.extf %422 : vector<32x64xbf16> to vector<32x64xf32>
    %cst_395 = arith.constant dense<0.000000e+00> : vector<16x64xf32>
    %424 = tpu.matmul %420, %423, %cst_395 {dimension_numbers = #tpu.dot_dimension_numbers<[1], [0], [0], [1], [0, 0, 1, 1], [], []>} : vector<16x32xf32>, vector<32x64xf32>, vector<16x64xf32> -> vector<16x64xf32>
    %425 = arith.addf %417, %424 : vector<16x64xf32>
    %c0_396 = arith.constant 0 : index
    %c8_397 = arith.constant 8 : index
    %c0_398 = arith.constant 0 : index
    %c0_399 = arith.constant 0 : index
    %426 = vector.load %arg2[%c0_396, %c8_397, %c0_398, %c0_399] : memref<1x10x16x16xf32, #tpu.memory_space<vmem>>, vector<1x1x16x16xf32>
    %427 = vector.shape_cast %426 : vector<1x1x16x16xf32> to vector<16x16xf32>
    %cst_400 = arith.constant dense<0.000000e+00> : vector<16x32xf32>
    %428 = tpu.matmul %427, %364, %cst_400 {dimension_numbers = #tpu.dot_dimension_numbers<[1], [0], [0], [1], [0, 0, 1, 1], [], []>} : vector<16x16xf32>, vector<16x32xf32>, vector<16x32xf32> -> vector<16x32xf32>
    %c1_401 = arith.constant 1 : index
    %c7_402 = arith.constant 7 : index
    %c0_403 = arith.constant 0 : index
    %c0_404 = arith.constant 0 : index
    %429 = vector.load %arg7[%c1_401, %c7_402, %c0_403, %c0_404] : memref<2x9x32x64xbf16, #tpu.memory_space<vmem>>, vector<1x1x32x64xbf16>
    %430 = vector.shape_cast %429 : vector<1x1x32x64xbf16> to vector<32x64xbf16>
    %431 = arith.extf %430 : vector<32x64xbf16> to vector<32x64xf32>
    %cst_405 = arith.constant dense<0.000000e+00> : vector<16x64xf32>
    %432 = tpu.matmul %428, %431, %cst_405 {dimension_numbers = #tpu.dot_dimension_numbers<[1], [0], [0], [1], [0, 0, 1, 1], [], []>} : vector<16x32xf32>, vector<32x64xf32>, vector<16x64xf32> -> vector<16x64xf32>
    %433 = arith.addf %425, %432 : vector<16x64xf32>
    %c0_406 = arith.constant 0 : index
    %c9_407 = arith.constant 9 : index
    %c0_408 = arith.constant 0 : index
    %c0_409 = arith.constant 0 : index
    %434 = vector.load %arg2[%c0_406, %c9_407, %c0_408, %c0_409] : memref<1x10x16x16xf32, #tpu.memory_space<vmem>>, vector<1x1x16x16xf32>
    %435 = vector.shape_cast %434 : vector<1x1x16x16xf32> to vector<16x16xf32>
    %cst_410 = arith.constant dense<0.000000e+00> : vector<16x32xf32>
    %436 = tpu.matmul %435, %364, %cst_410 {dimension_numbers = #tpu.dot_dimension_numbers<[1], [0], [0], [1], [0, 0, 1, 1], [], []>} : vector<16x16xf32>, vector<16x32xf32>, vector<16x32xf32> -> vector<16x32xf32>
    %c1_411 = arith.constant 1 : index
    %c8_412 = arith.constant 8 : index
    %c0_413 = arith.constant 0 : index
    %c0_414 = arith.constant 0 : index
    %437 = vector.load %arg7[%c1_411, %c8_412, %c0_413, %c0_414] : memref<2x9x32x64xbf16, #tpu.memory_space<vmem>>, vector<1x1x32x64xbf16>
    %438 = vector.shape_cast %437 : vector<1x1x32x64xbf16> to vector<32x64xbf16>
    %439 = arith.extf %438 : vector<32x64xbf16> to vector<32x64xf32>
    %cst_415 = arith.constant dense<0.000000e+00> : vector<16x64xf32>
    %440 = tpu.matmul %436, %439, %cst_415 {dimension_numbers = #tpu.dot_dimension_numbers<[1], [0], [0], [1], [0, 0, 1, 1], [], []>} : vector<16x32xf32>, vector<32x64xf32>, vector<16x64xf32> -> vector<16x64xf32>
    %441 = arith.addf %433, %440 : vector<16x64xf32>
    %cst_416 = arith.constant 0.000000e+00 : f32
    %442 = vector.broadcast %cst_416 : f32 to vector<16x64xf32>
    %443 = arith.maximumf %441, %442 : vector<16x64xf32>
    %c1_417 = arith.constant 1 : index
    %c0_418 = arith.constant 0 : index
    %c0_419 = arith.constant 0 : index
    %444 = vector.load %arg8[%c1_417, %c0_418, %c0_419] : memref<2x64x32xbf16, #tpu.memory_space<vmem>>, vector<1x64x32xbf16>
    %445 = vector.shape_cast %444 : vector<1x64x32xbf16> to vector<64x32xbf16>
    %446 = arith.extf %445 : vector<64x32xbf16> to vector<64x32xf32>
    %cst_420 = arith.constant dense<0.000000e+00> : vector<16x32xf32>
    %447 = tpu.matmul %443, %446, %cst_420 {dimension_numbers = #tpu.dot_dimension_numbers<[1], [0], [0], [1], [0, 0, 1, 1], [], []>} : vector<16x64xf32>, vector<64x32xf32>, vector<16x32xf32> -> vector<16x32xf32>
    %c1_421 = arith.constant 1 : index
    %c3_422 = arith.constant 3 : index
    %c0_423 = arith.constant 0 : index
    %c0_424 = arith.constant 0 : index
    %448 = vector.load %arg10[%c1_421, %c3_422, %c0_423, %c0_424] : memref<2x6x1x32xf32, #tpu.memory_space<vmem>>, vector<1x1x1x32xf32>
    %449 = vector.shape_cast %448 : vector<1x1x1x32xf32> to vector<1x32xf32>
    %450 = vector.broadcast %449 : vector<1x32xf32> to vector<16x32xf32>
    %451 = arith.addf %447, %450 : vector<16x32xf32>
    %452 = arith.addf %451, %364 : vector<16x32xf32>
    %c1_425 = arith.constant 1 : index
    %c4_426 = arith.constant 4 : index
    %c0_427 = arith.constant 0 : index
    %c0_428 = arith.constant 0 : index
    %453 = vector.load %arg10[%c1_425, %c4_426, %c0_427, %c0_428] : memref<2x6x1x32xf32, #tpu.memory_space<vmem>>, vector<1x1x1x32xf32>
    %454 = vector.shape_cast %453 : vector<1x1x1x32xf32> to vector<1x32xf32>
    %c1_429 = arith.constant 1 : index
    %c5_430 = arith.constant 5 : index
    %c0_431 = arith.constant 0 : index
    %c0_432 = arith.constant 0 : index
    %455 = vector.load %arg10[%c1_429, %c5_430, %c0_431, %c0_432] : memref<2x6x1x32xf32, #tpu.memory_space<vmem>>, vector<1x1x1x32xf32>
    %456 = vector.shape_cast %455 : vector<1x1x1x32xf32> to vector<1x32xf32>
    %cst_433 = arith.constant dense<0.000000e+00> : vector<16xf32>
    %457 = vector.multi_reduction <add>, %452, %cst_433 [1] : vector<16x32xf32> to vector<16xf32>
    %458 = vector.shape_cast %457 : vector<16xf32> to vector<16x1xf32>
    %cst_434 = arith.constant 3.200000e+01 : f32
    %459 = vector.broadcast %cst_434 : f32 to vector<16x1xf32>
    %460 = arith.divf %458, %459 : vector<16x1xf32>
    %461 = vector.broadcast %460 : vector<16x1xf32> to vector<16x32xf32>
    %462 = arith.subf %452, %461 : vector<16x32xf32>
    %463 = arith.mulf %462, %462 : vector<16x32xf32>
    %cst_435 = arith.constant dense<0.000000e+00> : vector<16xf32>
    %464 = vector.multi_reduction <add>, %463, %cst_435 [1] : vector<16x32xf32> to vector<16xf32>
    %465 = vector.shape_cast %464 : vector<16xf32> to vector<16x1xf32>
    %cst_436 = arith.constant 3.200000e+01 : f32
    %466 = vector.broadcast %cst_436 : f32 to vector<16x1xf32>
    %467 = arith.divf %465, %466 : vector<16x1xf32>
    %468 = vector.broadcast %460 : vector<16x1xf32> to vector<16x32xf32>
    %469 = arith.subf %452, %468 : vector<16x32xf32>
    %cst_437 = arith.constant 9.99999974E-6 : f32
    %470 = vector.broadcast %cst_437 : f32 to vector<16x1xf32>
    %471 = arith.addf %467, %470 : vector<16x1xf32>
    %472 = math.rsqrt %471 : vector<16x1xf32>
    %473 = vector.broadcast %472 : vector<16x1xf32> to vector<16x32xf32>
    %474 = arith.mulf %469, %473 : vector<16x32xf32>
    %475 = vector.broadcast %454 : vector<1x32xf32> to vector<16x32xf32>
    %476 = arith.mulf %474, %475 : vector<16x32xf32>
    %477 = vector.broadcast %456 : vector<1x32xf32> to vector<16x32xf32>
    %478 = arith.addf %476, %477 : vector<16x32xf32>
    %479 = vector.broadcast %2 : vector<16x1xf32> to vector<16x32xf32>
    %480 = arith.mulf %478, %479 : vector<16x32xf32>
    %c0_438 = arith.constant 0 : index
    %c0_439 = arith.constant 0 : index
    %481 = vector.load %arg11[%c0_438, %c0_439] : memref<16x32xf32, #tpu.memory_space<vmem>>, vector<16x32xf32>
    tpu.vector_store %arg11[%c0_438, %c0_439], %480 {strides = array<i32>} : memref<16x32xf32, #tpu.memory_space<vmem>>, vector<16x32xf32>,
    return
  }
  func.func @transform_0(%arg0: i32) -> (i32, i32) {
    %c0_i32 = arith.constant 0 : i32
    %c0_i32_0 = arith.constant 0 : i32
    return %arg0, %c0_i32 : i32, i32
  }
  func.func @transform_1(%arg0: i32) -> (i32, i32, i32, i32) {
    %c0_i32 = arith.constant 0 : i32
    %c0_i32_0 = arith.constant 0 : i32
    %c0_i32_1 = arith.constant 0 : i32
    %c0_i32_2 = arith.constant 0 : i32
    return %arg0, %c0_i32, %c0_i32_0, %c0_i32_1 : i32, i32, i32, i32
  }
  func.func @transform_2(%arg0: i32) -> (i32, i32, i32) {
    %c0_i32 = arith.constant 0 : i32
    %c0_i32_0 = arith.constant 0 : i32
    %c0_i32_1 = arith.constant 0 : i32
    return %arg0, %c0_i32, %c0_i32_0 : i32, i32, i32
  }
  func.func @transform_3(%arg0: i32) -> (i32, i32, i32, i32, i32) {
    %c0_i32 = arith.constant 0 : i32
    %c0_i32_0 = arith.constant 0 : i32
    %c0_i32_1 = arith.constant 0 : i32
    %c0_i32_2 = arith.constant 0 : i32
    %c0_i32_3 = arith.constant 0 : i32
    %c0_i32_4 = arith.constant 0 : i32
    return %c0_i32, %c0_i32_0, %c0_i32_1, %c0_i32_2, %c0_i32_3 : i32, i32, i32, i32, i32
  }
  func.func @transform_4(%arg0: i32) -> (i32, i32, i32, i32, i32) {
    %c0_i32 = arith.constant 0 : i32
    %c0_i32_0 = arith.constant 0 : i32
    %c0_i32_1 = arith.constant 0 : i32
    %c0_i32_2 = arith.constant 0 : i32
    %c0_i32_3 = arith.constant 0 : i32
    %c0_i32_4 = arith.constant 0 : i32
    return %c0_i32, %c0_i32_0, %c0_i32_1, %c0_i32_2, %c0_i32_3 : i32, i32, i32, i32, i32
  }
  func.func @transform_5(%arg0: i32) -> (i32, i32, i32, i32) {
    %c0_i32 = arith.constant 0 : i32
    %c0_i32_0 = arith.constant 0 : i32
    %c0_i32_1 = arith.constant 0 : i32
    %c0_i32_2 = arith.constant 0 : i32
    %c0_i32_3 = arith.constant 0 : i32
    return %c0_i32, %c0_i32_0, %c0_i32_1, %c0_i32_2 : i32, i32, i32, i32
  }
  func.func @transform_6(%arg0: i32) -> (i32, i32, i32, i32) {
    %c0_i32 = arith.constant 0 : i32
    %c0_i32_0 = arith.constant 0 : i32
    %c0_i32_1 = arith.constant 0 : i32
    %c0_i32_2 = arith.constant 0 : i32
    %c0_i32_3 = arith.constant 0 : i32
    return %c0_i32, %c0_i32_0, %c0_i32_1, %c0_i32_2 : i32, i32, i32, i32
  }
  func.func @transform_7(%arg0: i32) -> (i32, i32, i32) {
    %c0_i32 = arith.constant 0 : i32
    %c0_i32_0 = arith.constant 0 : i32
    %c0_i32_1 = arith.constant 0 : i32
    %c0_i32_2 = arith.constant 0 : i32
    return %c0_i32, %c0_i32_0, %c0_i32_1 : i32, i32, i32
  }
  func.func @transform_8(%arg0: i32) -> (i32, i32, i32) {
    %c0_i32 = arith.constant 0 : i32
    %c0_i32_0 = arith.constant 0 : i32
    %c0_i32_1 = arith.constant 0 : i32
    %c0_i32_2 = arith.constant 0 : i32
    return %c0_i32, %c0_i32_0, %c0_i32_1 : i32, i32, i32
  }
  func.func @transform_9(%arg0: i32) -> (i32, i32, i32, i32) {
    %c0_i32 = arith.constant 0 : i32
    %c0_i32_0 = arith.constant 0 : i32
    %c0_i32_1 = arith.constant 0 : i32
    %c0_i32_2 = arith.constant 0 : i32
    %c0_i32_3 = arith.constant 0 : i32
    return %c0_i32, %c0_i32_0, %c0_i32_1, %c0_i32_2 : i32, i32, i32, i32
  }
  func.func @transform_10(%arg0: i32) -> (i32, i32) {
    %c0_i32 = arith.constant 0 : i32
    %c0_i32_0 = arith.constant 0 : i32
    return %arg0, %c0_i32 : i32, i32
  }
}

</mosaic_0001>

<bundles_post_ra>
// kernel: _encoder_forward.1
= control target key start
LH: loop header
LB: loop body
LE: loop exit
PB: predicated region body
PF: predicated region fallthrough
CT: control target
= control target key end

     0   :  { %vm83_vm0 = vcmask 261120   ;;  %s8348_s0 = inlined_call_operand.vmem [shape: f32[16,32], index: 0, kind: input, shape index: {}]   ;;  %s8349_s1 = inlined_call_operand.vmem [shape: f32[1,10,16,16], index: 1, kind: input, shape index: {}]   ;;  %s8350_s2 = inlined_call_operand.vmem [shape: f32[1,16,1], index: 2, kind: input, shape index: {}]   ;;  %s8351_s3 = inlined_call_operand.vmem [shape: bf16[2,3,2,32,16], index: 3, kind: input, shape index: {}]   ;;  %s8352_s4 = inlined_call_operand.vmem [shape: f32[2,3,2,1,16], index: 4, kind: input, shape index: {}]   ;;  %s8353_s5 = inlined_call_operand.vmem [shape: bf16[2,2,16,32], index: 5, kind: input, shape index: {}]   ;;  %s8354_s6 = inlined_call_operand.vmem [shape: bf16[2,9,32,64], index: 6, kind: input, shape index: {}]   ;;  %s8355_s7 = inlined_call_operand.vmem [shape: bf16[2,64,32], index: 7, kind: input, shape index: {}]   ;;  %s8356_s8 = inlined_call_operand.vmem [shape: f32[2,1,64], index: 8, kind: input, shape index: {}]   ;;  %s8357_s9 = inlined_call_operand.vmem [shape: f32[2,6,1,32], index: 9, kind: input, shape index: {}]   ;;  %s8358_s10 = inlined_call_operand.hbm [shape: f32[16,32], index: 10, kind: output, shape index: {}]  }
   0x1   :  { %v6465_v0 = vld [vmem:[%s8351_s3 + $0x28] sm:$0xff]   ;;  %v6464_v2 = vld [vmem:[%s8351_s3 + $0x20] sm:$0xff]  }
   0x2   :  { %v6463_v1 = vld [vmem:[%s8351_s3 + $0x8] sm:$0xff]   ;;  %v6189_v3 = vunpack.c.l.bf16 %v6465_v0  ;;  %v6190_v4 = vunpack.c.h.bf16 %v6465_v0  ;;  %v6176_v7 = vld [vmem:[%s8351_s3] sm:$0xff]  }
   0x3   :  { %v6181_v5 = vunpack.c.l.bf16 %v6463_v1  ;;  %v6182_v6 = vunpack.c.h.bf16 %v6463_v1  ;;  %v7599_v8 = vld [vmem:[%s8348_s0] sm:$0xff] }
   0x4   :  { %6870 = vmatprep.mubr.msk.f32.mxu1 %vm83_vm0, %v7599_v8  ;;  %6859 = vmatprep.mubr.msk.f32.mxu0 %vm83_vm0, %v7599_v8 }
   0x5   :  { %15 = vsyncpa [#allocation3], 0  ;;  %6862 = vmatprep.subr.mxu1 %v6190_v4  ;;  %6851 = vmatprep.subr.mxu0 %v6182_v6  ;;  %v6186_v9 = vunpack.c.h.bf16 %v6464_v2  ;;  %v6178_v10 = vunpack.c.h.bf16 %v6176_v7  ;;  %v6185_v11 = vunpack.c.l.bf16 %v6464_v2  ;;  %v6177_v12 = vunpack.c.l.bf16 %v6176_v7  ;;  %v7608_v13 = vld [vmem:[%s8348_s0 + $0x8] sm:$0xff]  ;;  %v5863_v14 = vld [vmem:[%s8352_s4 + $0x2] ss:$0 sm:$0xff]  ;;  %s7526_s18 = smov [#allocation2]  }
   0x6   :  { %6863 = vmatpush3.msra.mxu1 %v6190_v4  ;;  %6852 = vmatpush3.msra.mxu0 %v6182_v6  ;;  %v5859_v17 = vld [vmem:[%s8352_s4] ss:$0 sm:$0xff]  ;;  %vm331_vm1 = vcmask 130048   ;;  %v6467_v24 = vld [vmem:[%s8351_s3 + $0x48] sm:$0xff]   ;;  %v5867_v51 = vld [vmem:[%s8352_s4 + $0x4] ss:$0 sm:$0xff] }
   0x7   :  { %6864 = vmatprep.subr.mxu1 %v6189_v3  ;;  %6853 = vmatprep.subr.mxu0 %v6181_v5  ;;  %v6466_v25 = vld [vmem:[%s8351_s3 + $0x40] sm:$0xff]   ;;  %v6198_v26 = vunpack.c.h.bf16 %v6467_v24  ;;  %v6197_v27 = vunpack.c.l.bf16 %v6467_v24  ;;  %v7646_v35 = vld [vmem:[%s8349_s1 + $0x8] sm:$0xff]  ;;  %v6471_v55 = vld [vmem:[%s8351_s3 + $0x38] sm:$0xff]   ;;  %vm2849_vm2 = vcmask 523264   ;;  %s5839_s19 = sshll.u32 %s7526_s18, 4  ;;  %s5840_s19 = int_to_ptr.vmem [resolvable:$true] %s5839_s19 }
   0x8   :  { %6865 = vmatpush3.msra.mxu1 %v6189_v3  ;;  %6854 = vmatpush3.msra.mxu0 %v6181_v5  ;;  %v6194_v28 = vunpack.c.h.bf16 %v6466_v25  ;;  %v6193_v29 = vunpack.c.l.bf16 %v6466_v25  ;;  %v7641_v32 = vld [vmem:[%s8349_s1] sm:$0xff]  ;;  %v6470_v56 = vld [vmem:[%s8351_s3 + $0x30] sm:$0xff]   ;;  %v6218_v58 = vunpack.c.h.bf16 %v6471_v55  ;;  %v6217_v59 = vunpack.c.l.bf16 %v6471_v55  ;;  %v6469_v6 = vld [vmem:[%s8351_s3 + $0x18] sm:$0xff]   ;;  %s7503_s20 = scalar_lea.vmem %s5840_s19, 256  ;;  %p7508_p1 = scmp.lt.s32.totalorder %s5840_s19, %s5840_s19 }
   0x9   :  { %6866 = vmatprep.subr.mxu1 %v6186_v9  ;;  %6855 = vmatprep.subr.mxu0 %v6178_v10  ;;  %v6200_v57 = vld [vmem:[%s8353_s5] sm:$0xff]   ;;  %v6214_v61 = vunpack.c.h.bf16 %v6470_v56  ;;  %v6213_v62 = vunpack.c.l.bf16 %v6470_v56  ;;  %v6210_v7 = vunpack.c.h.bf16 %v6469_v6  ;;  %p7504_p0 = scmp.ne.s32.totalorder %s5840_s19, %s7503_s20  ;;  %p7509_p2 = scmp.lt.s32.totalorder %s7503_s20, %s7503_s20 }
   0xa   :  { %6867 = vmatpush3.msra.mxu1 %v6186_v9  ;;  %6856 = vmatpush3.msra.mxu0 %v6178_v10  ;;  %v6202_v60 = vunpack.c.h.bf16 %v6200_v57  ;;  %v6201_v5 = vunpack.c.l.bf16 %v6200_v57  ;;  %v5895_v10 = vld [vmem:[%s8352_s4 + $0x3] ss:$0 sm:$0xff]  ;;  %v5891_v24 = vld [vmem:[%s8352_s4 + $0x1] ss:$0 sm:$0xff] }
   0xb   :  { %6868 = vmatprep.subr.mxu1 %v6185_v11  ;;  %6857 = vmatprep.subr.mxu0 %v6177_v12  ;;  %p7510_p3 = por %p7509_p2, %p7508_p1 }
   0xc   :  { %6869 = vmatpush3.msra.mxu1 %v6185_v11  ;;  %6858 = vmatpush3.msra.mxu0 %v6177_v12 }
   0xd   :  { %6871 = vmatmul.mubr.msk.f32.vlgmr.msra.gmra.mxu1 %vm83_vm0, %v7608_v13  ;;  %6860 = vmatmul.mubr.msk.f32.vlgmr.msra.gmra.mxu0 %vm83_vm0, %v7608_v13  ;;  %p7511_p4 = pnand %p7510_p3, %p7504_p0 }
   0xe   :  { %6881 = vmatprep.mubr.msk.f32.mxu0 %vm83_vm0, %v7599_v8  ;;  %6873 = vmatprep.subr.mxu0 %v6198_v26 }
   0xf   :  { %6874 = vmatpush3.msra.mxu0 %v6198_v26 }
  0x10   :  { %6875 = vmatprep.subr.mxu0 %v6197_v27 }
  0x11   :  { %6876 = vmatpush3.msra.mxu0 %v6197_v27 }
  0x12   :  { %6877 = vmatprep.subr.mxu0 %v6194_v28 }
  0x13   :  { %6878 = vmatpush3.msra.mxu0 %v6194_v28  ;;  %v6473_v28 = vld [vmem:[%s8351_s3 + $0x58] sm:$0xff]  }
  0x14   :  { %6879 = vmatprep.subr.mxu0 %v6193_v29 }
  0x15   :  { %6880 = vmatpush3.msra.mxu0 %v6193_v29  ;;  %v6472_v29 = vld [vmem:[%s8351_s3 + $0x50] sm:$0xff]  }
  0x16   :  { %6882 = vmatmul.mubr.msk.f32.vlgmr.msra.gmra.mxu0 %vm83_vm0, %v7608_v13 }
  0xcd   :  { %v6872_v15 = vpop.f32.mrf.mxu1  ;;  %v6861_v16 = vpop.f32.mrf.mxu0 }
  0xce   :  { %v245_v18 = vadd.f32 %v6872_v15, %v5863_v14  ;;  %v162_v23 = vadd.f32 %v6861_v16, %v5859_v17  ;;  %v6209_v16 = vunpack.c.l.bf16 %v6469_v6 }
  0xcf   :  { %v239_v19 = vpop.f32.mrf.mxu1  ;;  %v156_v20 = vpop.f32.mrf.mxu0 }
  0xd0   :  { %v240_v21 = vadd.f32 %v5863_v14, %v239_v19  ;;  %6884 = vmatprep.subr.msk.mxu1 %vm331_vm1, %v245_v18  ;;  %v157_v22 = vadd.f32 %v5859_v17, %v156_v20  ;;  %v6468_v14 = vld [vmem:[%s8351_s3 + $0x10] sm:$0xff]  }
  0xd1   :  { %6885 = vmatpush3.xpose.msk.msra.mxu1 %vm331_vm1, %v245_v18  ;;  %v6206_v17 = vunpack.c.h.bf16 %v6468_v14  ;;  %v6205_v18 = vunpack.c.l.bf16 %v6468_v14 }
  0xd2   :  { %6886 = vmatprep.subr.msk.mxu1 %vm331_vm1, %v240_v21  ;;  %6888 = vmatprep.mubr.msk.f32.mxu1 %vm331_vm1, %v157_v22 }
  0xd5   :  { %6887 = vmatpush3.xpose.msk.msra.mxu1 %vm331_vm1, %v240_v21 }
  0xd6   :  { %v6883_v50 = vpop.f32.mrf.mxu0  ;;  %6916 = vmatprep.subr.mxu1 %v6218_v58 }
  0xd7   :  { %v328_v52 = vadd.f32 %v6883_v50, %v5867_v51 }
  0xd8   :  { %6889 = vmatmul.mubr.msk.f32.vlgmr.msra.gmra.mxu1 %vm331_vm1, %v162_v23  ;;  %v322_v53 = vpop.f32.mrf.mxu0 }
  0xd9   :  { %6924 = vmatprep.mubr.msk.f32.mxu1 %vm83_vm0, %v7599_v8  ;;  %v323_v54 = vadd.f32 %v5867_v51, %v322_v53  ;;  %6891 = vmatprep.subr.mxu0 %v328_v52  ;;  %v5899_v53 = vld [vmem:[%s8352_s4 + $0x5] ss:$0 sm:$0xff] }
  0xda   :  { %6892 = vmatpush3.msra.mxu0 %v328_v52  ;;  %6917 = vmatpush3.msra.mxu1 %v6218_v58 }
  0xdb   :  { %6893 = vmatprep.subr.mxu0 %v323_v54  ;;  %6918 = vmatprep.subr.mxu1 %v6217_v59 }
  0xdc   :  { %6894 = vmatpush3.msra.mxu0 %v323_v54  ;;  %6919 = vmatpush3.msra.mxu1 %v6217_v59 }
  0xdd   :  { %6898 = vmatprep.subr.mxu0 %v6202_v60  ;;  %6920 = vmatprep.subr.mxu1 %v6214_v61 }
  0xde   :  { %6921 = vmatpush3.msra.mxu1 %v6214_v61 }
  0xdf   :  { %6922 = vmatprep.subr.mxu1 %v6213_v62 }
  0xe0   :  { %6923 = vmatpush3.msra.mxu1 %v6213_v62 }
  0xe1   :  { %6925 = vmatmul.mubr.msk.f32.vlgmr.msra.gmra.mxu1 %vm83_vm0, %v7608_v13 }
 0x198   :  { %v6890_v30 = vpop.f32.mrf.mxu1 }
 0x199   :  { %v420_v33 = vmul.f32 0.25, %v6890_v30  ;;  %v6226_v30 = vunpack.c.h.bf16 %v6473_v28 }
 0x19a   :  { %v410_v31 = vpop.f32.mrf.mxu1 }
 0x19b   :  { %v419_v34 = vmul.f32 0.25, %v410_v31  ;;  %v422_v38 = vadd.f32 %v420_v33, %v7646_v35  ;;  %v6225_v31 = vunpack.c.l.bf16 %v6473_v28  ;;  %v6222_v33 = vunpack.c.h.bf16 %v6472_v29  ;;  %v6232_v28 = vld [vmem:[%s8354_s6] sm:$0xff]  }
 0x19d   :  { %v421_v36 = vadd.f32 %v419_v34, %v7641_v32  ;;  %v426_v39 = vsel %vm331_vm1, %v422_v38, -inf  ;;  %v6221_v34 = vunpack.c.l.bf16 %v6472_v29 }
 0x19f   :  { %v423_v37 = vsel %vm331_vm1, %v421_v36, -inf }
 0x1a0   :  { %424 = vmax.xlane.f32.xlu0 %v423_v37 }
 0x1a1   :  { %v6926_v9 = vpop.f32.mrf.mxu1 }
 0x1a2   :  { %v803_v11 = vadd.f32 %v6926_v9, %v5895_v10 }
 0x1a3   :  { %v797_v19 = vpop.f32.mrf.mxu1 }
 0x1a4   :  { %427 = vmax.xlane.f32.xlu0 %v426_v39  ;;  %6938 = vmatprep.subr.msk.mxu1 %vm331_vm1, %v803_v11  ;;  %v798_v20 = vadd.f32 %v5895_v10, %v797_v19 }
 0x1a5   :  { %6939 = vmatpush3.xpose.msk.msra.mxu1 %vm331_vm1, %v803_v11 }
 0x1a6   :  { %6940 = vmatprep.subr.msk.mxu1 %vm331_vm1, %v798_v20 }
 0x1a9   :  { %6941 = vmatpush3.xpose.msk.msra.mxu1 %vm331_vm1, %v798_v20 }
 0x229   :  { %v425_v40 = vpop.xlane.xlu0 %424 }
 0x22a   :  { %v429_v41 = vsub.f32 %v421_v36, %v425_v40 }
 0x22c   :  { %v431_v42 = vmul.f32 1.442695, %v429_v41 }
 0x22d   :  { %v428_v43 = vpop.xlane.xlu0 %427 }
 0x22e   :  { %7435 = vpow2.f32 %v431_v42  ;;  %v430_v44 = vsub.f32 %v422_v38, %v428_v43 }
 0x230   :  { %v433_v45 = vmul.f32 1.442695, %v430_v44 }
 0x232   :  { %7437 = vpow2.f32 %v433_v45 }
 0x23b   :  { %v7436_v46 = vpop.eup %7435 }
 0x23c   :  { %v435_v47 = vsel %vm331_vm1, %v7436_v46, 0.0 }
 0x23d   :  { %436 = vadd.xlane.f32.xlu1 %v435_v47 }
 0x23f   :  { %v7438_v48 = vpop.eup %7437 }
 0x240   :  { %v438_v49 = vsel %vm331_vm1, %v7438_v48, 0.0 }
 0x241   :  { %439 = vadd.xlane.f32.xlu1 %v438_v49 }
 0x2c6   :  { %v437_v63 = vpop.xlane.xlu1 %436 }
 0x2c7   :  { %7439 = vrcp.f32 %v437_v63  ;;  %v6474_v63 = vld [vmem:[%s8353_s5 + $0x8] sm:$0xff]  }
 0x2ca   :  { %v440_v0 = vpop.xlane.xlu1 %439 }
 0x2cb   :  { %7441 = vrcp.f32 %v440_v0  ;;  %v6230_v0 = vunpack.c.h.bf16 %v6474_v63 }
 0x2cd   :  { %6952 = vmatprep.subr.mxu1 %v6230_v0 }
 0x2d4   :  { %v7440_v1 = vpop.eup %7439 }
 0x2d5   :  { %v443_v2 = vmul.f32 %v7440_v1, %v7436_v46  ;;  %v6229_v1 = vunpack.c.l.bf16 %v6474_v63 }
 0x2d7   :  { %6895 = vmatprep.mubr.msk.f32.mxu0 %vm331_vm1, %v443_v2 }
 0x2d8   :  { %v7442_v3 = vpop.eup %7441 }
 0x2d9   :  { %v444_v4 = vmul.f32 %v7442_v3, %v7438_v48 }
 0x2db   :  { %6896 = vmatmul.mubr.msk.f32.vlgmr.msra.gmra.mxu0 %vm331_vm1, %v444_v4  ;;  %v5850_v4 = vld [vmem:[%s8357_s9] ss:$0 sm:$0xff] }
 0x2dc   :  { %6899 = vmatpush3.msra.mxu0 %v6202_v60 }
 0x2dd   :  { %6900 = vmatprep.subr.mxu0 %v6201_v5 }
 0x2de   :  { %6901 = vmatpush3.msra.mxu0 %v6201_v5 }
 0x2df   :  { %6905 = vmatprep.subr.mxu0 %v6210_v7 }
 0x39b   :  { %v6897_v12 = vpop.f32.mrf.mxu0 }
 0x39d   :  { %v517_v15 = vpop.f32.mrf.mxu0 }
 0x39e   :  { %6902 = vmatprep.mubr.msk.f32.mxu0 %vm331_vm1, %v517_v15 }
 0x39f   :  { %6903 = vmatmul.mubr.msk.f32.vlgmr.msra.gmra.mxu0 %vm331_vm1, %v6897_v12 }
 0x3a0   :  { %6906 = vmatpush3.msra.mxu0 %v6210_v7  ;;  %6913 = vmatprep.mubr.msk.f32.mxu0 %vm83_vm0, %v7599_v8 }
 0x3a1   :  { %6907 = vmatprep.subr.mxu0 %v6209_v16 }
 0x3a2   :  { %6908 = vmatpush3.msra.mxu0 %v6209_v16 }
 0x3a3   :  { %6909 = vmatprep.subr.mxu0 %v6206_v17 }
 0x3a4   :  { %6910 = vmatpush3.msra.mxu0 %v6206_v17  ;;  %v7525_v17 = vmov 0  }
 0x3a5   :  { %6911 = vmatprep.subr.mxu0 %v6205_v18  ;;  %7433 = vset.pattern.permute.xlu0 %v7525_v17 }
 0x3a6   :  { %6912 = vmatpush3.msra.mxu0 %v6205_v18  ;;  %7434 = vset.pattern.permute.xlu1 %v7525_v17 }
 0x3a7   :  { %6914 = vmatmul.mubr.msk.f32.vlgmr.msra.gmra.mxu0 %vm83_vm0, %v7608_v13  ;;  %6927 = vmatprep.subr.mxu0 %v6226_v30 }
 0x3a8   :  { %6935 = vmatprep.mubr.msk.f32.mxu0 %vm83_vm0, %v7599_v8  ;;  %6928 = vmatpush3.msra.mxu0 %v6226_v30 }
 0x3a9   :  { %6929 = vmatprep.subr.mxu0 %v6225_v31 }
 0x3aa   :  { %6930 = vmatpush3.msra.mxu0 %v6225_v31  ;;  %v39_v31 = vld [vmem:[%s8350_s2 + $0x8] sm:$0xff] }
 0x3ab   :  { %6931 = vmatprep.subr.mxu0 %v6222_v33 }
 0x3ac   :  { %6932 = vmatpush3.msra.mxu0 %v6222_v33  ;;  %v6234_v33 = vunpack.c.h.bf16 %v6232_v28 }
 0x3ad   :  { %6933 = vmatprep.subr.mxu0 %v6221_v34 }
 0x3ae   :  { %6934 = vmatpush3.msra.mxu0 %v6221_v34  ;;  %v6233_v34 = vunpack.c.l.bf16 %v6232_v28 }
 0x3af   :  { %6936 = vmatmul.mubr.msk.f32.vlgmr.msra.gmra.mxu0 %vm83_vm0, %v7608_v13 }
 0x45f   :  { %v7691_v21 = vpop.f32.mrf.mxu0 }
 0x460   :  { %v612_v5 = vadd.f32 %v7691_v21, %v5850_v4 }
 0x461   :  { %v7693_v22 = vpop.f32.mrf.mxu0 }
 0x462   :  { %v611_v7 = vadd.f32 %v5850_v4, %v7693_v22 }
 0x467   :  { %v6915_v23 = vpop.f32.mrf.mxu0 }
 0x468   :  { %v720_v27 = vadd.f32 %v6915_v23, %v5891_v24 }
 0x469   :  { %v714_v25 = vpop.f32.mrf.mxu0 }
 0x46a   :  { %v715_v26 = vadd.f32 %v5891_v24, %v714_v25 }
 0x46c   :  { %6942 = vmatprep.mubr.msk.f32.mxu1 %vm331_vm1, %v715_v26  ;;  %v38_v26 = vld [vmem:[%s8350_s2] sm:$0xff] }
 0x46d   :  { %6943 = vmatmul.mubr.msk.f32.vlgmr.msra.gmra.mxu1 %vm331_vm1, %v720_v27  ;;  %v6475_v27 = vld [vmem:[%s8354_s6 + $0x8] sm:$0xff]  }
 0x46e   :  { %6953 = vmatpush3.msra.mxu1 %v6230_v0  ;;  %v6238_v29 = vunpack.c.h.bf16 %v6475_v27  ;;  %v6237_v30 = vunpack.c.l.bf16 %v6475_v27 }
 0x46f   :  { %6954 = vmatprep.subr.mxu1 %v6229_v1 }
 0x470   :  { %6955 = vmatpush3.msra.mxu1 %v6229_v1  ;;  %v6479_v1 = vld [vmem:[%s8354_s6 + $0x28] sm:$0xff]  }
 0x471   :  { %6966 = vmatprep.subr.mxu1 %v6238_v29 }
 0x52d   :  { %v6944_v36 = vpop.f32.mrf.mxu1 }
 0x52e   :  { %v977_v37 = vmul.f32 0.25, %v6944_v36  ;;  %v5917_v36 = vld [vmem:[%s8349_s1 + $0x10] sm:$0xff] }
 0x52f   :  { %v967_v38 = vpop.f32.mrf.mxu1 }
 0x530   :  { %v976_v39 = vmul.f32 0.25, %v967_v38  ;;  %v979_v40 = vadd.f32 %v977_v37, %v7646_v35 }
 0x532   :  { %v983_v41 = vsel %vm331_vm1, %v979_v40, -inf  ;;  %v978_v42 = vadd.f32 %v976_v39, %v7641_v32  ;;  %v6937_v32 = vpop.f32.mrf.mxu0 }
 0x533   :  { %984 = vmax.xlane.f32.xlu1 %v983_v41  ;;  %v886_v54 = vadd.f32 %v6937_v32, %v5899_v53 }
 0x534   :  { %v980_v43 = vsel %vm331_vm1, %v978_v42, -inf  ;;  %v880_v55 = vpop.f32.mrf.mxu0 }
 0x535   :  { %981 = vmax.xlane.f32.xlu0 %v980_v43  ;;  %v881_v56 = vadd.f32 %v5899_v53, %v880_v55  ;;  %6945 = vmatprep.subr.mxu0 %v886_v54  ;;  %v5918_v55 = vld [vmem:[%s8349_s1 + $0x18] sm:$0xff] }
 0x536   :  { %6946 = vmatpush3.msra.mxu0 %v886_v54 }
 0x537   :  { %6947 = vmatprep.subr.mxu0 %v881_v56 }
 0x538   :  { %6948 = vmatpush3.msra.mxu0 %v881_v56  ;;  %v6477_v56 = vld [vmem:[%s8354_s6 + $0x18] sm:$0xff]  }
 0x5bc   :  { %v985_v44 = vpop.xlane.xlu1 %984 }
 0x5bd   :  { %v987_v45 = vsub.f32 %v979_v40, %v985_v44  ;;  %v5914_v44 = vld [vmem:[%s8357_s9 + $0x1] ss:$0 sm:$0xff] }
 0x5be   :  { %v982_v46 = vpop.xlane.xlu0 %981 }
 0x5bf   :  { %v990_v47 = vmul.f32 1.442695, %v987_v45  ;;  %v986_v48 = vsub.f32 %v978_v42, %v982_v46 }
 0x5c1   :  { %7443 = vpow2.f32 %v990_v47  ;;  %v988_v49 = vmul.f32 1.442695, %v986_v48  ;;  %v5915_v47 = vld [vmem:[%s8357_s9 + $0x2] ss:$0 sm:$0xff] }
 0x5c3   :  { %7445 = vpow2.f32 %v988_v49 }
 0x5ce   :  { %v7444_v50 = vpop.eup %7443 }
 0x5cf   :  { %v995_v51 = vsel %vm331_vm1, %v7444_v50, 0.0 }
 0x5d0   :  { %v7446_v35 = vpop.eup %7445  ;;  %996 = vadd.xlane.f32.xlu1 %v995_v51 }
 0x5d1   :  { %v992_v52 = vsel %vm331_vm1, %v7446_v35, 0.0 }
 0x5d2   :  { %993 = vadd.xlane.f32.xlu0 %v992_v52 }
 0x659   :  { %v997_v57 = vpop.xlane.xlu1 %996 }
 0x65a   :  { %7447 = vrcp.f32 %v997_v57  ;;  %v5923_v57 = vld [vmem:[%s8349_s1 + $0x20] sm:$0xff] }
 0x65b   :  { %v994_v58 = vpop.xlane.xlu0 %993 }
 0x65c   :  { %7449 = vrcp.f32 %v994_v58  ;;  %v6246_v58 = vunpack.c.h.bf16 %v6477_v56 }
 0x667   :  { %v7448_v59 = vpop.eup %7447 }
 0x668   :  { %v1001_v62 = vmul.f32 %v7448_v59, %v7444_v50  ;;  %v5924_v59 = vld [vmem:[%s8349_s1 + $0x28] sm:$0xff] }
 0x669   :  { %v7450_v60 = vpop.eup %7449 }
 0x66a   :  { %v1000_v61 = vmul.f32 %v7450_v60, %v7446_v35  ;;  %v6476_v60 = vld [vmem:[%s8354_s6 + $0x10] sm:$0xff]  }
 0x66b   :  { %v6241_v63 = vunpack.c.l.bf16 %v6476_v60 }
 0x66c   :  { %6949 = vmatprep.mubr.msk.f32.mxu0 %vm331_vm1, %v1000_v61  ;;  %v6245_v61 = vunpack.c.l.bf16 %v6477_v56 }
 0x66d   :  { %6950 = vmatmul.mubr.msk.f32.vlgmr.msra.gmra.mxu0 %vm331_vm1, %v1001_v62  ;;  %v6242_v62 = vunpack.c.h.bf16 %v6476_v60  ;;  %v6487_v60 = vld [vmem:[%s8354_s6 + $0x68] sm:$0xff]  }
 0x66e   :  { %6963 = vmatprep.mubr.msk.f32.mxu0 %vm331_vm1, %v5917_v36 }
 0x72d   :  { %v6951_v2 = vpop.f32.mrf.mxu0 }
 0x72f   :  { %v1074_v3 = vpop.f32.mrf.mxu0 }
 0x730   :  { %6956 = vmatprep.mubr.msk.f32.mxu1 %vm331_vm1, %v1074_v3  ;;  %v5933_v3 = vld [vmem:[%s8349_s1 + $0x30] sm:$0xff] }
 0x731   :  { %6957 = vmatmul.mubr.msk.f32.vlgmr.msra.gmra.mxu1 %vm331_vm1, %v6951_v2 }
 0x732   :  { %6967 = vmatpush3.msra.mxu1 %v6238_v29  ;;  %v6483_v29 = vld [vmem:[%s8354_s6 + $0x48] sm:$0xff]  }
 0x733   :  { %6968 = vmatprep.subr.mxu1 %v6237_v30 }
 0x734   :  { %6969 = vmatpush3.msra.mxu1 %v6237_v30 }
 0x735   :  { %6970 = vmatprep.subr.mxu1 %v6234_v33 }
 0x736   :  { %6971 = vmatpush3.msra.mxu1 %v6234_v33  ;;  %v5953_v33 = vld [vmem:[%s8349_s1 + $0x50] sm:$0xff] }
 0x737   :  { %6972 = vmatprep.subr.mxu1 %v6233_v34 }
 0x738   :  { %6973 = vmatpush3.msra.mxu1 %v6233_v34  ;;  %v6270_v34 = vunpack.c.h.bf16 %v6483_v29 }
 0x7f1   :  { %v6958_v6 = vpop.f32.mrf.mxu1 }
 0x7f2   :  { %v1170_v9 = vadd.f32 %v6958_v6, %v612_v5  ;;  %v6254_v5 = vunpack.c.h.bf16 %v6479_v1 }
 0x7f3   :  { %v1160_v10 = vpop.f32.mrf.mxu1 }
 0x7f4   :  { %v1169_v11 = vadd.f32 %v1160_v10, %v611_v7  ;;  %v1172_v12 = vadd.f32 %v1170_v9, %v7608_v13  ;;  %v5934_v7 = vld [vmem:[%s8349_s1 + $0x38] sm:$0xff]  ;;  %v6478_v9 = vld [vmem:[%s8354_s6 + $0x20] sm:$0xff]  }
 0x7f5   :  { %v6481_v10 = vld [vmem:[%s8354_s6 + $0x38] sm:$0xff]   ;;  %v6249_v17 = vunpack.c.l.bf16 %v6478_v9 }
 0x7f6   :  { %v1180_v14 = vsel %vm83_vm0, %v1172_v12, 0.0  ;;  %v1171_v15 = vadd.f32 %v1169_v11, %v7599_v8  ;;  %v6253_v11 = vunpack.c.l.bf16 %v6479_v1  ;;  %v6286_v1 = vunpack.c.h.bf16 %v6487_v60 }
 0x7f7   :  { %1181 = vadd.xlane.f32.xlu0 %v1180_v14  ;;  %v5943_v14 = vld [vmem:[%s8349_s1 + $0x40] sm:$0xff] }
 0x7f8   :  { %v1177_v16 = vsel %vm83_vm0, %v1171_v15, 0.0 }
 0x7f9   :  { %1178 = vadd.xlane.f32.xlu1 %v1177_v16  ;;  %v5944_v16 = vld [vmem:[%s8349_s1 + $0x48] sm:$0xff] }
 0x880   :  { %v1182_v18 = vpop.xlane.xlu0 %1181 }
 0x881   :  { %v1185_v19 = vmul.f32 0.03125, %v1182_v18  ;;  %v6480_v18 = vld [vmem:[%s8354_s6 + $0x30] sm:$0xff]  }
 0x882   :  { %v1179_v20 = vpop.xlane.xlu1 %1178 }
 0x883   :  { %v1187_v21 = vsub.f32 %v1172_v12, %v1185_v19  ;;  %v1184_v22 = vmul.f32 0.03125, %v1179_v20  ;;  %v6250_v12 = vunpack.c.h.bf16 %v6478_v9  ;;  %v6261_v19 = vunpack.c.l.bf16 %v6481_v10  ;;  %v5983_v9 = vld [vmem:[%s8349_s1 + $0x80] sm:$0xff] }
 0x884   :  { %v6258_v20 = vunpack.c.h.bf16 %v6480_v18 }
 0x885   :  { %v1186_v23 = vsub.f32 %v1171_v15, %v1184_v22  ;;  %v1189_v24 = vmul.f32 %v1187_v21, %v1187_v21  ;;  %v6262_v15 = vunpack.c.h.bf16 %v6481_v10  ;;  %v5916_v22 = vld [vmem:[%s8356_s8] ss:$0 sm:$0xff]  ;;  %v5984_v10 = vld [vmem:[%s8349_s1 + $0x88] sm:$0xff] }
 0x887   :  { %v1193_v13 = vsel %vm83_vm0, %v1189_v24, 0.0  ;;  %v1188_v25 = vmul.f32 %v1186_v23, %v1186_v23 }
 0x888   :  { %1194 = vadd.xlane.f32.xlu0 %v1193_v13 }
 0x889   :  { %v1190_v8 = vsel %vm83_vm0, %v1188_v25, 0.0 }
 0x88a   :  { %1191 = vadd.xlane.f32.xlu1 %v1190_v8 }
 0x89b   :  { %1222 = vperm.xlu1 %7434, %v38_v26  }
 0x89e   :  { %1227 = vperm.xlu0 %7433, %v39_v31  }
 0x911   :  { %v1195_v37 = vpop.xlane.xlu0 %1194 }
 0x912   :  { %v1197_v38 = vmul.f32 0.03125, %v1195_v37  ;;  %v5954_v37 = vld [vmem:[%s8349_s1 + $0x58] sm:$0xff] }
 0x913   :  { %v1192_v39 = vpop.xlane.xlu1 %1191 }
 0x914   :  { %v1199_v40 = vadd.f32 1e-05, %v1197_v38  ;;  %v1196_v41 = vmul.f32 0.03125, %v1192_v39  ;;  %v6482_v38 = vld [vmem:[%s8354_s6 + $0x40] sm:$0xff]  }
 0x916   :  { %7451 = vrsqrt.f32 %v1199_v40  ;;  %v1198_v42 = vadd.f32 1e-05, %v1196_v41  ;;  %v6269_v40 = vunpack.c.l.bf16 %v6483_v29  ;;  %v6485_v41 = vld [vmem:[%s8354_s6 + $0x58] sm:$0xff]  }
 0x917   :  { %v7759_v52 = vpop.permute.xlu1 %1222 }
 0x918   :  { %7453 = vrsqrt.f32 %v1198_v42  ;;  %v6266_v42 = vunpack.c.h.bf16 %v6482_v38 }
 0x919   :  { %v7757_v50 = vpop.permute.xlu0 %1227 }
 0x923   :  { %v7452_v43 = vpop.eup %7451 }
 0x924   :  { %v1203_v45 = vmul.f32 %v7452_v43, %v1187_v21  ;;  %v6257_v21 = vunpack.c.l.bf16 %v6480_v18  ;;  %v5963_v43 = vld [vmem:[%s8349_s1 + $0x60] sm:$0xff] }
 0x925   :  { %v7454_v46 = vpop.eup %7453 }
 0x926   :  { %v1211_v48 = vmul.f32 %v5914_v44, %v1203_v45  ;;  %v1202_v49 = vmul.f32 %v7454_v46, %v1186_v23  ;;  %v6265_v45 = vunpack.c.l.bf16 %v6482_v38  ;;  %v5964_v46 = vld [vmem:[%s8349_s1 + $0x68] sm:$0xff] }
 0x928   :  { %v1219_v51 = vadd.f32 %v5915_v47, %v1211_v48  ;;  %v1210_v35 = vmul.f32 %v5914_v44, %v1202_v49  ;;  %v6278_v44 = vunpack.c.h.bf16 %v6485_v41  ;;  %v6277_v48 = vunpack.c.l.bf16 %v6485_v41 }
 0x92a   :  { %v7762_v32 = vmul.f32 %v7757_v50, %v1219_v51  ;;  %v1218_v53 = vadd.f32 %v5915_v47, %v1210_v35  ;;  %v6484_v47 = vld [vmem:[%s8354_s6 + $0x50] sm:$0xff]  }
 0x92b   :  { %v6274_v49 = vunpack.c.h.bf16 %v6484_v47  ;;  %v6273_v51 = vunpack.c.l.bf16 %v6484_v47 }
 0x92c   :  { %v7765_v54 = vmul.f32 %v7759_v52, %v1218_v53  ;;  %6959 = vmatprep.subr.mxu0 %v7762_v32  ;;  %6995 = vmatprep.subr.mxu1 %v7762_v32 }
 0x92d   :  { %6960 = vmatpush3.msra.mxu0 %v7762_v32 }
 0x92e   :  { %6961 = vmatprep.subr.mxu0 %v7765_v54 }
 0x92f   :  { %6962 = vmatpush3.msra.mxu0 %v7765_v54 }
 0x930   :  { %6964 = vmatmul.mubr.msk.f32.vlgmr.msra.gmra.mxu0 %vm331_vm1, %v5918_v55  ;;  %6977 = vmatprep.subr.mxu0 %v7762_v32 }
 0x931   :  { %6978 = vmatpush3.msra.mxu0 %v7762_v32  ;;  %6981 = vmatprep.mubr.msk.f32.mxu0 %vm331_vm1, %v5923_v57 }
 0x932   :  { %6979 = vmatprep.subr.mxu0 %v7765_v54 }
 0x933   :  { %6980 = vmatpush3.msra.mxu0 %v7765_v54 }
 0x934   :  { %6982 = vmatmul.mubr.msk.f32.vlgmr.msra.gmra.mxu0 %vm331_vm1, %v5924_v59  ;;  %6984 = vmatprep.subr.mxu0 %v6246_v58 }
 0x935   :  { %6985 = vmatpush3.msra.mxu0 %v6246_v58 }
 0x936   :  { %6986 = vmatprep.subr.mxu0 %v6245_v61 }
 0x937   :  { %6987 = vmatpush3.msra.mxu0 %v6245_v61 }
 0x938   :  { %6988 = vmatprep.subr.mxu0 %v6242_v62 }
 0x939   :  { %6989 = vmatpush3.msra.mxu0 %v6242_v62 }
 0x93a   :  { %6990 = vmatprep.subr.mxu0 %v6241_v63 }
 0x93b   :  { %6991 = vmatpush3.msra.mxu0 %v6241_v63  ;;  %v5973_v63 = vld [vmem:[%s8349_s1 + $0x70] sm:$0xff] }
 0x93c   :  { %7013 = vmatprep.subr.mxu0 %v7762_v32 }
 0x9f0   :  { %v6965_v0 = vpop.f32.mrf.mxu0 }
 0x9f2   :  { %v1315_v2 = vpop.f32.mrf.mxu0 }
 0x9f3   :  { %6974 = vmatprep.mubr.msk.f32.mxu1 %vm83_vm0, %v1315_v2  ;;  %v5974_v2 = vld [vmem:[%s8349_s1 + $0x78] sm:$0xff] }
 0x9f4   :  { %6975 = vmatmul.mubr.msk.f32.vlgmr.msra.gmra.mxu1 %vm83_vm0, %v6965_v0  ;;  %v6983_v4 = vpop.f32.mrf.mxu0 }
 0x9f5   :  { %6996 = vmatpush3.msra.mxu1 %v7762_v32  ;;  %6999 = vmatprep.mubr.msk.f32.mxu1 %vm331_vm1, %v5933_v3  ;;  %v6486_v3 = vld [vmem:[%s8354_s6 + $0x60] sm:$0xff]  }
 0x9f6   :  { %6997 = vmatprep.subr.mxu1 %v7765_v54  ;;  %v1490_v6 = vpop.f32.mrf.mxu0 }
 0x9f7   :  { %6998 = vmatpush3.msra.mxu1 %v7765_v54  ;;  %6992 = vmatprep.mubr.msk.f32.mxu0 %vm83_vm0, %v1490_v6 }
 0x9f8   :  { %7002 = vmatprep.subr.mxu1 %v6254_v5  ;;  %6993 = vmatmul.mubr.msk.f32.vlgmr.msra.gmra.mxu0 %vm83_vm0, %v6983_v4 }
 0x9f9   :  { %7000 = vmatmul.mubr.msk.f32.vlgmr.msra.gmra.mxu1 %vm331_vm1, %v5934_v7  ;;  %7014 = vmatpush3.msra.mxu0 %v7762_v32  ;;  %v6282_v7 = vunpack.c.h.bf16 %v6486_v3 }
 0x9fa   :  { %7003 = vmatpush3.msra.mxu1 %v6254_v5  ;;  %7015 = vmatprep.subr.mxu0 %v7765_v54  ;;  %v6285_v5 = vunpack.c.l.bf16 %v6487_v60 }
 0x9fb   :  { %7004 = vmatprep.subr.mxu1 %v6253_v11  ;;  %7016 = vmatpush3.msra.mxu0 %v7765_v54 }
 0x9fc   :  { %7005 = vmatpush3.msra.mxu1 %v6253_v11  ;;  %7017 = vmatprep.mubr.msk.f32.mxu0 %vm331_vm1, %v5943_v14  ;;  %v6281_v11 = vunpack.c.l.bf16 %v6486_v3 }
 0x9fd   :  { %7006 = vmatprep.subr.mxu1 %v6250_v12  ;;  %7020 = vmatprep.subr.mxu0 %v6262_v15 }
 0x9fe   :  { %7007 = vmatpush3.msra.mxu1 %v6250_v12  ;;  %7018 = vmatmul.mubr.msk.f32.vlgmr.msra.gmra.mxu0 %vm331_vm1, %v5944_v16  ;;  %v6489_v12 = vld [vmem:[%s8354_s6 + $0x78] sm:$0xff]   ;;  %v6488_v16 = vld [vmem:[%s8354_s6 + $0x70] sm:$0xff]  }
 0x9ff   :  { %7021 = vmatpush3.msra.mxu0 %v6262_v15  ;;  %7008 = vmatprep.subr.mxu1 %v6249_v17  ;;  %v6294_v14 = vunpack.c.h.bf16 %v6489_v12  ;;  %v6293_v15 = vunpack.c.l.bf16 %v6489_v12  ;;  %v6289_v18 = vunpack.c.l.bf16 %v6488_v16 }
 0xa00   :  { %7022 = vmatprep.subr.mxu0 %v6261_v19  ;;  %7009 = vmatpush3.msra.mxu1 %v6249_v17  ;;  %v6290_v17 = vunpack.c.h.bf16 %v6488_v16 }
 0xa01   :  { %7023 = vmatpush3.msra.mxu0 %v6261_v19  ;;  %7031 = vmatprep.subr.mxu1 %v7762_v32 }
 0xa02   :  { %7024 = vmatprep.subr.mxu0 %v6258_v20 }
 0xa03   :  { %7025 = vmatpush3.msra.mxu0 %v6258_v20 }
 0xa04   :  { %7026 = vmatprep.subr.mxu0 %v6257_v21 }
 0xa05   :  { %7027 = vmatpush3.msra.mxu0 %v6257_v21 }
 0xa06   :  { %7049 = vmatprep.subr.mxu0 %v7762_v32 }
 0xab4   :  { %v6976_v23 = vpop.f32.mrf.mxu1 }
 0xab5   :  { %v1414_v13 = vadd.f32 %v6976_v23, %v5916_v22 }
 0xab6   :  { %v1404_v24 = vpop.f32.mrf.mxu1 }
 0xab7   :  { %v1413_v8 = vadd.f32 %v5916_v22, %v1404_v24 }
 0xab8   :  { %v6994_v25 = vpop.f32.mrf.mxu0 }
 0xab9   :  { %v1590_v26 = vadd.f32 %v6994_v25, %v1414_v13  ;;  %v7001_v27 = vpop.f32.mrf.mxu1  ;;  %v5993_v25 = vld [vmem:[%s8349_s1 + $0x90] sm:$0xff] }
 0xaba   :  { %v1580_v28 = vpop.f32.mrf.mxu0 }
 0xabb   :  { %v1589_v30 = vadd.f32 %v1580_v28, %v1413_v8  ;;  %v1666_v31 = vpop.f32.mrf.mxu1  ;;  %v5994_v28 = vld [vmem:[%s8349_s1 + $0x98] sm:$0xff] }
 0xabc   :  { %7010 = vmatprep.mubr.msk.f32.mxu1 %vm83_vm0, %v1666_v31  ;;  %v6491_v31 = vld [vmem:[%s8354_s6 + $0x88] sm:$0xff]  }
 0xabd   :  { %7011 = vmatmul.mubr.msk.f32.vlgmr.msra.gmra.mxu1 %vm83_vm0, %v7001_v27 }
 0xabe   :  { %v7019_v36 = vpop.f32.mrf.mxu0  ;;  %7032 = vmatpush3.msra.mxu1 %v7762_v32  ;;  %7035 = vmatprep.mubr.msk.f32.mxu1 %vm331_vm1, %v5953_v33  ;;  %v6302_v33 = vunpack.c.h.bf16 %v6491_v31 }
 0xabf   :  { %7033 = vmatprep.subr.mxu1 %v7765_v54 }
 0xac0   :  { %v1842_v39 = vpop.f32.mrf.mxu0  ;;  %7034 = vmatpush3.msra.mxu1 %v7765_v54 }
 0xac1   :  { %7028 = vmatprep.mubr.msk.f32.mxu0 %vm83_vm0, %v1842_v39  ;;  %7038 = vmatprep.subr.mxu1 %v6270_v34  ;;  %v6494_v39 = vld [vmem:[%s8355_s7 + $0x18] sm:$0xff]  }
 0xac2   :  { %7029 = vmatmul.mubr.msk.f32.vlgmr.msra.gmra.mxu0 %vm83_vm0, %v7019_v36  ;;  %7036 = vmatmul.mubr.msk.f32.vlgmr.msra.gmra.mxu1 %vm331_vm1, %v5954_v37  ;;  %v6490_v36 = vld [vmem:[%s8354_s6 + $0x80] sm:$0xff]   ;;  %v6318_v41 = vunpack.c.h.bf16 %v6494_v39 }
 0xac3   :  { %7039 = vmatpush3.msra.mxu1 %v6270_v34  ;;  %7050 = vmatpush3.msra.mxu0 %v7762_v32  ;;  %v6301_v34 = vunpack.c.l.bf16 %v6491_v31  ;;  %v6298_v37 = vunpack.c.h.bf16 %v6490_v36  ;;  %v6297_v38 = vunpack.c.l.bf16 %v6490_v36  ;;  %v6498_v36 = vld [vmem:[%s8351_s3 + $0x88] sm:$0xff]  }
 0xac4   :  { %7040 = vmatprep.subr.mxu1 %v6269_v40  ;;  %7051 = vmatprep.subr.mxu0 %v7765_v54 }
 0xac5   :  { %7041 = vmatpush3.msra.mxu1 %v6269_v40  ;;  %7052 = vmatpush3.msra.mxu0 %v7765_v54  ;;  %v6493_v40 = vld [vmem:[%s8355_s7 + $0x10] sm:$0xff]  }
 0xac6   :  { %7042 = vmatprep.subr.mxu1 %v6266_v42  ;;  %7053 = vmatprep.mubr.msk.f32.mxu0 %vm331_vm1, %v5963_v43  ;;  %v6314_v43 = vunpack.c.h.bf16 %v6493_v40 }
 0xac7   :  { %7056 = vmatprep.subr.mxu0 %v6278_v44  ;;  %7043 = vmatpush3.msra.mxu1 %v6266_v42  ;;  %v6317_v42 = vunpack.c.l.bf16 %v6494_v39 }
 0xac8   :  { %7054 = vmatmul.mubr.msk.f32.vlgmr.msra.gmra.mxu0 %vm331_vm1, %v5964_v46  ;;  %7044 = vmatprep.subr.mxu1 %v6265_v45 }
 0xac9   :  { %7057 = vmatpush3.msra.mxu0 %v6278_v44  ;;  %7045 = vmatpush3.msra.mxu1 %v6265_v45  ;;  %v6313_v44 = vunpack.c.l.bf16 %v6493_v40 }
 0xaca   :  { %7058 = vmatprep.subr.mxu0 %v6277_v48  ;;  %7067 = vmatprep.subr.mxu1 %v7762_v32 }
 0xacb   :  { %7059 = vmatpush3.msra.mxu0 %v6277_v48 }
 0xacc   :  { %7060 = vmatprep.subr.mxu0 %v6274_v49 }
 0xacd   :  { %7061 = vmatpush3.msra.mxu0 %v6274_v49 }
 0xace   :  { %7062 = vmatprep.subr.mxu0 %v6273_v51 }
 0xacf   :  { %7063 = vmatpush3.msra.mxu0 %v6273_v51 }
 0xad0   :  { %7085 = vmatprep.subr.mxu0 %v7762_v32 }
 0xb7d   :  { %v7012_v35 = vpop.f32.mrf.mxu1 }
 0xb7e   :  { %v1766_v53 = vadd.f32 %v7012_v35, %v1590_v26  ;;  %v6492_v35 = vld [vmem:[%s8355_s7 + $0x8] sm:$0xff]  }
 0xb7f   :  { %v1756_v55 = vpop.f32.mrf.mxu1 }
 0xb80   :  { %v1765_v56 = vadd.f32 %v1756_v55, %v1589_v30  ;;  %v6309_v55 = vunpack.c.l.bf16 %v6492_v35 }
 0xb82   :  { %v7030_v57 = vpop.f32.mrf.mxu0  ;;  %v7037_v58 = vpop.f32.mrf.mxu1 }
 0xb83   :  { %v1942_v59 = vadd.f32 %v7030_v57, %v1766_v53  ;;  %v6310_v53 = vunpack.c.h.bf16 %v6492_v35 }
 0xb84   :  { %v1932_v61 = vpop.f32.mrf.mxu0  ;;  %v2018_v62 = vpop.f32.mrf.mxu1 }
 0xb85   :  { %v1941_v0 = vadd.f32 %v1932_v61, %v1765_v56  ;;  %7046 = vmatprep.mubr.msk.f32.mxu1 %vm83_vm0, %v2018_v62  ;;  %v6304_v56 = vld [vmem:[%s8355_s7] sm:$0xff]  }
 0xb86   :  { %7047 = vmatmul.mubr.msk.f32.vlgmr.msra.gmra.mxu1 %vm83_vm0, %v7037_v58  ;;  %v6306_v57 = vunpack.c.h.bf16 %v6304_v56  ;;  %v6305_v58 = vunpack.c.l.bf16 %v6304_v56 }
 0xb87   :  { %7068 = vmatpush3.msra.mxu1 %v7762_v32  ;;  %7071 = vmatprep.mubr.msk.f32.mxu1 %vm331_vm1, %v5973_v63 }
 0xb88   :  { %v7055_v4 = vpop.f32.mrf.mxu0  ;;  %7069 = vmatprep.subr.mxu1 %v7765_v54 }
 0xb89   :  { %7070 = vmatpush3.msra.mxu1 %v7765_v54 }
 0xb8a   :  { %v2194_v6 = vpop.f32.mrf.mxu0  ;;  %7074 = vmatprep.subr.mxu1 %v6286_v1  ;;  %7072 = vmatmul.mubr.msk.f32.vlgmr.msra.gmra.mxu1 %vm331_vm1, %v5974_v2 }
 0xb8b   :  { %7064 = vmatprep.mubr.msk.f32.mxu0 %vm83_vm0, %v2194_v6  ;;  %7075 = vmatpush3.msra.mxu1 %v6286_v1 }
 0xb8c   :  { %7065 = vmatmul.mubr.msk.f32.vlgmr.msra.gmra.mxu0 %vm83_vm0, %v7055_v4  ;;  %7076 = vmatprep.subr.mxu1 %v6285_v5 }
 0xb8d   :  { %7086 = vmatpush3.msra.mxu0 %v7762_v32  ;;  %7077 = vmatpush3.msra.mxu1 %v6285_v5  ;;  %v6004_v5 = vld [vmem:[%s8357_s9 + $0x3] ss:$0 sm:$0xff] }
 0xb8e   :  { %7087 = vmatprep.subr.mxu0 %v7765_v54  ;;  %7078 = vmatprep.subr.mxu1 %v6282_v7 }
 0xb8f   :  { %7088 = vmatpush3.msra.mxu0 %v7765_v54  ;;  %7089 = vmatprep.mubr.msk.f32.mxu0 %vm331_vm1, %v5983_v9 }
 0xb90   :  { %7079 = vmatpush3.msra.mxu1 %v6282_v7  ;;  %7090 = vmatmul.mubr.msk.f32.vlgmr.msra.gmra.mxu0 %vm331_vm1, %v5984_v10 }
 0xb91   :  { %7080 = vmatprep.subr.mxu1 %v6281_v11  ;;  %7092 = vmatprep.subr.mxu0 %v6294_v14 }
 0xb92   :  { %7081 = vmatpush3.msra.mxu1 %v6281_v11  ;;  %7093 = vmatpush3.msra.mxu0 %v6294_v14 }
 0xb93   :  { %7103 = vmatprep.subr.mxu1 %v7762_v32  ;;  %7094 = vmatprep.subr.mxu0 %v6293_v15 }
 0xb94   :  { %7095 = vmatpush3.msra.mxu0 %v6293_v15 }
 0xb95   :  { %7096 = vmatprep.subr.mxu0 %v6290_v17 }
 0xb96   :  { %7097 = vmatpush3.msra.mxu0 %v6290_v17 }
 0xb97   :  { %7098 = vmatprep.subr.mxu0 %v6289_v18 }
 0xb98   :  { %7099 = vmatpush3.msra.mxu0 %v6289_v18 }
 0xb99   :  { %7121 = vmatprep.subr.mxu0 %v6318_v41 }
 0xc46   :  { %v7048_v19 = vpop.f32.mrf.mxu1 }
 0xc47   :  { %v2118_v20 = vadd.f32 %v7048_v19, %v1942_v59 }
 0xc48   :  { %v2108_v21 = vpop.f32.mrf.mxu1 }
 0xc49   :  { %v2117_v22 = vadd.f32 %v2108_v21, %v1941_v0 }
 0xc4a   :  { %v7073_v23 = vpop.f32.mrf.mxu1 }
 0xc4c   :  { %v7066_v24 = vpop.f32.mrf.mxu0  ;;  %v2370_v13 = vpop.f32.mrf.mxu1 }
 0xc4d   :  { %v2294_v8 = vadd.f32 %v7066_v24, %v2118_v20  ;;  %7082 = vmatprep.mubr.msk.f32.mxu1 %vm83_vm0, %v2370_v13 }
 0xc4e   :  { %v2284_v26 = vpop.f32.mrf.mxu0  ;;  %7083 = vmatmul.mubr.msk.f32.vlgmr.msra.gmra.mxu1 %vm83_vm0, %v7073_v23 }
 0xc4f   :  { %v2293_v27 = vadd.f32 %v2284_v26, %v2117_v22  ;;  %7104 = vmatpush3.msra.mxu1 %v7762_v32  ;;  %7107 = vmatprep.mubr.msk.f32.mxu1 %vm331_vm1, %v5993_v25  ;;  %v6500_v25 = vld [vmem:[%s8351_s3 + $0xa8] sm:$0xff]  }
 0xc50   :  { %v7091_v29 = vpop.f32.mrf.mxu0  ;;  %7105 = vmatprep.subr.mxu1 %v7765_v54 }
 0xc51   :  { %7106 = vmatpush3.msra.mxu1 %v7765_v54 }
 0xc52   :  { %v2546_v30 = vpop.f32.mrf.mxu0  ;;  %7108 = vmatmul.mubr.msk.f32.vlgmr.msra.gmra.mxu1 %vm331_vm1, %v5994_v28  ;;  %7110 = vmatprep.subr.mxu1 %v6302_v33  ;;  %v6495_v28 = vld [vmem:[%s8351_s3 + $0x60] sm:$0xff]  }
 0xc53   :  { %7100 = vmatprep.mubr.msk.f32.mxu0 %vm83_vm0, %v2546_v30  ;;  %7111 = vmatpush3.msra.mxu1 %v6302_v33  ;;  %v6499_v30 = vld [vmem:[%s8351_s3 + $0xa0] sm:$0xff]   ;;  %v6321_v33 = vunpack.c.l.bf16 %v6495_v28 }
 0xc54   :  { %7101 = vmatmul.mubr.msk.f32.vlgmr.msra.gmra.mxu0 %vm83_vm0, %v7091_v29  ;;  %7112 = vmatprep.subr.mxu1 %v6301_v34  ;;  %v6322_v29 = vunpack.c.h.bf16 %v6495_v28  ;;  %v6338_v31 = vunpack.c.h.bf16 %v6499_v30 }
 0xc55   :  { %7113 = vmatpush3.msra.mxu1 %v6301_v34  ;;  %7122 = vmatpush3.msra.mxu0 %v6318_v41  ;;  %v6337_v34 = vunpack.c.l.bf16 %v6499_v30 }
 0xc56   :  { %7114 = vmatprep.subr.mxu1 %v6298_v37  ;;  %7123 = vmatprep.subr.mxu0 %v6317_v42 }
 0xc57   :  { %7115 = vmatpush3.msra.mxu1 %v6298_v37  ;;  %7124 = vmatpush3.msra.mxu0 %v6317_v42  ;;  %v6334_v37 = vunpack.c.h.bf16 %v6498_v36 }
 0xc58   :  { %7116 = vmatprep.subr.mxu1 %v6297_v38  ;;  %7125 = vmatprep.subr.mxu0 %v6314_v43 }
 0xc59   :  { %7117 = vmatpush3.msra.mxu1 %v6297_v38  ;;  %7126 = vmatpush3.msra.mxu0 %v6314_v43 }
 0xc5a   :  { %7127 = vmatprep.subr.mxu0 %v6313_v44 }
 0xc5b   :  { %7128 = vmatpush3.msra.mxu0 %v6313_v44 }
 0xc5c   :  { %7129 = vmatprep.subr.mxu0 %v6310_v53 }
 0xc5d   :  { %7130 = vmatpush3.msra.mxu0 %v6310_v53 }
 0xc5e   :  { %7131 = vmatprep.subr.mxu0 %v6309_v55 }
 0xc5f   :  { %7132 = vmatpush3.msra.mxu0 %v6309_v55 }
 0xc60   :  { %7133 = vmatprep.subr.mxu0 %v6306_v57 }
 0xc61   :  { %7134 = vmatpush3.msra.mxu0 %v6306_v57  ;;  %v6497_v57 = vld [vmem:[%s8351_s3 + $0x80] sm:$0xff]  }
 0xc62   :  { %7135 = vmatprep.subr.mxu0 %v6305_v58 }
 0xc63   :  { %7136 = vmatpush3.msra.mxu0 %v6305_v58 }
 0xd0e   :  { %v7084_v45 = vpop.f32.mrf.mxu1 }
 0xd0f   :  { %v2470_v46 = vadd.f32 %v7084_v45, %v2294_v8  ;;  %v6342_v8 = vunpack.c.h.bf16 %v6500_v25  ;;  %v6009_v45 = vld [vmem:[%s8357_s9 + $0x4] ss:$0 sm:$0xff] }
 0xd10   :  { %v2460_v47 = vpop.f32.mrf.mxu1 }
 0xd11   :  { %v2469_v48 = vadd.f32 %v2460_v47, %v2293_v27  ;;  %7162 = vmatprep.subr.mxu0 %v6342_v8  ;;  %v6341_v27 = vunpack.c.l.bf16 %v6500_v25  ;;  %v6010_v47 = vld [vmem:[%s8357_s9 + $0x5] ss:$0 sm:$0xff] }
 0xd12   :  { %v7109_v49 = vpop.f32.mrf.mxu1 }
 0xd14   :  { %v2722_v51 = vpop.f32.mrf.mxu1  ;;  %v7102_v59 = vpop.f32.mrf.mxu0 }
 0xd15   :  { %7118 = vmatprep.mubr.msk.f32.mxu1 %vm83_vm0, %v2722_v51  ;;  %v2646_v61 = vadd.f32 %v7102_v59, %v2470_v46  ;;  %v6333_v59 = vunpack.c.l.bf16 %v6498_v36 }
 0xd16   :  { %7119 = vmatmul.mubr.msk.f32.vlgmr.msra.gmra.mxu1 %vm83_vm0, %v7109_v49  ;;  %v2636_v60 = vpop.f32.mrf.mxu0 }
 0xd17   :  { %v2645_v63 = vadd.f32 %v2636_v60, %v2469_v48  ;;  %v6330_v60 = vunpack.c.h.bf16 %v6497_v57 }
 0xdd6   :  { %v7120_v62 = vpop.f32.mrf.mxu1 }
 0xdd7   :  { %v2822_v0 = vadd.f32 %v7120_v62, %v2646_v61  ;;  %v6329_v61 = vunpack.c.l.bf16 %v6497_v57  ;;  %v6034_v62 = vld [vmem:[%s8352_s4 + $0xa] ss:$0 sm:$0xff]  ;;  %v6501_v57 = vld [vmem:[%s8353_s5 + $0x10] sm:$0xff]  }
 0xdd8   :  { %v2812_v1 = vpop.f32.mrf.mxu1 }
 0xdd9   :  { %v2821_v2 = vadd.f32 %v2812_v1, %v2645_v63  ;;  %v2824_v4 = vmax.f32 %v2822_v0, 0.0 }
 0xddb   :  { %v2823_v3 = vmax.f32 %v2821_v2, 0.0  ;;  %v6026_v2 = vld [vmem:[%s8352_s4 + $0x6] ss:$0 sm:$0xff] }
 0xddd   :  { %7137 = vmatprep.mubr.msk.f32.mxu0 %vm2849_vm2, %v2823_v3 }
 0xdde   :  { %7138 = vmatmul.mubr.msk.f32.vlgmr.msra.gmra.mxu0 %vm2849_vm2, %v2824_v4 }
 0xddf   :  { %7163 = vmatpush3.msra.mxu0 %v6342_v8 }
 0xde0   :  { %7164 = vmatprep.subr.mxu0 %v6341_v27 }
 0xde1   :  { %7165 = vmatpush3.msra.mxu0 %v6341_v27  ;;  %v8043_v27 = vld [vmem:[%s8349_s1] sm:$0xff] }
 0xde2   :  { %7166 = vmatprep.subr.mxu0 %v6338_v31 }
 0xde3   :  { %7167 = vmatpush3.msra.mxu0 %v6338_v31  ;;  %v8055_v31 = vld [vmem:[%s8349_s1 + $0x8] sm:$0xff] }
 0xde4   :  { %7168 = vmatprep.subr.mxu0 %v6337_v34 }
 0xde5   :  { %7169 = vmatpush3.msra.mxu0 %v6337_v34 }
 0xe9e   :  { %v7139_v6 = vpop.f32.mrf.mxu0 }
 0xe9f   :  { %v2928_v7 = vadd.f32 %v7139_v6, %v6004_v5 }
 0xea0   :  { %v2922_v9 = vpop.f32.mrf.mxu0 }
 0xea1   :  { %v2923_v10 = vadd.f32 %v6004_v5, %v2922_v9  ;;  %v2932_v11 = vadd.f32 %v2928_v7, %v7762_v32  ;;  %v6030_v7 = vld [vmem:[%s8352_s4 + $0x8] ss:$0 sm:$0xff] }
 0xea3   :  { %v2940_v12 = vsel %vm83_vm0, %v2932_v11, 0.0  ;;  %v2931_v14 = vadd.f32 %v2923_v10, %v7765_v54  ;;  %v6496_v54 = vld [vmem:[%s8351_s3 + $0x68] sm:$0xff]  }
 0xea4   :  { %2941 = vadd.xlane.f32.xlu0 %v2940_v12  ;;  %v6326_v13 = vunpack.c.h.bf16 %v6496_v54  ;;  %v6325_v26 = vunpack.c.l.bf16 %v6496_v54  ;;  %v6503_v12 = vld [vmem:[%s8351_s3 + $0x78] sm:$0xff]  }
 0xea5   :  { %v2937_v15 = vsel %vm83_vm0, %v2931_v14, 0.0 }
 0xea6   :  { %2938 = vadd.xlane.f32.xlu1 %v2937_v15  ;;  %7140 = vmatprep.subr.mxu1 %v6326_v13  ;;  %v6354_v15 = vunpack.c.h.bf16 %v6503_v12 }
 0xea7   :  { %7141 = vmatpush3.msra.mxu1 %v6326_v13 }
 0xea8   :  { %7142 = vmatprep.subr.mxu1 %v6325_v26 }
 0xea9   :  { %7143 = vmatpush3.msra.mxu1 %v6325_v26 }
 0xeaa   :  { %7144 = vmatprep.subr.mxu1 %v6322_v29 }
 0xeab   :  { %7145 = vmatpush3.msra.mxu1 %v6322_v29  ;;  %v8049_v29 = vld [vmem:[%s8352_s4 + $0x7] ss:$0 sm:$0xff] }
 0xeac   :  { %7146 = vmatprep.subr.mxu1 %v6321_v33 }
 0xead   :  { %7147 = vmatpush3.msra.mxu1 %v6321_v33 }
 0xeae   :  { %7151 = vmatprep.subr.mxu1 %v6334_v37 }
 0xf2d   :  { %v2942_v16 = vpop.xlane.xlu0 %2941 }
 0xf2e   :  { %v2944_v17 = vmul.f32 0.03125, %v2942_v16  ;;  %v6502_v16 = vld [vmem:[%s8351_s3 + $0x70] sm:$0xff]  }
 0xf2f   :  { %v2939_v18 = vpop.xlane.xlu1 %2938 }
 0xf30   :  { %v2943_v19 = vmul.f32 0.03125, %v2939_v18  ;;  %v2946_v20 = vsub.f32 %v2932_v11, %v2944_v17  ;;  %v6353_v18 = vunpack.c.l.bf16 %v6503_v12 }
 0xf32   :  { %v2945_v21 = vsub.f32 %v2931_v14, %v2943_v19  ;;  %v2948_v24 = vmul.f32 %v2946_v20, %v2946_v20  ;;  %v6350_v19 = vunpack.c.h.bf16 %v6502_v16 }
 0xf34   :  { %v2947_v22 = vmul.f32 %v2945_v21, %v2945_v21  ;;  %v2952_v32 = vsel %vm83_vm0, %v2948_v24, 0.0 }
 0xf36   :  { %v2949_v23 = vsel %vm83_vm0, %v2947_v22, 0.0 }
 0xf37   :  { %2950 = vadd.xlane.f32.xlu1 %v2949_v23  ;;  %v6506_v23 = vld [vmem:[%s8351_s3 + $0xb0] sm:$0xff]  }
 0xf38   :  { %v6365_v54 = vunpack.c.l.bf16 %v6506_v23 }
 0xf3b   :  { %2953 = vadd.xlane.f32.xlu1 %v2952_v32  ;;  %v6366_v32 = vunpack.c.h.bf16 %v6506_v23 }
 0xfc0   :  { %v2951_v38 = vpop.xlane.xlu1 %2950 }
 0xfc1   :  { %v2955_v39 = vmul.f32 0.03125, %v2951_v38 }
 0xfc3   :  { %v2957_v40 = vadd.f32 1e-05, %v2955_v39  ;;  %v6068_v39 = vld [vmem:[%s8352_s4 + $0xb] ss:$0 sm:$0xff] }
 0xfc4   :  { %v2954_v41 = vpop.xlane.xlu1 %2953 }
 0xfc5   :  { %7455 = vrsqrt.f32 %v2957_v40  ;;  %v2956_v42 = vmul.f32 0.03125, %v2954_v41 }
 0xfc7   :  { %v2958_v43 = vadd.f32 1e-05, %v2956_v42 }
 0xfc9   :  { %7457 = vrsqrt.f32 %v2958_v43 }
 0xfd2   :  { %v7456_v44 = vpop.eup %7455 }
 0xfd3   :  { %v2961_v46 = vmul.f32 %v7456_v44, %v2945_v21  ;;  %v6349_v21 = vunpack.c.l.bf16 %v6502_v16  ;;  %v6064_v16 = vld [vmem:[%s8352_s4 + $0x9] ss:$0 sm:$0xff] }
 0xfd5   :  { %v2969_v48 = vmul.f32 %v6009_v45, %v2961_v46 }
 0xfd6   :  { %v7458_v49 = vpop.eup %7457 }
 0xfd7   :  { %v2977_v51 = vadd.f32 %v6010_v47, %v2969_v48  ;;  %v2962_v35 = vmul.f32 %v7458_v49, %v2946_v20  ;;  %v6507_v20 = vld [vmem:[%s8351_s3 + $0xb8] sm:$0xff]  }
 0xfd8   :  { %v6370_v22 = vunpack.c.h.bf16 %v6507_v20  ;;  %v6369_v24 = vunpack.c.l.bf16 %v6507_v20 }
 0xfd9   :  { %v7985_v53 = vmul.f32 %v2977_v51, %v7759_v52  ;;  %v2970_v55 = vmul.f32 %v6009_v45, %v2962_v35 }
 0xfdb   :  { %v2978_v56 = vadd.f32 %v6010_v47, %v2970_v55  ;;  %7148 = vmatprep.mubr.msk.f32.mxu1 %vm83_vm0, %v7985_v53  ;;  %7170 = vmatprep.mubr.msk.f32.mxu0 %vm83_vm0, %v7985_v53 }
 0xfdd   :  { %v7995_v58 = vmul.f32 %v2978_v56, %v7757_v50 }
 0xfdf   :  { %7149 = vmatmul.mubr.msk.f32.vlgmr.msra.gmra.mxu1 %vm83_vm0, %v7995_v58  ;;  %7171 = vmatmul.mubr.msk.f32.vlgmr.msra.gmra.mxu0 %vm83_vm0, %v7995_v58 }
 0xfe0   :  { %7152 = vmatpush3.msra.mxu1 %v6334_v37  ;;  %7159 = vmatprep.mubr.msk.f32.mxu1 %vm83_vm0, %v7985_v53 }
 0xfe1   :  { %7153 = vmatprep.subr.mxu1 %v6333_v59 }
 0xfe2   :  { %7154 = vmatpush3.msra.mxu1 %v6333_v59  ;;  %v6346_v59 = vunpack.c.h.bf16 %v6501_v57 }
 0xfe3   :  { %7155 = vmatprep.subr.mxu1 %v6330_v60 }
 0xfe4   :  { %7156 = vmatpush3.msra.mxu1 %v6330_v60 }
 0xfe5   :  { %7157 = vmatprep.subr.mxu1 %v6329_v61 }
 0xfe6   :  { %7158 = vmatpush3.msra.mxu1 %v6329_v61 }
 0xfe7   :  { %7160 = vmatmul.mubr.msk.f32.vlgmr.msra.gmra.mxu1 %vm83_vm0, %v7995_v58 }
0x109f   :  { %v7150_v63 = vpop.f32.mrf.mxu1  ;;  %v7172_v0 = vpop.f32.mrf.mxu0 }
0x10a0   :  { %v3269_v1 = vadd.f32 %v7172_v0, %v6034_v62  ;;  %v3103_v17 = vadd.f32 %v7150_v63, %v6026_v2 }
0x10a1   :  { %v3097_v3 = vpop.f32.mrf.mxu1  ;;  %v3263_v4 = vpop.f32.mrf.mxu0 }
0x10a2   :  { %v3098_v5 = vadd.f32 %v6026_v2, %v3097_v3  ;;  %v3264_v6 = vadd.f32 %v6034_v62, %v3263_v4  ;;  %7180 = vmatprep.subr.mxu0 %v3269_v1  ;;  %v6345_v2 = vunpack.c.l.bf16 %v6501_v57  ;;  %v6505_v3 = vld [vmem:[%s8351_s3 + $0x98] sm:$0xff]  }
0x10a3   :  { %7181 = vmatpush3.msra.mxu0 %v3269_v1  ;;  %v6362_v4 = vunpack.c.h.bf16 %v6505_v3 }
0x10a4   :  { %7177 = vmatprep.mubr.msk.f32.mxu1 %vm331_vm1, %v3098_v5  ;;  %7182 = vmatprep.subr.mxu0 %v3264_v6 }
0x10a5   :  { %7183 = vmatpush3.msra.mxu0 %v3264_v6  ;;  %v6504_v6 = vld [vmem:[%s8351_s3 + $0x90] sm:$0xff]  }
0x10a6   :  { %7187 = vmatprep.subr.mxu0 %v6346_v59 }
0x10a7   :  { %v7161_v9 = vpop.f32.mrf.mxu1 }
0x10a8   :  { %v3186_v10 = vadd.f32 %v7161_v9, %v6030_v7  ;;  %v6361_v9 = vunpack.c.l.bf16 %v6505_v3 }
0x10a9   :  { %v3180_v11 = vpop.f32.mrf.mxu1 }
0x10aa   :  { %v3181_v14 = vadd.f32 %v6030_v7, %v3180_v11  ;;  %7173 = vmatprep.subr.msk.mxu1 %vm331_vm1, %v3186_v10  ;;  %v6357_v11 = vunpack.c.l.bf16 %v6504_v6 }
0x10ab   :  { %7174 = vmatpush3.xpose.msk.msra.mxu1 %vm331_vm1, %v3186_v10  ;;  %v6358_v10 = vunpack.c.h.bf16 %v6504_v6 }
0x10ac   :  { %7175 = vmatprep.subr.msk.mxu1 %vm331_vm1, %v3181_v14 }
0x10af   :  { %7176 = vmatpush3.xpose.msk.msra.mxu1 %vm331_vm1, %v3181_v14 }
0x10b0   :  { %7194 = vmatprep.subr.mxu1 %v6354_v15 }
0x10b2   :  { %7178 = vmatmul.mubr.msk.f32.vlgmr.msra.gmra.mxu1 %vm331_vm1, %v3103_v17 }
0x10b3   :  { %7195 = vmatpush3.msra.mxu1 %v6354_v15  ;;  %7202 = vmatprep.mubr.msk.f32.mxu1 %vm83_vm0, %v7985_v53 }
0x10b4   :  { %7196 = vmatprep.subr.mxu1 %v6353_v18 }
0x10b5   :  { %7197 = vmatpush3.msra.mxu1 %v6353_v18 }
0x10b6   :  { %7198 = vmatprep.subr.mxu1 %v6350_v19 }
0x10b7   :  { %7199 = vmatpush3.msra.mxu1 %v6350_v19 }
0x10b8   :  { %7200 = vmatprep.subr.mxu1 %v6349_v21 }
0x10b9   :  { %7201 = vmatpush3.msra.mxu1 %v6349_v21 }
0x10ba   :  { %7203 = vmatmul.mubr.msk.f32.vlgmr.msra.gmra.mxu1 %vm83_vm0, %v7995_v58  ;;  %7216 = vmatprep.subr.mxu1 %v6370_v22 }
0x10bb   :  { %7217 = vmatpush3.msra.mxu1 %v6370_v22  ;;  %7224 = vmatprep.mubr.msk.f32.mxu1 %vm83_vm0, %v7985_v53 }
0x10bc   :  { %7218 = vmatprep.subr.mxu1 %v6369_v24 }
0x10bd   :  { %7219 = vmatpush3.msra.mxu1 %v6369_v24 }
0x10be   :  { %7220 = vmatprep.subr.mxu1 %v6366_v32 }
0x10bf   :  { %7221 = vmatpush3.msra.mxu1 %v6366_v32 }
0x10c0   :  { %7222 = vmatprep.subr.mxu1 %v6365_v54 }
0x10c1   :  { %7223 = vmatpush3.msra.mxu1 %v6365_v54 }
0x10c2   :  { %7225 = vmatmul.mubr.msk.f32.vlgmr.msra.gmra.mxu1 %vm83_vm0, %v7995_v58 }
0x1172   :  { %v7179_v13 = vpop.f32.mrf.mxu1 }
0x1173   :  { %v3360_v8 = vmul.f32 0.25, %v7179_v13 }
0x1174   :  { %v3350_v25 = vpop.f32.mrf.mxu1 }
0x1175   :  { %v3359_v26 = vmul.f32 0.25, %v3350_v25  ;;  %v3362_v33 = vadd.f32 %v8055_v31, %v3360_v8 }
0x1177   :  { %v3361_v28 = vadd.f32 %v8043_v27, %v3359_v26  ;;  %v3366_v37 = vsel %vm331_vm1, %v3362_v33, -inf }
0x1179   :  { %v3363_v30 = vsel %vm331_vm1, %v3361_v28, -inf }
0x117a   :  { %v7204_v34 = vpop.f32.mrf.mxu1  ;;  %3364 = vmax.xlane.f32.xlu1 %v3363_v30 }
0x117b   :  { %v8059_v36 = vadd.f32 %v7204_v34, %v8049_v29 }
0x117c   :  { %v3655_v38 = vpop.f32.mrf.mxu1 }
0x117d   :  { %v3656_v12 = vadd.f32 %v8049_v29, %v3655_v38 }
0x117e   :  { %3367 = vmax.xlane.f32.xlu1 %v3366_v37 }
0x1182   :  { %v7226_v40 = vpop.f32.mrf.mxu1 }
0x1183   :  { %v3827_v41 = vadd.f32 %v7226_v40, %v6068_v39 }
0x1184   :  { %v3821_v42 = vpop.f32.mrf.mxu1 }
0x1185   :  { %v3822_v43 = vadd.f32 %v6068_v39, %v3821_v42  ;;  %7234 = vmatprep.subr.mxu1 %v3827_v41 }
0x1186   :  { %7235 = vmatpush3.msra.mxu1 %v3827_v41 }
0x1187   :  { %7236 = vmatprep.subr.mxu1 %v3822_v43 }
0x1188   :  { %7237 = vmatpush3.msra.mxu1 %v3822_v43  ;;  %v7485_v43 = vld [vmem:[%s8349_s1 + $0x10] sm:$0xff] }
0x1203   :  { %v3365_v44 = vpop.xlane.xlu1 %3364 }
0x1204   :  { %v3369_v45 = vsub.f32 %v3361_v28, %v3365_v44  ;;  %v6508_v44 = vld [vmem:[%s8353_s5 + $0x18] sm:$0xff]  }
0x1206   :  { %v3371_v46 = vmul.f32 1.442695, %v3369_v45  ;;  %v6374_v45 = vunpack.c.h.bf16 %v6508_v44 }
0x1207   :  { %v3368_v47 = vpop.xlane.xlu1 %3367 }
0x1208   :  { %7459 = vpow2.f32 %v3371_v46  ;;  %v3370_v48 = vsub.f32 %v3362_v33, %v3368_v47  ;;  %v6373_v46 = vunpack.c.l.bf16 %v6508_v44 }
0x120a   :  { %v3373_v49 = vmul.f32 1.442695, %v3370_v48 }
0x120c   :  { %7461 = vpow2.f32 %v3373_v49  ;;  %v6012_v49 = vld [vmem:[%s8357_s9 + $0x6] ss:$0 sm:$0xff] }
0x1215   :  { %v7460_v51 = vpop.eup %7459 }
0x1216   :  { %v3375_v35 = vsel %vm331_vm1, %v7460_v51, 0.0 }
0x1217   :  { %3376 = vadd.xlane.f32.xlu1 %v3375_v35 }
0x1219   :  { %v7462_v55 = vpop.eup %7461 }
0x121a   :  { %v3378_v56 = vsel %vm331_vm1, %v7462_v55, 0.0 }
0x121b   :  { %3379 = vadd.xlane.f32.xlu1 %v3378_v56 }
0x12a0   :  { %v3377_v60 = vpop.xlane.xlu1 %3376 }
0x12a1   :  { %7463 = vrcp.f32 %v3377_v60 }
0x12a4   :  { %v3380_v61 = vpop.xlane.xlu1 %3379 }
0x12a5   :  { %7465 = vrcp.f32 %v3380_v61 }
0x12ae   :  { %v7464_v62 = vpop.eup %7463 }
0x12af   :  { %v3383_v63 = vmul.f32 %v7464_v62, %v7460_v51 }
0x12b1   :  { %7184 = vmatprep.mubr.msk.f32.mxu0 %vm331_vm1, %v3383_v63 }
0x12b2   :  { %v7466_v0 = vpop.eup %7465 }
0x12b3   :  { %v3384_v1 = vmul.f32 %v7466_v0, %v7462_v55 }
0x12b5   :  { %7185 = vmatmul.mubr.msk.f32.vlgmr.msra.gmra.mxu0 %vm331_vm1, %v3384_v1 }
0x12b6   :  { %7188 = vmatpush3.msra.mxu0 %v6346_v59 }
0x12b7   :  { %7189 = vmatprep.subr.mxu0 %v6345_v2 }
0x12b8   :  { %7190 = vmatpush3.msra.mxu0 %v6345_v2 }
0x12b9   :  { %7205 = vmatprep.subr.mxu0 %v6362_v4 }
0x1375   :  { %v7186_v5 = vpop.f32.mrf.mxu0 }
0x1377   :  { %v3457_v7 = vpop.f32.mrf.mxu0 }
0x1378   :  { %7191 = vmatprep.mubr.msk.f32.mxu0 %vm331_vm1, %v3457_v7 }
0x1379   :  { %7192 = vmatmul.mubr.msk.f32.vlgmr.msra.gmra.mxu0 %vm331_vm1, %v7186_v5 }
0x137a   :  { %7206 = vmatpush3.msra.mxu0 %v6362_v4  ;;  %7213 = vmatprep.mubr.msk.f32.mxu0 %vm83_vm0, %v7985_v53 }
0x137b   :  { %7207 = vmatprep.subr.mxu0 %v6361_v9 }
0x137c   :  { %7208 = vmatpush3.msra.mxu0 %v6361_v9 }
0x137d   :  { %7209 = vmatprep.subr.mxu0 %v6358_v10 }
0x137e   :  { %7210 = vmatpush3.msra.mxu0 %v6358_v10 }
0x137f   :  { %7211 = vmatprep.subr.mxu0 %v6357_v11 }
0x1380   :  { %7212 = vmatpush3.msra.mxu0 %v6357_v11 }
0x1381   :  { %7214 = vmatmul.mubr.msk.f32.vlgmr.msra.gmra.mxu0 %vm83_vm0, %v7995_v58 }
0x1382   :  { %7231 = vmatprep.mubr.msk.f32.mxu0 %vm331_vm1, %v3656_v12  ;;  %v6509_v12 = vld [vmem:[%s8354_s6 + $0x90] sm:$0xff]  }
0x1439   :  { %v7193_v14 = vpop.f32.mrf.mxu0 }
0x143a   :  { %v3553_v51 = vadd.f32 %v7193_v14, %v6012_v49  ;;  %v6378_v14 = vunpack.c.h.bf16 %v6509_v12 }
0x143b   :  { %v3543_v15 = vpop.f32.mrf.mxu0 }
0x143c   :  { %v3552_v55 = vadd.f32 %v6012_v49, %v3543_v15  ;;  %v6377_v15 = vunpack.c.l.bf16 %v6509_v12  ;;  %v6516_v49 = vld [vmem:[%s8354_s6 + $0xc8] sm:$0xff]  }
0x1441   :  { %v7215_v17 = vpop.f32.mrf.mxu0 }
0x1442   :  { %v3744_v18 = vadd.f32 %v7215_v17, %v6064_v16 }
0x1443   :  { %v3738_v19 = vpop.f32.mrf.mxu0 }
0x1444   :  { %v3739_v20 = vadd.f32 %v6064_v16, %v3738_v19  ;;  %7227 = vmatprep.subr.msk.mxu0 %vm331_vm1, %v3744_v18 }
0x1445   :  { %7228 = vmatpush3.xpose.msk.msra.mxu0 %vm331_vm1, %v3744_v18 }
0x1446   :  { %7229 = vmatprep.subr.msk.mxu0 %vm331_vm1, %v3739_v20 }
0x1449   :  { %7230 = vmatpush3.xpose.msk.msra.mxu0 %vm331_vm1, %v3739_v20 }
0x144a   :  { %7241 = vmatprep.subr.mxu0 %v6374_v45 }
0x144c   :  { %7232 = vmatmul.mubr.msk.f32.vlgmr.msra.gmra.mxu0 %vm331_vm1, %v8059_v36 }
0x144d   :  { %7242 = vmatpush3.msra.mxu0 %v6374_v45 }
0x144e   :  { %7243 = vmatprep.subr.mxu0 %v6373_v46 }
0x144f   :  { %7244 = vmatpush3.msra.mxu0 %v6373_v46  ;;  %v7489_v46 = vld [vmem:[%s8349_s1 + $0x30] sm:$0xff] }
0x150c   :  { %v7233_v21 = vpop.f32.mrf.mxu0 }
0x150d   :  { %v3918_v22 = vmul.f32 0.25, %v7233_v21 }
0x150e   :  { %v3908_v23 = vpop.f32.mrf.mxu0 }
0x150f   :  { %v3917_v24 = vmul.f32 0.25, %v3908_v23  ;;  %v3920_v32 = vadd.f32 %v8055_v31, %v3918_v22  ;;  %v6083_v23 = vld [vmem:[%s8357_s9 + $0x7] ss:$0 sm:$0xff] }
0x1511   :  { %v3924_v54 = vsel %vm331_vm1, %v3920_v32, -inf  ;;  %v3919_v13 = vadd.f32 %v8043_v27, %v3917_v24 }
0x1512   :  { %3925 = vmax.xlane.f32.xlu1 %v3924_v54  ;;  %v6084_v54 = vld [vmem:[%s8357_s9 + $0x8] ss:$0 sm:$0xff] }
0x1513   :  { %v3921_v25 = vsel %vm331_vm1, %v3919_v13, -inf }
0x1514   :  { %3922 = vmax.xlane.f32.xlu0 %v3921_v25 }
0x159b   :  { %v3926_v8 = vpop.xlane.xlu1 %3925 }
0x159c   :  { %v3928_v26 = vsub.f32 %v3920_v32, %v3926_v8 }
0x159d   :  { %v3923_v28 = vpop.xlane.xlu0 %3922 }
0x159e   :  { %v3931_v29 = vmul.f32 1.442695, %v3928_v26  ;;  %v3927_v30 = vsub.f32 %v3919_v13, %v3923_v28 }
0x15a0   :  { %7467 = vpow2.f32 %v3931_v29  ;;  %v3929_v33 = vmul.f32 1.442695, %v3927_v30 }
0x15a2   :  { %7469 = vpow2.f32 %v3929_v33  ;;  %v6512_v33 = vld [vmem:[%s8354_s6 + $0xa8] sm:$0xff]  }
0x15ad   :  { %v7468_v34 = vpop.eup %7467 }
0x15ae   :  { %v3936_v36 = vsel %vm331_vm1, %v7468_v34, 0.0 }
0x15af   :  { %v7470_v31 = vpop.eup %7469  ;;  %3937 = vadd.xlane.f32.xlu1 %v3936_v36  ;;  %v6390_v36 = vunpack.c.h.bf16 %v6512_v33 }
0x15b0   :  { %v3933_v37 = vsel %vm331_vm1, %v7470_v31, 0.0 }
0x15b1   :  { %3934 = vadd.xlane.f32.xlu0 %v3933_v37  ;;  %v6511_v37 = vld [vmem:[%s8354_s6 + $0xa0] sm:$0xff]  }
0x1638   :  { %v3938_v27 = vpop.xlane.xlu1 %3937 }
0x1639   :  { %7471 = vrcp.f32 %v3938_v27  ;;  %v6389_v27 = vunpack.c.l.bf16 %v6512_v33 }
0x163a   :  { %v3935_v38 = vpop.xlane.xlu0 %3934 }
0x163b   :  { %7473 = vrcp.f32 %v3935_v38  ;;  %v7488_v38 = vld [vmem:[%s8349_s1 + $0x28] sm:$0xff] }
0x1646   :  { %v7472_v39 = vpop.eup %7471 }
0x1647   :  { %v3942_v42 = vmul.f32 %v7472_v39, %v7468_v34  ;;  %v7486_v34 = vld [vmem:[%s8349_s1 + $0x18] sm:$0xff]  ;;  %v6386_v39 = vunpack.c.h.bf16 %v6511_v37 }
0x1648   :  { %v7474_v40 = vpop.eup %7473 }
0x1649   :  { %v3941_v41 = vmul.f32 %v7474_v40, %v7470_v31  ;;  %v7487_v31 = vld [vmem:[%s8349_s1 + $0x20] sm:$0xff]  ;;  %v6385_v40 = vunpack.c.l.bf16 %v6511_v37 }
0x164b   :  { %7238 = vmatprep.mubr.msk.f32.mxu1 %vm331_vm1, %v3941_v41 }
0x164c   :  { %7239 = vmatmul.mubr.msk.f32.vlgmr.msra.gmra.mxu1 %vm331_vm1, %v3942_v42  ;;  %v6514_v42 = vld [vmem:[%s8354_s6 + $0xb8] sm:$0xff]  }
0x164d   :  { %7252 = vmatprep.mubr.msk.f32.mxu1 %vm331_vm1, %v7485_v43  ;;  %v6398_v45 = vunpack.c.h.bf16 %v6514_v42 }
0x170c   :  { %v7240_v47 = vpop.f32.mrf.mxu1 }
0x170e   :  { %v4015_v48 = vpop.f32.mrf.mxu1 }
0x170f   :  { %7245 = vmatprep.mubr.msk.f32.mxu0 %vm331_vm1, %v4015_v48  ;;  %v6513_v48 = vld [vmem:[%s8354_s6 + $0xb0] sm:$0xff]  }
0x1710   :  { %7246 = vmatmul.mubr.msk.f32.vlgmr.msra.gmra.mxu0 %vm331_vm1, %v7240_v47 }
0x17d0   :  { %v7247_v35 = vpop.f32.mrf.mxu0 }
0x17d1   :  { %v4111_v56 = vadd.f32 %v7247_v35, %v3553_v51  ;;  %v6397_v51 = vunpack.c.l.bf16 %v6514_v42  ;;  %v7490_v35 = vld [vmem:[%s8349_s1 + $0x38] sm:$0xff]  ;;  %v7497_v42 = vld [vmem:[%s8349_s1 + $0x70] sm:$0xff] }
0x17d2   :  { %v4101_v57 = vpop.f32.mrf.mxu0 }
0x17d3   :  { %v4110_v59 = vadd.f32 %v4101_v57, %v3552_v55  ;;  %v4113_v60 = vadd.f32 %v4111_v56, %v7995_v58  ;;  %v6394_v55 = vunpack.c.h.bf16 %v6513_v48  ;;  %v6406_v56 = vunpack.c.h.bf16 %v6516_v49 }
0x17d4   :  { %v6393_v57 = vunpack.c.l.bf16 %v6513_v48 }
0x17d5   :  { %v4121_v61 = vsel %vm83_vm0, %v4113_v60, 0.0  ;;  %v4112_v62 = vadd.f32 %v4110_v59, %v7985_v53  ;;  %v6510_v53 = vld [vmem:[%s8354_s6 + $0x98] sm:$0xff]   ;;  %v6515_v59 = vld [vmem:[%s8354_s6 + $0xc0] sm:$0xff]  }
0x17d6   :  { %4122 = vadd.xlane.f32.xlu0 %v4121_v61  ;;  %v6382_v10 = vunpack.c.h.bf16 %v6510_v53  ;;  %v6381_v11 = vunpack.c.l.bf16 %v6510_v53  ;;  %v6405_v61 = vunpack.c.l.bf16 %v6516_v49  ;;  %v6518_v53 = vld [vmem:[%s8354_s6 + $0xd8] sm:$0xff]  }
0x17d7   :  { %v4118_v63 = vsel %vm83_vm0, %v4112_v62, 0.0  ;;  %v6414_v12 = vunpack.c.h.bf16 %v6518_v53 }
0x17d8   :  { %4119 = vadd.xlane.f32.xlu1 %v4118_v63  ;;  %7255 = vmatprep.subr.mxu0 %v6382_v10  ;;  %v6402_v63 = vunpack.c.h.bf16 %v6515_v59 }
0x17d9   :  { %7256 = vmatpush3.msra.mxu0 %v6382_v10 }
0x17da   :  { %7257 = vmatprep.subr.mxu0 %v6381_v11 }
0x17db   :  { %7258 = vmatpush3.msra.mxu0 %v6381_v11 }
0x17dc   :  { %7259 = vmatprep.subr.mxu0 %v6378_v14 }
0x17dd   :  { %7260 = vmatpush3.msra.mxu0 %v6378_v14 }
0x17de   :  { %7261 = vmatprep.subr.mxu0 %v6377_v15 }
0x17df   :  { %7262 = vmatpush3.msra.mxu0 %v6377_v15  ;;  %v7493_v15 = vld [vmem:[%s8349_s1 + $0x50] sm:$0xff] }
0x185f   :  { %v4123_v0 = vpop.xlane.xlu0 %4122 }
0x1860   :  { %v4125_v1 = vmul.f32 0.03125, %v4123_v0  ;;  %v6401_v0 = vunpack.c.l.bf16 %v6515_v59  ;;  %v6523_v59 = vld [vmem:[%s8354_s6 + $0x100] sm:$0xff]  }
0x1861   :  { %v4120_v2 = vpop.xlane.xlu1 %4119 }
0x1862   :  { %v4127_v3 = vsub.f32 %v4113_v60, %v4125_v1  ;;  %v4124_v4 = vmul.f32 0.03125, %v4120_v2  ;;  %v7491_v60 = vld [vmem:[%s8349_s1 + $0x40] sm:$0xff] }
0x1863   :  { %v6086_v1 = vld [vmem:[%s8356_s8 + $0x1] ss:$0 sm:$0xff] }
0x1864   :  { %v4126_v5 = vsub.f32 %v4112_v62, %v4124_v4  ;;  %v4129_v6 = vmul.f32 %v4127_v3, %v4127_v3  ;;  %v7492_v62 = vld [vmem:[%s8349_s1 + $0x48] sm:$0xff] }
0x1866   :  { %v4133_v7 = vsel %vm83_vm0, %v4129_v6, 0.0  ;;  %v4128_v9 = vmul.f32 %v4126_v5, %v4126_v5 }
0x1867   :  { %4134 = vadd.xlane.f32.xlu0 %v4133_v7 }
0x1868   :  { %v4130_v58 = vsel %vm83_vm0, %v4128_v9, 0.0 }
0x1869   :  { %4131 = vadd.xlane.f32.xlu1 %v4130_v58 }
0x18f0   :  { %v4135_v16 = vpop.xlane.xlu0 %4134 }
0x18f1   :  { %v4137_v17 = vmul.f32 0.03125, %v4135_v16  ;;  %v6517_v16 = vld [vmem:[%s8354_s6 + $0xd0] sm:$0xff]  }
0x18f2   :  { %v4132_v18 = vpop.xlane.xlu1 %4131 }
0x18f3   :  { %v4139_v19 = vadd.f32 1e-05, %v4137_v17  ;;  %v4136_v20 = vmul.f32 0.03125, %v4132_v18  ;;  %v6413_v18 = vunpack.c.l.bf16 %v6518_v53 }
0x18f5   :  { %7475 = vrsqrt.f32 %v4139_v19  ;;  %v4138_v21 = vadd.f32 1e-05, %v4136_v20  ;;  %v6520_v19 = vld [vmem:[%s8354_s6 + $0xe8] sm:$0xff]   ;;  %v7494_v20 = vld [vmem:[%s8349_s1 + $0x58] sm:$0xff] }
0x18f7   :  { %7477 = vrsqrt.f32 %v4138_v21  ;;  %v6410_v21 = vunpack.c.h.bf16 %v6517_v16 }
0x1902   :  { %v7476_v22 = vpop.eup %7475 }
0x1903   :  { %v4143_v24 = vmul.f32 %v7476_v22, %v4127_v3  ;;  %v6422_v22 = vunpack.c.h.bf16 %v6520_v19 }
0x1904   :  { %v7478_v32 = vpop.eup %7477 }
0x1905   :  { %v4151_v13 = vmul.f32 %v6083_v23, %v4143_v24  ;;  %v4142_v25 = vmul.f32 %v7478_v32, %v4126_v5  ;;  %v6519_v24 = vld [vmem:[%s8354_s6 + $0xe0] sm:$0xff]  }
0x1906   :  { %v7495_v32 = vld [vmem:[%s8349_s1 + $0x60] sm:$0xff] }
0x1907   :  { %v4159_v8 = vadd.f32 %v6084_v54, %v4151_v13  ;;  %v4150_v26 = vmul.f32 %v6083_v23, %v4142_v25  ;;  %v6409_v23 = vunpack.c.l.bf16 %v6517_v16  ;;  %v7496_v13 = vld [vmem:[%s8349_s1 + $0x68] sm:$0xff]  ;;  %v6418_v25 = vunpack.c.h.bf16 %v6519_v24 }
0x1909   :  { %v8134_v28 = vmul.f32 %v4159_v8, %v7757_v50  ;;  %v4158_v29 = vadd.f32 %v6084_v54, %v4150_v26  ;;  %v6421_v54 = vunpack.c.l.bf16 %v6520_v19  ;;  %v6417_v8 = vunpack.c.l.bf16 %v6519_v24  ;;  %v6529_v19 = vld [vmem:[%s8355_s7 + $0x30] sm:$0xff]  }
0x190b   :  { %v8137_v30 = vmul.f32 %v4158_v29, %v7759_v52  ;;  %7248 = vmatprep.subr.mxu1 %v8134_v28  ;;  %7284 = vmatprep.subr.mxu0 %v8134_v28 }
0x190c   :  { %7249 = vmatpush3.msra.mxu1 %v8134_v28 }
0x190d   :  { %7250 = vmatprep.subr.mxu1 %v8137_v30 }
0x190e   :  { %7251 = vmatpush3.msra.mxu1 %v8137_v30 }
0x190f   :  { %7253 = vmatmul.mubr.msk.f32.vlgmr.msra.gmra.mxu1 %vm331_vm1, %v7486_v34  ;;  %7266 = vmatprep.subr.mxu1 %v8134_v28 }
0x1910   :  { %7267 = vmatpush3.msra.mxu1 %v8134_v28  ;;  %7270 = vmatprep.mubr.msk.f32.mxu1 %vm331_vm1, %v7487_v31 }
0x1911   :  { %7268 = vmatprep.subr.mxu1 %v8137_v30 }
0x1912   :  { %7269 = vmatpush3.msra.mxu1 %v8137_v30 }
0x1913   :  { %7271 = vmatmul.mubr.msk.f32.vlgmr.msra.gmra.mxu1 %vm331_vm1, %v7488_v38  ;;  %7273 = vmatprep.subr.mxu1 %v6390_v36 }
0x1914   :  { %7274 = vmatpush3.msra.mxu1 %v6390_v36 }
0x1915   :  { %7275 = vmatprep.subr.mxu1 %v6389_v27 }
0x1916   :  { %7276 = vmatpush3.msra.mxu1 %v6389_v27  ;;  %v6522_v27 = vld [vmem:[%s8354_s6 + $0xf8] sm:$0xff]  }
0x1917   :  { %7277 = vmatprep.subr.mxu1 %v6386_v39 }
0x1918   :  { %7278 = vmatpush3.msra.mxu1 %v6386_v39 }
0x1919   :  { %7279 = vmatprep.subr.mxu1 %v6385_v40 }
0x191a   :  { %7280 = vmatpush3.msra.mxu1 %v6385_v40 }
0x191b   :  { %7302 = vmatprep.subr.mxu1 %v8134_v28 }
0x19cf   :  { %v7254_v41 = vpop.f32.mrf.mxu1 }
0x19d1   :  { %v4237_v43 = vpop.f32.mrf.mxu1 }
0x19d2   :  { %7263 = vmatprep.mubr.msk.f32.mxu0 %vm83_vm0, %v4237_v43  ;;  %v6521_v43 = vld [vmem:[%s8354_s6 + $0xf0] sm:$0xff]  }
0x19d3   :  { %7264 = vmatmul.mubr.msk.f32.vlgmr.msra.gmra.mxu0 %vm83_vm0, %v7254_v41  ;;  %v7272_v44 = vpop.f32.mrf.mxu1  ;;  %v6430_v41 = vunpack.c.h.bf16 %v6522_v27  ;;  %v6426_v48 = vunpack.c.h.bf16 %v6521_v43  ;;  %v6425_v49 = vunpack.c.l.bf16 %v6521_v43 }
0x19d4   :  { %7285 = vmatpush3.msra.mxu0 %v8134_v28  ;;  %7288 = vmatprep.mubr.msk.f32.mxu0 %vm331_vm1, %v7489_v46 }
0x19d5   :  { %7286 = vmatprep.subr.mxu0 %v8137_v30  ;;  %v4404_v47 = vpop.f32.mrf.mxu1 }
0x19d6   :  { %7287 = vmatpush3.msra.mxu0 %v8137_v30  ;;  %7281 = vmatprep.mubr.msk.f32.mxu1 %vm83_vm0, %v4404_v47  ;;  %v7498_v47 = vld [vmem:[%s8349_s1 + $0x78] sm:$0xff] }
0x19d7   :  { %7291 = vmatprep.subr.mxu0 %v6398_v45  ;;  %7282 = vmatmul.mubr.msk.f32.vlgmr.msra.gmra.mxu1 %vm83_vm0, %v7272_v44 }
0x19d8   :  { %7289 = vmatmul.mubr.msk.f32.vlgmr.msra.gmra.mxu0 %vm331_vm1, %v7490_v35  ;;  %7303 = vmatpush3.msra.mxu1 %v8134_v28  ;;  %v7500_v35 = vld [vmem:[%s8349_s1 + $0x88] sm:$0xff] }
0x19d9   :  { %7292 = vmatpush3.msra.mxu0 %v6398_v45  ;;  %7304 = vmatprep.subr.mxu1 %v8137_v30  ;;  %v6429_v45 = vunpack.c.l.bf16 %v6522_v27 }
0x19da   :  { %7293 = vmatprep.subr.mxu0 %v6397_v51  ;;  %7305 = vmatpush3.msra.mxu1 %v8137_v30 }
0x19db   :  { %7294 = vmatpush3.msra.mxu0 %v6397_v51  ;;  %7306 = vmatprep.mubr.msk.f32.mxu1 %vm331_vm1, %v7491_v60  ;;  %v7499_v51 = vld [vmem:[%s8349_s1 + $0x80] sm:$0xff]  ;;  %v6434_v60 = vunpack.c.h.bf16 %v6523_v59 }
0x19dc   :  { %7295 = vmatprep.subr.mxu0 %v6394_v55  ;;  %7309 = vmatprep.subr.mxu1 %v6406_v56 }
0x19dd   :  { %7296 = vmatpush3.msra.mxu0 %v6394_v55  ;;  %7307 = vmatmul.mubr.msk.f32.vlgmr.msra.gmra.mxu1 %vm331_vm1, %v7492_v62  ;;  %v6524_v55 = vld [vmem:[%s8354_s6 + $0x108] sm:$0xff]  }
0x19de   :  { %7310 = vmatpush3.msra.mxu1 %v6406_v56  ;;  %7297 = vmatprep.subr.mxu0 %v6393_v57  ;;  %v6438_v56 = vunpack.c.h.bf16 %v6524_v55 }
0x19df   :  { %7311 = vmatprep.subr.mxu1 %v6405_v61  ;;  %7298 = vmatpush3.msra.mxu0 %v6393_v57  ;;  %v6437_v57 = vunpack.c.l.bf16 %v6524_v55 }
0x19e0   :  { %7312 = vmatpush3.msra.mxu1 %v6405_v61  ;;  %7320 = vmatprep.subr.mxu0 %v8134_v28  ;;  %v6433_v61 = vunpack.c.l.bf16 %v6523_v59 }
0x19e1   :  { %7313 = vmatprep.subr.mxu1 %v6402_v63 }
0x19e2   :  { %7314 = vmatpush3.msra.mxu1 %v6402_v63 }
0x19e3   :  { %7315 = vmatprep.subr.mxu1 %v6401_v0 }
0x19e4   :  { %7316 = vmatpush3.msra.mxu1 %v6401_v0 }
0x19e5   :  { %7338 = vmatprep.subr.mxu1 %v8134_v28 }
0x1a93   :  { %v7265_v2 = vpop.f32.mrf.mxu0 }
0x1a94   :  { %v4337_v4 = vadd.f32 %v7265_v2, %v6086_v1 }
0x1a95   :  { %v4327_v3 = vpop.f32.mrf.mxu0 }
0x1a96   :  { %v4336_v6 = vadd.f32 %v6086_v1, %v4327_v3 }
0x1a97   :  { %v7283_v5 = vpop.f32.mrf.mxu1 }
0x1a98   :  { %v4504_v7 = vadd.f32 %v7283_v5, %v4337_v4  ;;  %v7290_v9 = vpop.f32.mrf.mxu0 }
0x1a99   :  { %v4494_v58 = vpop.f32.mrf.mxu1 }
0x1a9a   :  { %v4503_v10 = vadd.f32 %v4494_v58, %v4336_v6  ;;  %v4571_v11 = vpop.f32.mrf.mxu0 }
0x1a9b   :  { %7299 = vmatprep.mubr.msk.f32.mxu0 %vm83_vm0, %v4571_v11  ;;  %v6526_v11 = vld [vmem:[%s8354_s6 + $0x118] sm:$0xff]  }
0x1a9c   :  { %7300 = vmatmul.mubr.msk.f32.vlgmr.msra.gmra.mxu0 %vm83_vm0, %v7290_v9  ;;  %v7501_v9 = vld [vmem:[%s8349_s1 + $0x90] sm:$0xff] }
0x1a9d   :  { %v7308_v14 = vpop.f32.mrf.mxu1  ;;  %7321 = vmatpush3.msra.mxu0 %v8134_v28  ;;  %7324 = vmatprep.mubr.msk.f32.mxu0 %vm331_vm1, %v7493_v15  ;;  %v6525_v15 = vld [vmem:[%s8354_s6 + $0x110] sm:$0xff]  }
0x1a9e   :  { %7322 = vmatprep.subr.mxu0 %v8137_v30  ;;  %v6442_v16 = vunpack.c.h.bf16 %v6525_v15 }
0x1a9f   :  { %v4738_v17 = vpop.f32.mrf.mxu1  ;;  %7323 = vmatpush3.msra.mxu0 %v8137_v30 }
0x1aa0   :  { %7317 = vmatprep.mubr.msk.f32.mxu1 %vm83_vm0, %v4738_v17  ;;  %7327 = vmatprep.subr.mxu0 %v6414_v12  ;;  %v6441_v17 = vunpack.c.l.bf16 %v6525_v15 }
0x1aa1   :  { %7318 = vmatmul.mubr.msk.f32.vlgmr.msra.gmra.mxu1 %vm83_vm0, %v7308_v14  ;;  %7325 = vmatmul.mubr.msk.f32.vlgmr.msra.gmra.mxu0 %vm331_vm1, %v7494_v20  ;;  %v6445_v14 = vunpack.c.l.bf16 %v6526_v11 }
0x1aa2   :  { %7328 = vmatpush3.msra.mxu0 %v6414_v12  ;;  %7339 = vmatpush3.msra.mxu1 %v8134_v28  ;;  %v6446_v12 = vunpack.c.h.bf16 %v6526_v11 }
0x1aa3   :  { %7329 = vmatprep.subr.mxu0 %v6413_v18  ;;  %7340 = vmatprep.subr.mxu1 %v8137_v30 }
0x1aa4   :  { %7330 = vmatpush3.msra.mxu0 %v6413_v18  ;;  %7341 = vmatpush3.msra.mxu1 %v8137_v30  ;;  %v6530_v18 = vld [vmem:[%s8355_s7 + $0x38] sm:$0xff]  }
0x1aa5   :  { %7331 = vmatprep.subr.mxu0 %v6410_v21  ;;  %7342 = vmatprep.mubr.msk.f32.mxu1 %vm331_vm1, %v7495_v32  ;;  %v6462_v20 = vunpack.c.h.bf16 %v6530_v18 }
0x1aa6   :  { %7345 = vmatprep.subr.mxu1 %v6422_v22  ;;  %7332 = vmatpush3.msra.mxu0 %v6410_v21  ;;  %v6461_v21 = vunpack.c.l.bf16 %v6530_v18 }
0x1aa7   :  { %7343 = vmatmul.mubr.msk.f32.vlgmr.msra.gmra.mxu1 %vm331_vm1, %v7496_v13  ;;  %7333 = vmatprep.subr.mxu0 %v6409_v23 }
0x1aa8   :  { %7346 = vmatpush3.msra.mxu1 %v6422_v22  ;;  %7334 = vmatpush3.msra.mxu0 %v6409_v23  ;;  %v6458_v22 = vunpack.c.h.bf16 %v6529_v19  ;;  %v6457_v23 = vunpack.c.l.bf16 %v6529_v19 }
0x1aa9   :  { %7347 = vmatprep.subr.mxu1 %v6421_v54  ;;  %7356 = vmatprep.subr.mxu0 %v8134_v28 }
0x1aaa   :  { %7348 = vmatpush3.msra.mxu1 %v6421_v54 }
0x1aab   :  { %7349 = vmatprep.subr.mxu1 %v6418_v25 }
0x1aac   :  { %7350 = vmatpush3.msra.mxu1 %v6418_v25 }
0x1aad   :  { %7351 = vmatprep.subr.mxu1 %v6417_v8 }
0x1aae   :  { %7352 = vmatpush3.msra.mxu1 %v6417_v8 }
0x1aaf   :  { %7374 = vmatprep.subr.mxu1 %v8134_v28 }
0x1b5c   :  { %v7301_v26 = vpop.f32.mrf.mxu0 }
0x1b5d   :  { %v4671_v29 = vadd.f32 %v7301_v26, %v4504_v7  ;;  %v6528_v26 = vld [vmem:[%s8355_s7 + $0x28] sm:$0xff]  }
0x1b5e   :  { %v4661_v33 = vpop.f32.mrf.mxu0 }
0x1b5f   :  { %v4670_v34 = vadd.f32 %v4661_v33, %v4503_v10  ;;  %v7502_v10 = vld [vmem:[%s8349_s1 + $0x98] sm:$0xff]  ;;  %v6453_v33 = vunpack.c.l.bf16 %v6528_v26 }
0x1b61   :  { %v7319_v36 = vpop.f32.mrf.mxu1  ;;  %v7326_v31 = vpop.f32.mrf.mxu0 }
0x1b62   :  { %v4838_v37 = vadd.f32 %v7319_v36, %v4671_v29  ;;  %v6454_v29 = vunpack.c.h.bf16 %v6528_v26 }
0x1b63   :  { %v4828_v38 = vpop.f32.mrf.mxu1  ;;  %v4905_v39 = vpop.f32.mrf.mxu0 }
0x1b64   :  { %v4837_v40 = vadd.f32 %v4828_v38, %v4670_v34  ;;  %7335 = vmatprep.mubr.msk.f32.mxu0 %vm83_vm0, %v4905_v39  ;;  %v6527_v34 = vld [vmem:[%s8355_s7 + $0x20] sm:$0xff]  }
0x1b65   :  { %7336 = vmatmul.mubr.msk.f32.vlgmr.msra.gmra.mxu0 %vm83_vm0, %v7326_v31  ;;  %v6450_v36 = vunpack.c.h.bf16 %v6527_v34  ;;  %v6449_v31 = vunpack.c.l.bf16 %v6527_v34 }
0x1b66   :  { %7357 = vmatpush3.msra.mxu0 %v8134_v28  ;;  %7360 = vmatprep.mubr.msk.f32.mxu0 %vm331_vm1, %v7497_v42 }
0x1b67   :  { %v7344_v44 = vpop.f32.mrf.mxu1  ;;  %7358 = vmatprep.subr.mxu0 %v8137_v30 }
0x1b68   :  { %7359 = vmatpush3.msra.mxu0 %v8137_v30 }
0x1b69   :  { %v5072_v46 = vpop.f32.mrf.mxu1  ;;  %7363 = vmatprep.subr.mxu0 %v6430_v41  ;;  %7361 = vmatmul.mubr.msk.f32.vlgmr.msra.gmra.mxu0 %vm331_vm1, %v7498_v47 }
0x1b6a   :  { %7353 = vmatprep.mubr.msk.f32.mxu1 %vm83_vm0, %v5072_v46  ;;  %7364 = vmatpush3.msra.mxu0 %v6430_v41  ;;  %v6168_v46 = vld [vmem:[%s8357_s9 + $0x9] ss:$0 sm:$0xff] }
0x1b6b   :  { %7354 = vmatmul.mubr.msk.f32.vlgmr.msra.gmra.mxu1 %vm83_vm0, %v7344_v44  ;;  %7365 = vmatprep.subr.mxu0 %v6429_v45 }
0x1b6c   :  { %7375 = vmatpush3.msra.mxu1 %v8134_v28  ;;  %7366 = vmatpush3.msra.mxu0 %v6429_v45 }
0x1b6d   :  { %7376 = vmatprep.subr.mxu1 %v8137_v30  ;;  %7367 = vmatprep.subr.mxu0 %v6426_v48 }
0x1b6e   :  { %7377 = vmatpush3.msra.mxu1 %v8137_v30  ;;  %7378 = vmatprep.mubr.msk.f32.mxu1 %vm331_vm1, %v7499_v51 }
0x1b6f   :  { %7368 = vmatpush3.msra.mxu0 %v6426_v48  ;;  %7379 = vmatmul.mubr.msk.f32.vlgmr.msra.gmra.mxu1 %vm331_vm1, %v7500_v35 }
0x1b70   :  { %7369 = vmatprep.subr.mxu0 %v6425_v49  ;;  %7381 = vmatprep.subr.mxu1 %v6438_v56 }
0x1b71   :  { %7370 = vmatpush3.msra.mxu0 %v6425_v49  ;;  %7382 = vmatpush3.msra.mxu1 %v6438_v56 }
0x1b72   :  { %7392 = vmatprep.subr.mxu0 %v8134_v28  ;;  %7383 = vmatprep.subr.mxu1 %v6437_v57 }
0x1b73   :  { %7384 = vmatpush3.msra.mxu1 %v6437_v57 }
0x1b74   :  { %7385 = vmatprep.subr.mxu1 %v6434_v60 }
0x1b75   :  { %7386 = vmatpush3.msra.mxu1 %v6434_v60 }
0x1b76   :  { %7387 = vmatprep.subr.mxu1 %v6433_v61 }
0x1b77   :  { %7388 = vmatpush3.msra.mxu1 %v6433_v61 }
0x1b78   :  { %7410 = vmatprep.subr.mxu1 %v6462_v20 }
0x1c25   :  { %v7337_v62 = vpop.f32.mrf.mxu0 }
0x1c26   :  { %v5005_v63 = vadd.f32 %v7337_v62, %v4838_v37 }
0x1c27   :  { %v4995_v0 = vpop.f32.mrf.mxu0 }
0x1c28   :  { %v5004_v1 = vadd.f32 %v4995_v0, %v4837_v40 }
0x1c29   :  { %v7362_v2 = vpop.f32.mrf.mxu0 }
0x1c2b   :  { %v7355_v3 = vpop.f32.mrf.mxu1  ;;  %v5239_v4 = vpop.f32.mrf.mxu0 }
0x1c2c   :  { %v5172_v5 = vadd.f32 %v7355_v3, %v5005_v63  ;;  %7371 = vmatprep.mubr.msk.f32.mxu0 %vm83_vm0, %v5239_v4 }
0x1c2d   :  { %v5162_v6 = vpop.f32.mrf.mxu1  ;;  %7372 = vmatmul.mubr.msk.f32.vlgmr.msra.gmra.mxu0 %vm83_vm0, %v7362_v2 }
0x1c2e   :  { %v5171_v7 = vadd.f32 %v5162_v6, %v5004_v1  ;;  %7393 = vmatpush3.msra.mxu0 %v8134_v28  ;;  %7396 = vmatprep.mubr.msk.f32.mxu0 %vm331_vm1, %v7501_v9 }
0x1c2f   :  { %v7380_v58 = vpop.f32.mrf.mxu1  ;;  %7394 = vmatprep.subr.mxu0 %v8137_v30 }
0x1c30   :  { %7395 = vmatpush3.msra.mxu0 %v8137_v30 }
0x1c31   :  { %v5406_v53 = vpop.f32.mrf.mxu1  ;;  %7397 = vmatmul.mubr.msk.f32.vlgmr.msra.gmra.mxu0 %vm331_vm1, %v7502_v10  ;;  %7399 = vmatprep.subr.mxu0 %v6446_v12 }
0x1c32   :  { %7389 = vmatprep.mubr.msk.f32.mxu1 %vm83_vm0, %v5406_v53  ;;  %7400 = vmatpush3.msra.mxu0 %v6446_v12  ;;  %v6173_v53 = vld [vmem:[%s8357_s9 + $0xa] ss:$0 sm:$0xff]  ;;  %v6174_v12 = vld [vmem:[%s8357_s9 + $0xb] ss:$0 sm:$0xff] }
0x1c33   :  { %7390 = vmatmul.mubr.msk.f32.vlgmr.msra.gmra.mxu1 %vm83_vm0, %v7380_v58  ;;  %7401 = vmatprep.subr.mxu0 %v6445_v14 }
0x1c34   :  { %7402 = vmatpush3.msra.mxu0 %v6445_v14  ;;  %7411 = vmatpush3.msra.mxu1 %v6462_v20 }
0x1c35   :  { %7403 = vmatprep.subr.mxu0 %v6442_v16  ;;  %7412 = vmatprep.subr.mxu1 %v6461_v21 }
0x1c36   :  { %7404 = vmatpush3.msra.mxu0 %v6442_v16  ;;  %7413 = vmatpush3.msra.mxu1 %v6461_v21 }
0x1c37   :  { %7405 = vmatprep.subr.mxu0 %v6441_v17  ;;  %7414 = vmatprep.subr.mxu1 %v6458_v22 }
0x1c38   :  { %7406 = vmatpush3.msra.mxu0 %v6441_v17  ;;  %7415 = vmatpush3.msra.mxu1 %v6458_v22 }
0x1c39   :  { %7416 = vmatprep.subr.mxu1 %v6457_v23 }
0x1c3a   :  { %7417 = vmatpush3.msra.mxu1 %v6457_v23 }
0x1c3b   :  { %7418 = vmatprep.subr.mxu1 %v6454_v29 }
0x1c3c   :  { %7419 = vmatpush3.msra.mxu1 %v6454_v29 }
0x1c3d   :  { %7420 = vmatprep.subr.mxu1 %v6453_v33 }
0x1c3e   :  { %7421 = vmatpush3.msra.mxu1 %v6453_v33 }
0x1c3f   :  { %7422 = vmatprep.subr.mxu1 %v6450_v36 }
0x1c40   :  { %7423 = vmatpush3.msra.mxu1 %v6450_v36 }
0x1c41   :  { %7424 = vmatprep.subr.mxu1 %v6449_v31 }
0x1c42   :  { %7425 = vmatpush3.msra.mxu1 %v6449_v31 }
0x1ced   :  { %v7373_v24 = vpop.f32.mrf.mxu0 }
0x1cee   :  { %v5339_v32 = vadd.f32 %v7373_v24, %v5172_v5 }
0x1cef   :  { %v5329_v54 = vpop.f32.mrf.mxu0 }
0x1cf0   :  { %v5338_v13 = vadd.f32 %v5329_v54, %v5171_v7 }
0x1cf1   :  { %v7398_v25 = vpop.f32.mrf.mxu0 }
0x1cf3   :  { %v5573_v8 = vpop.f32.mrf.mxu0  ;;  %v7391_v37 = vpop.f32.mrf.mxu1 }
0x1cf4   :  { %7407 = vmatprep.mubr.msk.f32.mxu0 %vm83_vm0, %v5573_v8  ;;  %v5506_v38 = vadd.f32 %v7391_v37, %v5339_v32 }
0x1cf5   :  { %7408 = vmatmul.mubr.msk.f32.vlgmr.msra.gmra.mxu0 %vm83_vm0, %v7398_v25  ;;  %v5496_v27 = vpop.f32.mrf.mxu1 }
0x1cf6   :  { %v5505_v40 = vadd.f32 %v5496_v27, %v5338_v13 }
0x1db5   :  { %v7409_v39 = vpop.f32.mrf.mxu0 }
0x1db6   :  { %v5673_v41 = vadd.f32 %v7409_v39, %v5506_v38 }
0x1db7   :  { %v5663_v42 = vpop.f32.mrf.mxu0 }
0x1db8   :  { %v5672_v43 = vadd.f32 %v5663_v42, %v5505_v40  ;;  %v5675_v45 = vmax.f32 %v5673_v41, 0.0 }
0x1dba   :  { %v5674_v44 = vmax.f32 %v5672_v43, 0.0 }
0x1dbc   :  { %7426 = vmatprep.mubr.msk.f32.mxu1 %vm2849_vm2, %v5674_v44 }
0x1dbd   :  { %7427 = vmatmul.mubr.msk.f32.vlgmr.msra.gmra.mxu1 %vm2849_vm2, %v5675_v45 }
0x1e7d   :  { %v7428_v47 = vpop.f32.mrf.mxu1 }
0x1e7e   :  { %v5779_v48 = vadd.f32 %v7428_v47, %v6168_v46 }
0x1e7f   :  { %v5773_v49 = vpop.f32.mrf.mxu1 }
0x1e80   :  { %v5774_v51 = vadd.f32 %v6168_v46, %v5773_v49  ;;  %v5783_v35 = vadd.f32 %v5779_v48, %v8134_v28 }
0x1e82   :  { %v5791_v55 = vsel %vm83_vm0, %v5783_v35, 0.0  ;;  %v5782_v56 = vadd.f32 %v5774_v51, %v8137_v30 }
0x1e83   :  { %5792 = vadd.xlane.f32.xlu1 %v5791_v55 }
0x1e84   :  { %v5788_v57 = vsel %vm83_vm0, %v5782_v56, 0.0 }
0x1e85   :  { %5789 = vadd.xlane.f32.xlu0 %v5788_v57 }
0x1f0c   :  { %v5793_v59 = vpop.xlane.xlu1 %5792 }
0x1f0d   :  { %v5795_v60 = vmul.f32 0.03125, %v5793_v59 }
0x1f0e   :  { %v5790_v61 = vpop.xlane.xlu0 %5789 }
0x1f0f   :  { %v5797_v62 = vsub.f32 %v5783_v35, %v5795_v60  ;;  %v5794_v63 = vmul.f32 0.03125, %v5790_v61 }
0x1f11   :  { %v5796_v0 = vsub.f32 %v5782_v56, %v5794_v63  ;;  %v5799_v1 = vmul.f32 %v5797_v62, %v5797_v62 }
0x1f13   :  { %v5803_v2 = vsel %vm83_vm0, %v5799_v1, 0.0  ;;  %v5798_v3 = vmul.f32 %v5796_v0, %v5796_v0 }
0x1f14   :  { %5804 = vadd.xlane.f32.xlu1 %v5803_v2 }
0x1f15   :  { %v5800_v28 = vsel %vm83_vm0, %v5798_v3, 0.0 }
0x1f16   :  { %5801 = vadd.xlane.f32.xlu0 %v5800_v28 }
0x1f9d   :  { %v5805_v4 = vpop.xlane.xlu1 %5804 }
0x1f9e   :  { %v5807_v30 = vmul.f32 0.03125, %v5805_v4 }
0x1f9f   :  { %v5802_v5 = vpop.xlane.xlu0 %5801 }
0x1fa0   :  { %v5809_v6 = vadd.f32 1e-05, %v5807_v30  ;;  %v5806_v7 = vmul.f32 0.03125, %v5802_v5 }
0x1fa2   :  { %7479 = vrsqrt.f32 %v5809_v6  ;;  %v5808_v9 = vadd.f32 1e-05, %v5806_v7 }
0x1fa4   :  { %7481 = vrsqrt.f32 %v5808_v9 }
0x1faf   :  { %v7480_v58 = vpop.eup %7479 }
0x1fb0   :  { %v5813_v10 = vmul.f32 %v7480_v58, %v5797_v62 }
0x1fb1   :  { %v7482_v11 = vpop.eup %7481 }
0x1fb2   :  { %v5812_v14 = vmul.f32 %v7482_v11, %v5796_v0  ;;  %v5821_v15 = vmul.f32 %v6173_v53, %v5813_v10 }
0x1fb4   :  { %v5820_v16 = vmul.f32 %v6173_v53, %v5812_v14  ;;  %v5829_v17 = vadd.f32 %v6174_v12, %v5821_v15 }
0x1fb6   :  { %v5828_v18 = vadd.f32 %v6174_v12, %v5820_v16  ;;  %v5831_v19 = vmul.f32 %v5829_v17, %v7757_v50 }
0x1fb8   :  { %v5830_v20 = vmul.f32 %v5828_v18, %v7759_v52  ;;  %5833 = vst.msk [vmem:[#allocation2 + $0x8] sm:$0xff] %vm83_vm0, %v5831_v19 }
0x1fba   :  { %5832 = vst.msk [vmem:[#allocation2] sm:$0xff] %vm83_vm0, %v5830_v20 }
0x1fbb   :  { %7514 = shalt.err (!%p7511_p4)
}
0x1fbc   :  { %s7527_s9 = smov 128   ;;  %s7528_s8 = smov 8  }
0x1fbd   :  { %5845 = dma.vmem_to_hbm [thread:$0]  %s5840_s19, 256, %s8358_s10, [#allocation3], %s7527_s9, %s7527_s9, %s7528_s8  }
0x1fbe   :  { %7523 = dma.done.wait [#allocation3], 256  }
0x1fbf   :  { %7524 = vsyncadd [#allocation3], 4294967040 }
0x1fc0   :  { %5849 = vsyncpa [#allocation3], 1 }

</bundles_post_ra>
